<compile_context>
chip_gen: v6e
topology: v6e:2x2x1
jax: 0.10.0
libtpu: 0.0.40
codegen_flags: <defaults>
</compile_context>

<pallas_src>
import functools

import jax
import jax.numpy as jnp
from jax.experimental import pallas as pl
from jax.experimental.pallas import tpu as pltpu


# ----------------------------------------------------------------------------
# helpers
# ----------------------------------------------------------------------------
def _ceil_to(x, m):
    return ((x + m - 1) // m) * m


def _tile(m, k, cout):
    """Pick (TM, TK) and padded sizes (Mp, Kp, Cp) respecting (8,128) layout."""
    tm = min(512, _ceil_to(max(m, 1), 8))
    tk = min(512, _ceil_to(max(k, 1), 128))
    mp = _ceil_to(m, tm)
    kp = _ceil_to(k, tk)
    cp = _ceil_to(max(cout, 1), 128)
    return tm, tk, mp, kp, cp


# ----------------------------------------------------------------------------
# Pallas kernels
# ----------------------------------------------------------------------------
def _conv_gemm_kernel(a_ref, b_ref, o_ref, stats_ref, acc_ref, *, apply_lrelu, alpha):
    """Tiled GEMM with f32 accumulator, optional fused LeakyReLU, and fused
    per-channel sum / sum-of-squares (BatchNorm statistics) in the epilogue."""
    k = pl.program_id(1)

    @pl.when(k == 0)
    def _init():
        acc_ref[...] = jnp.zeros_like(acc_ref)

    acc_ref[...] += jnp.dot(a_ref[...], b_ref[...], preferred_element_type=jnp.float32)

    @pl.when(k == pl.num_programs(1) - 1)
    def _finalize():
        acc = acc_ref[...]
        # BN stats on the (pre-activation) f32 accumulator.  Zero-padded rows /
        # channels contribute 0 to both sums, so no masking is needed.
        s1 = jnp.sum(acc, axis=0, keepdims=True)
        s2 = jnp.sum(acc * acc, axis=0, keepdims=True)
        stats_ref[0, :, :] = jnp.concatenate([s1, s2], axis=0)
        if apply_lrelu:
            acc = jnp.where(acc >= 0.0, acc, alpha * acc)
        o_ref[...] = acc.astype(o_ref.dtype)


def _affine_lrelu_kernel(y_ref, scale_ref, shift_ref, o_ref, *, alpha):
    """y * scale + shift followed by LeakyReLU (the BN 'apply' pass)."""
    y = y_ref[...].astype(jnp.float32) * scale_ref[...] + shift_ref[...]
    o_ref[...] = jnp.where(y >= 0.0, y, alpha * y).astype(o_ref.dtype)


# ----------------------------------------------------------------------------
# Pallas wrappers
# ----------------------------------------------------------------------------
def conv_gemm(a, b, *, tm, tk, apply_lrelu, alpha, out_dtype):
    """a: (Mp, Kp) bf16 patches, b: (Kp, Cp) bf16 weights -> (Mp, Cp) + stats."""
    mp, kp = a.shape
    kp2, cp = b.shape
    assert kp == kp2
    n_m, n_k = mp // tm, kp // tk
    out_isize = jnp.dtype(out_dtype).itemsize

    vmem_need = (2 * (tm * tk * 2 + tk * cp * 2 + tm * cp * out_isize)
                 + tm * cp * 4 + 2 * 2 * cp * 4)
    vmem_limit = int(min(max(2 * vmem_need, 16 * 1024 * 1024), 48 * 1024 * 1024))

    cost = pl.CostEstimate(
        flops=2 * mp * kp * cp,
        transcendentals=0,
        bytes_accessed=mp * kp * 2 + kp * cp * 2 + mp * cp * out_isize + n_m * 2 * cp * 4,
    )

    y, stats = pl.pallas_call(
        functools.partial(_conv_gemm_kernel, apply_lrelu=apply_lrelu, alpha=alpha),
        grid=(n_m, n_k),
        in_specs=[
            pl.BlockSpec((tm, tk), lambda i, k: (i, k)),
            pl.BlockSpec((tk, cp), lambda i, k: (k, 0)),
        ],
        out_specs=[
            pl.BlockSpec((tm, cp), lambda i, k: (i, 0)),
            pl.BlockSpec((1, 2, cp), lambda i, k: (i, 0, 0)),
        ],
        out_shape=[
            jax.ShapeDtypeStruct((mp, cp), out_dtype),
            jax.ShapeDtypeStruct((n_m, 2, cp), jnp.float32),
        ],
        scratch_shapes=[pltpu.VMEM((tm, cp), jnp.float32)],
        compiler_params=pltpu.CompilerParams(
            dimension_semantics=("parallel", "arbitrary"),
            vmem_limit_bytes=vmem_limit,
        ),
        cost_estimate=cost,
    )(a, b)
    return y, stats


def affine_lrelu(y, scale, shift, *, tm, alpha):
    """Tiled per-channel affine (folded BN) + LeakyReLU.  Output bf16 (feeds
    the next layer's bf16 GEMM directly)."""
    mp, cp = y.shape
    n_m = mp // tm
    y_isize = jnp.dtype(y.dtype).itemsize
    return pl.pallas_call(
        functools.partial(_affine_lrelu_kernel, alpha=alpha),
        grid=(n_m,),
        in_specs=[
            pl.BlockSpec((tm, cp), lambda i: (i, 0)),
            pl.BlockSpec((1, cp), lambda i: (0, 0)),
            pl.BlockSpec((1, cp), lambda i: (0, 0)),
        ],
        out_specs=pl.BlockSpec((tm, cp), lambda i: (i, 0)),
        out_shape=jax.ShapeDtypeStruct((mp, cp), jnp.bfloat16),
        compiler_params=pltpu.CompilerParams(
            dimension_semantics=("parallel",),
            vmem_limit_bytes=16 * 1024 * 1024,
        ),
        cost_estimate=pl.CostEstimate(
            flops=3 * mp * cp,
            transcendentals=0,
            bytes_accessed=mp * cp * y_isize + mp * cp * 2 + 2 * cp * 4,
        ),
    )(y, scale.reshape(1, cp).astype(jnp.float32), shift.reshape(1, cp).astype(jnp.float32))


# ----------------------------------------------------------------------------
# Glue (plain JAX, no layout churn: activations stay NHWC)
# ----------------------------------------------------------------------------
def extract_patches_nhwc(x, k, stride, pad):
    """x: (N, H, W, C) -> patches (N*Ho*Wo, k*k*C) with column order (kh, kw, c)."""
    n, h, w, c = x.shape
    if pad:
        x = jnp.pad(x, ((0, 0), (pad, pad), (pad, pad), (0, 0)))
    ho = (h + 2 * pad - k) // stride + 1
    wo = (w + 2 * pad - k) // stride + 1
    taps = []
    for kh in range(k):
        for kw in range(k):
            taps.append(x[:, kh:kh + stride * ho:stride, kw:kw + stride * wo:stride, :])
    p = jnp.concatenate(taps, axis=-1)            # (N, Ho, Wo, k*k*C)
    return p.reshape(n * ho * wo, k * k * c), ho, wo


def _bn_scale_shift(stats, m_true, gamma, beta, cp, eps):
    """Fold batch-stats BatchNorm into a per-channel (scale, shift)."""
    s = jnp.sum(stats, axis=0)                    # (2, Cp)
    mean = s[0] / float(m_true)
    var = jnp.maximum(s[1] / float(m_true) - mean * mean, 0.0)   # biased variance
    inv = jax.lax.rsqrt(var + eps)
    g = jnp.pad(gamma.astype(jnp.float32), (0, cp - gamma.shape[0]))
    b = jnp.pad(beta.astype(jnp.float32), (0, cp - beta.shape[0]))
    scale = g * inv
    shift = b - mean * scale
    return scale, shift


def conv_block(x_nhwc, w_oihw, *, stride, pad, mode, gamma=None, beta=None,
               eps=1e-5, alpha=0.2):
    """One conv layer.  mode: 'lrelu' (fused), 'bn_lrelu', or 'none'."""
    n = x_nhwc.shape[0]
    cout, cin, kh, kw = w_oihw.shape
    patches, ho, wo = extract_patches_nhwc(x_nhwc, kh, stride, pad)
    m, k = patches.shape
    tm, tk, mp, kp, cp = _tile(m, k, cout)

    a = jnp.pad(patches.astype(jnp.bfloat16), ((0, mp - m), (0, kp - k)))
    w_mat = jnp.transpose(w_oihw, (2, 3, 1, 0)).reshape(k, cout)   # (kh,kw,cin) x cout
    b = jnp.pad(w_mat.astype(jnp.bfloat16), ((0, kp - k), (0, cp - cout)))

    fuse_lrelu = (mode == "lrelu")
    out_dtype = jnp.bfloat16 if fuse_lrelu else jnp.float32
    y, stats = conv_gemm(a, b, tm=tm, tk=tk, apply_lrelu=fuse_lrelu,
                         alpha=alpha, out_dtype=out_dtype)

    if mode == "bn_lrelu":
        scale, shift = _bn_scale_shift(stats, m, gamma, beta, cp, eps)
        y = affine_lrelu(y, scale, shift, tm=tm, alpha=alpha)

    return y[:m, :cout].reshape(n, ho, wo, cout)


# ----------------------------------------------------------------------------
# Discriminator forward
# ----------------------------------------------------------------------------
def discriminator_forward(x_nchw, params, *, eps=1e-5, alpha=0.2):
    # single layout conversion at the model boundary (NCHW -> NHWC)
    x = jnp.transpose(x_nchw, (0, 2, 3, 1)).astype(jnp.float32)

    # layer 1: conv(s=2,p=1) + LeakyReLU(0.2)  (fused in the GEMM epilogue)
    x = conv_block(x, params["w1"], stride=2, pad=1, mode="lrelu", alpha=alpha)

    # layers 2-4: conv(s=2,p=1) + BatchNorm2d (batch stats) + LeakyReLU(0.2)
    for idx in (2, 3, 4):
        x = conv_block(x, params[f"w{idx}"], stride=2, pad=1, mode="bn_lrelu",
                       gamma=params[f"g{idx}"], beta=params[f"b{idx}"],
                       eps=eps, alpha=alpha)

    # layer 5: conv(k=4, s=1, p=0) -> (N, 1, 1, 1)
    x = conv_block(x, params["w5"], stride=1, pad=0, mode="none")

    return x.reshape(-1).astype(jnp.float32)      # output.view(-1)


def init_params(key, n_channels=3, n_fmaps=64):
    ks = jax.random.split(key, 5)
    f = n_fmaps

    def w(k, co, ci):
        return (0.02 * jax.random.normal(k, (co, ci, 4, 4))).astype(jnp.float32)

    return {
        "w1": w(ks[0], f, n_channels),
        "w2": w(ks[1], 2 * f, f),
        "w3": w(ks[2], 4 * f, 2 * f),
        "w4": w(ks[3], 8 * f, 4 * f),
        "w5": w(ks[4], 1, 8 * f),
        # BatchNorm2d default init: weight=1, bias=0 (running stats not updated here)
        "g2": jnp.ones((2 * f,), jnp.float32), "b2": jnp.zeros((2 * f,), jnp.float32),
        "g3": jnp.ones((4 * f,), jnp.float32), "b3": jnp.zeros((4 * f,), jnp.float32),
        "g4": jnp.ones((8 * f,), jnp.float32), "b4": jnp.zeros((8 * f,), jnp.float32),
    }


if __name__ == "__main__":
    key = jax.random.PRNGKey(0)
    k_x, k_p = jax.random.split(key)

    # Standard DCGAN discriminator geometry: 64x64 input so the final 4x4/valid
    # conv reduces to 1x1.  Small channels for the smoke test.
    N, C, H, W = 2, 3, 64, 64
    x = jax.random.normal(k_x, (N, C, H, W), dtype=jnp.float32)
    params = init_params(k_p, n_channels=C, n_fmaps=8)

    fwd = jax.jit(discriminator_forward)
    out = jax.block_until_ready(fwd(x, params))

    assert out.shape == (N,), f"unexpected output shape {out.shape}"
    assert bool(jnp.all(jnp.isfinite(out))), "non-finite output"
    print("KERNEL_OK")
</pallas_src>

<mosaic_0001>
module attributes {stable_mosaic.version = 11 : i64} {
  func.func @_conv_gemm_kernel(%arg0: i32, %arg1: i32, %arg2: memref<512x128xbf16, #tpu.memory_space<vmem>>, %arg3: memref<128x128xbf16, #tpu.memory_space<vmem>>, %arg4: memref<512x128xbf16, #tpu.memory_space<vmem>>, %arg5: memref<1x2x128xf32, #tpu.memory_space<vmem>>, %arg6: memref<512x128xf32, #tpu.memory_space<vmem>>) attributes {dimension_semantics = [#tpu.dimension_semantics<parallel>, #tpu.dimension_semantics<arbitrary>], iteration_bounds = array<i64: 4, 1>, scalar_prefetch = 0 : i64, scratch_operands = 1 : i64, tpu.core_type = #tpu.core_type<tc>, window_params = [{transform_indices = @transform_0, window_bounds = array<i64: 512, 128>}, {transform_indices = @transform_1, window_bounds = array<i64: 128, 128>}, {transform_indices = @transform_2, window_bounds = array<i64: 512, 128>}, {transform_indices = @transform_3, window_bounds = array<i64: 1, 2, 128>}]} {
    %c0_i32 = arith.constant 0 : i32
    %0 = arith.cmpi eq, %arg1, %c0_i32 : i32
    %1 = arith.extui %0 : i1 to i32
    %c0_i32_0 = arith.constant 0 : i32
    %2 = arith.cmpi ne, %1, %c0_i32_0 : i32
    scf.if %2 {
      %cst_10 = arith.constant 0.000000e+00 : f32
      %12 = vector.broadcast %cst_10 : f32 to vector<512x128xf32>
      %c0_11 = arith.constant 0 : index
      %c0_12 = arith.constant 0 : index
      %13 = vector.load %arg6[%c0_11, %c0_12] : memref<512x128xf32, #tpu.memory_space<vmem>>, vector<512x128xf32>
      tpu.vector_store %arg6[%c0_11, %c0_12], %12 {strides = array<i32>} : memref<512x128xf32, #tpu.memory_space<vmem>>, vector<512x128xf32>,
    } else {
    }
    %c0 = arith.constant 0 : index
    %c0_1 = arith.constant 0 : index
    %3 = vector.load %arg6[%c0, %c0_1] : memref<512x128xf32, #tpu.memory_space<vmem>>, vector<512x128xf32>
    %c0_2 = arith.constant 0 : index
    %c0_3 = arith.constant 0 : index
    %4 = vector.load %arg2[%c0_2, %c0_3] : memref<512x128xbf16, #tpu.memory_space<vmem>>, vector<512x128xbf16>
    %c0_4 = arith.constant 0 : index
    %c0_5 = arith.constant 0 : index
    %5 = vector.load %arg3[%c0_4, %c0_5] : memref<128x128xbf16, #tpu.memory_space<vmem>>, vector<128x128xbf16>
    %cst = arith.constant dense<0.000000e+00> : vector<512x128xf32>
    %6 = tpu.matmul %4, %5, %cst {dimension_numbers = #tpu.dot_dimension_numbers<[1], [0], [0], [1], [0, 0, 1, 1], [], []>} : vector<512x128xbf16>, vector<128x128xbf16>, vector<512x128xf32> -> vector<512x128xf32>
    %7 = arith.addf %3, %6 : vector<512x128xf32>
    %c0_6 = arith.constant 0 : index
    %c0_7 = arith.constant 0 : index
    %8 = vector.load %arg6[%c0_6, %c0_7] : memref<512x128xf32, #tpu.memory_space<vmem>>, vector<512x128xf32>
    tpu.vector_store %arg6[%c0_6, %c0_7], %7 {strides = array<i32>} : memref<512x128xf32, #tpu.memory_space<vmem>>, vector<512x128xf32>,
    %c0_i32_8 = arith.constant 0 : i32
    %9 = arith.cmpi eq, %arg1, %c0_i32_8 : i32
    %10 = arith.extui %9 : i1 to i32
    %c0_i32_9 = arith.constant 0 : i32
    %11 = arith.cmpi ne, %10, %c0_i32_9 : i32
    scf.if %11 {
      %c0_10 = arith.constant 0 : index
      %c0_11 = arith.constant 0 : index
      %12 = vector.load %arg6[%c0_10, %c0_11] : memref<512x128xf32, #tpu.memory_space<vmem>>, vector<512x128xf32>
      %cst_12 = arith.constant dense<0.000000e+00> : vector<128xf32>
      %13 = vector.multi_reduction <add>, %12, %cst_12 [0] : vector<512x128xf32> to vector<128xf32>
      %14 = vector.shape_cast %13 : vector<128xf32> to vector<1x128xf32>
      %15 = arith.mulf %12, %12 : vector<512x128xf32>
      %cst_13 = arith.constant dense<0.000000e+00> : vector<128xf32>
      %16 = vector.multi_reduction <add>, %15, %cst_13 [0] : vector<512x128xf32> to vector<128xf32>
      %17 = vector.shape_cast %16 : vector<128xf32> to vector<1x128xf32>
      %18 = tpu.concatenate %14, %17 in 0 : vector<1x128xf32>, vector<1x128xf32> -> vector<2x128xf32>
      %c0_14 = arith.constant 0 : index
      %c0_15 = arith.constant 0 : index
      %c0_16 = arith.constant 0 : index
      %19 = vector.load %arg5[%c0_14, %c0_15, %c0_16] : memref<1x2x128xf32, #tpu.memory_space<vmem>>, vector<1x2x128xf32>
      %20 = vector.shape_cast %19 : vector<1x2x128xf32> to vector<2x128xf32>
      %21 = vector.shape_cast %18 : vector<2x128xf32> to vector<1x2x128xf32>
      tpu.vector_store %arg5[%c0_14, %c0_15, %c0_16], %21 {strides = array<i32>} : memref<1x2x128xf32, #tpu.memory_space<vmem>>, vector<1x2x128xf32>,
      %cst_17 = arith.constant 0.000000e+00 : f32
      %22 = vector.broadcast %cst_17 : f32 to vector<512x128xf32>
      %23 = arith.cmpf oge, %12, %22 : vector<512x128xf32>
      %cst_18 = arith.constant 2.000000e-01 : f32
      %24 = vector.broadcast %cst_18 : f32 to vector<512x128xf32>
      %25 = arith.mulf %24, %12 : vector<512x128xf32>
      %26 = arith.select %23, %12, %25 : vector<512x128xi1>, vector<512x128xf32>
      %27 = arith.truncf %26 : vector<512x128xf32> to vector<512x128xbf16>
      %c0_19 = arith.constant 0 : index
      %c0_20 = arith.constant 0 : index
      %28 = vector.load %arg4[%c0_19, %c0_20] : memref<512x128xbf16, #tpu.memory_space<vmem>>, vector<512x128xbf16>
      tpu.vector_store %arg4[%c0_19, %c0_20], %27 {strides = array<i32>} : memref<512x128xbf16, #tpu.memory_space<vmem>>, vector<512x128xbf16>,
    } else {
    }
    return
  }
  func.func @transform_0(%arg0: i32, %arg1: i32) -> (i32, i32) {
    %c0_i32 = arith.constant 0 : i32
    return %arg0, %arg1 : i32, i32
  }
  func.func @transform_1(%arg0: i32, %arg1: i32) -> (i32, i32) {
    %c0_i32 = arith.constant 0 : i32
    %c0_i32_0 = arith.constant 0 : i32
    return %arg1, %c0_i32 : i32, i32
  }
  func.func @transform_2(%arg0: i32, %arg1: i32) -> (i32, i32) {
    %c0_i32 = arith.constant 0 : i32
    %c0_i32_0 = arith.constant 0 : i32
    return %arg0, %c0_i32 : i32, i32
  }
  func.func @transform_3(%arg0: i32, %arg1: i32) -> (i32, i32, i32) {
    %c0_i32 = arith.constant 0 : i32
    %c0_i32_0 = arith.constant 0 : i32
    %c0_i32_1 = arith.constant 0 : i32
    return %arg0, %c0_i32, %c0_i32_0 : i32, i32, i32
  }
}

module attributes {stable_mosaic.version = 11 : i64} {
  func.func @_conv_gemm_kernel(%arg0: i32, %arg1: i32, %arg2: memref<512x128xbf16, #tpu.memory_space<vmem>>, %arg3: memref<128x128xbf16, #tpu.memory_space<vmem>>, %arg4: memref<512x128xf32, #tpu.memory_space<vmem>>, %arg5: memref<1x2x128xf32, #tpu.memory_space<vmem>>, %arg6: memref<512x128xf32, #tpu.memory_space<vmem>>) attributes {dimension_semantics = [#tpu.dimension_semantics<parallel>, #tpu.dimension_semantics<arbitrary>], iteration_bounds = array<i64: 1, 1>, scalar_prefetch = 0 : i64, scratch_operands = 1 : i64, tpu.core_type = #tpu.core_type<tc>, window_params = [{transform_indices = @transform_0, window_bounds = array<i64: 512, 128>}, {transform_indices = @transform_1, window_bounds = array<i64: 128, 128>}, {transform_indices = @transform_2, window_bounds = array<i64: 512, 128>}, {transform_indices = @transform_3, window_bounds = array<i64: 1, 2, 128>}]} {
    %c0_i32 = arith.constant 0 : i32
    %0 = arith.cmpi eq, %arg1, %c0_i32 : i32
    %1 = arith.extui %0 : i1 to i32
    %c0_i32_0 = arith.constant 0 : i32
    %2 = arith.cmpi ne, %1, %c0_i32_0 : i32
    scf.if %2 {
      %cst_10 = arith.constant 0.000000e+00 : f32
      %12 = vector.broadcast %cst_10 : f32 to vector<512x128xf32>
      %c0_11 = arith.constant 0 : index
      %c0_12 = arith.constant 0 : index
      %13 = vector.load %arg6[%c0_11, %c0_12] : memref<512x128xf32, #tpu.memory_space<vmem>>, vector<512x128xf32>
      tpu.vector_store %arg6[%c0_11, %c0_12], %12 {strides = array<i32>} : memref<512x128xf32, #tpu.memory_space<vmem>>, vector<512x128xf32>,
    } else {
    }
    %c0 = arith.constant 0 : index
    %c0_1 = arith.constant 0 : index
    %3 = vector.load %arg6[%c0, %c0_1] : memref<512x128xf32, #tpu.memory_space<vmem>>, vector<512x128xf32>
    %c0_2 = arith.constant 0 : index
    %c0_3 = arith.constant 0 : index
    %4 = vector.load %arg2[%c0_2, %c0_3] : memref<512x128xbf16, #tpu.memory_space<vmem>>, vector<512x128xbf16>
    %c0_4 = arith.constant 0 : index
    %c0_5 = arith.constant 0 : index
    %5 = vector.load %arg3[%c0_4, %c0_5] : memref<128x128xbf16, #tpu.memory_space<vmem>>, vector<128x128xbf16>
    %cst = arith.constant dense<0.000000e+00> : vector<512x128xf32>
    %6 = tpu.matmul %4, %5, %cst {dimension_numbers = #tpu.dot_dimension_numbers<[1], [0], [0], [1], [0, 0, 1, 1], [], []>} : vector<512x128xbf16>, vector<128x128xbf16>, vector<512x128xf32> -> vector<512x128xf32>
    %7 = arith.addf %3, %6 : vector<512x128xf32>
    %c0_6 = arith.constant 0 : index
    %c0_7 = arith.constant 0 : index
    %8 = vector.load %arg6[%c0_6, %c0_7] : memref<512x128xf32, #tpu.memory_space<vmem>>, vector<512x128xf32>
    tpu.vector_store %arg6[%c0_6, %c0_7], %7 {strides = array<i32>} : memref<512x128xf32, #tpu.memory_space<vmem>>, vector<512x128xf32>,
    %c0_i32_8 = arith.constant 0 : i32
    %9 = arith.cmpi eq, %arg1, %c0_i32_8 : i32
    %10 = arith.extui %9 : i1 to i32
    %c0_i32_9 = arith.constant 0 : i32
    %11 = arith.cmpi ne, %10, %c0_i32_9 : i32
    scf.if %11 {
      %c0_10 = arith.constant 0 : index
      %c0_11 = arith.constant 0 : index
      %12 = vector.load %arg6[%c0_10, %c0_11] : memref<512x128xf32, #tpu.memory_space<vmem>>, vector<512x128xf32>
      %cst_12 = arith.constant dense<0.000000e+00> : vector<128xf32>
      %13 = vector.multi_reduction <add>, %12, %cst_12 [0] : vector<512x128xf32> to vector<128xf32>
      %14 = vector.shape_cast %13 : vector<128xf32> to vector<1x128xf32>
      %15 = arith.mulf %12, %12 : vector<512x128xf32>
      %cst_13 = arith.constant dense<0.000000e+00> : vector<128xf32>
      %16 = vector.multi_reduction <add>, %15, %cst_13 [0] : vector<512x128xf32> to vector<128xf32>
      %17 = vector.shape_cast %16 : vector<128xf32> to vector<1x128xf32>
      %18 = tpu.concatenate %14, %17 in 0 : vector<1x128xf32>, vector<1x128xf32> -> vector<2x128xf32>
      %c0_14 = arith.constant 0 : index
      %c0_15 = arith.constant 0 : index
      %c0_16 = arith.constant 0 : index
      %19 = vector.load %arg5[%c0_14, %c0_15, %c0_16] : memref<1x2x128xf32, #tpu.memory_space<vmem>>, vector<1x2x128xf32>
      %20 = vector.shape_cast %19 : vector<1x2x128xf32> to vector<2x128xf32>
      %21 = vector.shape_cast %18 : vector<2x128xf32> to vector<1x2x128xf32>
      tpu.vector_store %arg5[%c0_14, %c0_15, %c0_16], %21 {strides = array<i32>} : memref<1x2x128xf32, #tpu.memory_space<vmem>>, vector<1x2x128xf32>,
      %c0_17 = arith.constant 0 : index
      %c0_18 = arith.constant 0 : index
      %22 = vector.load %arg4[%c0_17, %c0_18] : memref<512x128xf32, #tpu.memory_space<vmem>>, vector<512x128xf32>
      tpu.vector_store %arg4[%c0_17, %c0_18], %12 {strides = array<i32>} : memref<512x128xf32, #tpu.memory_space<vmem>>, vector<512x128xf32>,
    } else {
    }
    return
  }
  func.func @transform_0(%arg0: i32, %arg1: i32) -> (i32, i32) {
    %c0_i32 = arith.constant 0 : i32
    return %arg0, %arg1 : i32, i32
  }
  func.func @transform_1(%arg0: i32, %arg1: i32) -> (i32, i32) {
    %c0_i32 = arith.constant 0 : i32
    %c0_i32_0 = arith.constant 0 : i32
    return %arg1, %c0_i32 : i32, i32
  }
  func.func @transform_2(%arg0: i32, %arg1: i32) -> (i32, i32) {
    %c0_i32 = arith.constant 0 : i32
    %c0_i32_0 = arith.constant 0 : i32
    return %arg0, %c0_i32 : i32, i32
  }
  func.func @transform_3(%arg0: i32, %arg1: i32) -> (i32, i32, i32) {
    %c0_i32 = arith.constant 0 : i32
    %c0_i32_0 = arith.constant 0 : i32
    %c0_i32_1 = arith.constant 0 : i32
    return %arg0, %c0_i32, %c0_i32_0 : i32, i32, i32
  }
}

module attributes {stable_mosaic.version = 11 : i64} {
  func.func @_affine_lrelu_kernel(%arg0: i32, %arg1: memref<512x128xf32, #tpu.memory_space<vmem>>, %arg2: memref<1x128xf32, #tpu.memory_space<vmem>>, %arg3: memref<1x128xf32, #tpu.memory_space<vmem>>, %arg4: memref<512x128xbf16, #tpu.memory_space<vmem>>) attributes {dimension_semantics = [#tpu.dimension_semantics<parallel>], iteration_bounds = array<i64: 1>, scalar_prefetch = 0 : i64, scratch_operands = 0 : i64, tpu.core_type = #tpu.core_type<tc>, window_params = [{transform_indices = @transform_0, window_bounds = array<i64: 512, 128>}, {pipeline_mode = #tpu.pipeline_mode<synchronous>, transform_indices = @transform_1, window_bounds = array<i64: 1, 128>}, {pipeline_mode = #tpu.pipeline_mode<synchronous>, transform_indices = @transform_2, window_bounds = array<i64: 1, 128>}, {transform_indices = @transform_3, window_bounds = array<i64: 512, 128>}]} {
    %c0 = arith.constant 0 : index
    %c0_0 = arith.constant 0 : index
    %0 = vector.load %arg1[%c0, %c0_0] : memref<512x128xf32, #tpu.memory_space<vmem>>, vector<512x128xf32>
    %c0_1 = arith.constant 0 : index
    %c0_2 = arith.constant 0 : index
    %1 = vector.load %arg2[%c0_1, %c0_2] : memref<1x128xf32, #tpu.memory_space<vmem>>, vector<1x128xf32>
    %2 = vector.broadcast %1 : vector<1x128xf32> to vector<512x128xf32>
    %3 = arith.mulf %0, %2 : vector<512x128xf32>
    %c0_3 = arith.constant 0 : index
    %c0_4 = arith.constant 0 : index
    %4 = vector.load %arg3[%c0_3, %c0_4] : memref<1x128xf32, #tpu.memory_space<vmem>>, vector<1x128xf32>
    %5 = vector.broadcast %4 : vector<1x128xf32> to vector<512x128xf32>
    %6 = arith.addf %3, %5 : vector<512x128xf32>
    %cst = arith.constant 0.000000e+00 : f32
    %7 = vector.broadcast %cst : f32 to vector<512x128xf32>
    %8 = arith.cmpf oge, %6, %7 : vector<512x128xf32>
    %cst_5 = arith.constant 2.000000e-01 : f32
    %9 = vector.broadcast %cst_5 : f32 to vector<512x128xf32>
    %10 = arith.mulf %9, %6 : vector<512x128xf32>
    %11 = arith.select %8, %6, %10 : vector<512x128xi1>, vector<512x128xf32>
    %12 = arith.truncf %11 : vector<512x128xf32> to vector<512x128xbf16>
    %c0_6 = arith.constant 0 : index
    %c0_7 = arith.constant 0 : index
    %13 = vector.load %arg4[%c0_6, %c0_7] : memref<512x128xbf16, #tpu.memory_space<vmem>>, vector<512x128xbf16>
    tpu.vector_store %arg4[%c0_6, %c0_7], %12 {strides = array<i32>} : memref<512x128xbf16, #tpu.memory_space<vmem>>, vector<512x128xbf16>,
    return
  }
  func.func @transform_0(%arg0: i32) -> (i32, i32) {
    %c0_i32 = arith.constant 0 : i32
    %c0_i32_0 = arith.constant 0 : i32
    return %arg0, %c0_i32 : i32, i32
  }
  func.func @transform_1(%arg0: i32) -> (i32, i32) {
    %c0_i32 = arith.constant 0 : i32
    %c0_i32_0 = arith.constant 0 : i32
    %c0_i32_1 = arith.constant 0 : i32
    return %c0_i32, %c0_i32_0 : i32, i32
  }
  func.func @transform_2(%arg0: i32) -> (i32, i32) {
    %c0_i32 = arith.constant 0 : i32
    %c0_i32_0 = arith.constant 0 : i32
    %c0_i32_1 = arith.constant 0 : i32
    return %c0_i32, %c0_i32_0 : i32, i32
  }
  func.func @transform_3(%arg0: i32) -> (i32, i32) {
    %c0_i32 = arith.constant 0 : i32
    %c0_i32_0 = arith.constant 0 : i32
    return %arg0, %c0_i32 : i32, i32
  }
}

module attributes {stable_mosaic.version = 11 : i64} {
  func.func @_affine_lrelu_kernel(%arg0: i32, %arg1: memref<128x128xf32, #tpu.memory_space<vmem>>, %arg2: memref<1x128xf32, #tpu.memory_space<vmem>>, %arg3: memref<1x128xf32, #tpu.memory_space<vmem>>, %arg4: memref<128x128xbf16, #tpu.memory_space<vmem>>) attributes {dimension_semantics = [#tpu.dimension_semantics<parallel>], iteration_bounds = array<i64: 1>, scalar_prefetch = 0 : i64, scratch_operands = 0 : i64, tpu.core_type = #tpu.core_type<tc>, window_params = [{transform_indices = @transform_0, window_bounds = array<i64: 128, 128>}, {pipeline_mode = #tpu.pipeline_mode<synchronous>, transform_indices = @transform_1, window_bounds = array<i64: 1, 128>}, {pipeline_mode = #tpu.pipeline_mode<synchronous>, transform_indices = @transform_2, window_bounds = array<i64: 1, 128>}, {transform_indices = @transform_3, window_bounds = array<i64: 128, 128>}]} {
    %c0 = arith.constant 0 : index
    %c0_0 = arith.constant 0 : index
    %0 = vector.load %arg1[%c0, %c0_0] : memref<128x128xf32, #tpu.memory_space<vmem>>, vector<128x128xf32>
    %c0_1 = arith.constant 0 : index
    %c0_2 = arith.constant 0 : index
    %1 = vector.load %arg2[%c0_1, %c0_2] : memref<1x128xf32, #tpu.memory_space<vmem>>, vector<1x128xf32>
    %2 = vector.broadcast %1 : vector<1x128xf32> to vector<128x128xf32>
    %3 = arith.mulf %0, %2 : vector<128x128xf32>
    %c0_3 = arith.constant 0 : index
    %c0_4 = arith.constant 0 : index
    %4 = vector.load %arg3[%c0_3, %c0_4] : memref<1x128xf32, #tpu.memory_space<vmem>>, vector<1x128xf32>
    %5 = vector.broadcast %4 : vector<1x128xf32> to vector<128x128xf32>
    %6 = arith.addf %3, %5 : vector<128x128xf32>
    %cst = arith.constant 0.000000e+00 : f32
    %7 = vector.broadcast %cst : f32 to vector<128x128xf32>
    %8 = arith.cmpf oge, %6, %7 : vector<128x128xf32>
    %cst_5 = arith.constant 2.000000e-01 : f32
    %9 = vector.broadcast %cst_5 : f32 to vector<128x128xf32>
    %10 = arith.mulf %9, %6 : vector<128x128xf32>
    %11 = arith.select %8, %6, %10 : vector<128x128xi1>, vector<128x128xf32>
    %12 = arith.truncf %11 : vector<128x128xf32> to vector<128x128xbf16>
    %c0_6 = arith.constant 0 : index
    %c0_7 = arith.constant 0 : index
    %13 = vector.load %arg4[%c0_6, %c0_7] : memref<128x128xbf16, #tpu.memory_space<vmem>>, vector<128x128xbf16>
    tpu.vector_store %arg4[%c0_6, %c0_7], %12 {strides = array<i32>} : memref<128x128xbf16, #tpu.memory_space<vmem>>, vector<128x128xbf16>,
    return
  }
  func.func @transform_0(%arg0: i32) -> (i32, i32) {
    %c0_i32 = arith.constant 0 : i32
    %c0_i32_0 = arith.constant 0 : i32
    return %arg0, %c0_i32 : i32, i32
  }
  func.func @transform_1(%arg0: i32) -> (i32, i32) {
    %c0_i32 = arith.constant 0 : i32
    %c0_i32_0 = arith.constant 0 : i32
    %c0_i32_1 = arith.constant 0 : i32
    return %c0_i32, %c0_i32_0 : i32, i32
  }
  func.func @transform_2(%arg0: i32) -> (i32, i32) {
    %c0_i32 = arith.constant 0 : i32
    %c0_i32_0 = arith.constant 0 : i32
    %c0_i32_1 = arith.constant 0 : i32
    return %c0_i32, %c0_i32_0 : i32, i32
  }
  func.func @transform_3(%arg0: i32) -> (i32, i32) {
    %c0_i32 = arith.constant 0 : i32
    %c0_i32_0 = arith.constant 0 : i32
    return %arg0, %c0_i32 : i32, i32
  }
}

module attributes {stable_mosaic.version = 11 : i64} {
  func.func @_conv_gemm_kernel(%arg0: i32, %arg1: i32, %arg2: memref<128x256xbf16, #tpu.memory_space<vmem>>, %arg3: memref<256x128xbf16, #tpu.memory_space<vmem>>, %arg4: memref<128x128xf32, #tpu.memory_space<vmem>>, %arg5: memref<1x2x128xf32, #tpu.memory_space<vmem>>, %arg6: memref<128x128xf32, #tpu.memory_space<vmem>>) attributes {dimension_semantics = [#tpu.dimension_semantics<parallel>, #tpu.dimension_semantics<arbitrary>], iteration_bounds = array<i64: 1, 1>, scalar_prefetch = 0 : i64, scratch_operands = 1 : i64, tpu.core_type = #tpu.core_type<tc>, window_params = [{transform_indices = @transform_0, window_bounds = array<i64: 128, 256>}, {transform_indices = @transform_1, window_bounds = array<i64: 256, 128>}, {transform_indices = @transform_2, window_bounds = array<i64: 128, 128>}, {transform_indices = @transform_3, window_bounds = array<i64: 1, 2, 128>}]} {
    %c0_i32 = arith.constant 0 : i32
    %0 = arith.cmpi eq, %arg1, %c0_i32 : i32
    %1 = arith.extui %0 : i1 to i32
    %c0_i32_0 = arith.constant 0 : i32
    %2 = arith.cmpi ne, %1, %c0_i32_0 : i32
    scf.if %2 {
      %cst_10 = arith.constant 0.000000e+00 : f32
      %12 = vector.broadcast %cst_10 : f32 to vector<128x128xf32>
      %c0_11 = arith.constant 0 : index
      %c0_12 = arith.constant 0 : index
      %13 = vector.load %arg6[%c0_11, %c0_12] : memref<128x128xf32, #tpu.memory_space<vmem>>, vector<128x128xf32>
      tpu.vector_store %arg6[%c0_11, %c0_12], %12 {strides = array<i32>} : memref<128x128xf32, #tpu.memory_space<vmem>>, vector<128x128xf32>,
    } else {
    }
    %c0 = arith.constant 0 : index
    %c0_1 = arith.constant 0 : index
    %3 = vector.load %arg6[%c0, %c0_1] : memref<128x128xf32, #tpu.memory_space<vmem>>, vector<128x128xf32>
    %c0_2 = arith.constant 0 : index
    %c0_3 = arith.constant 0 : index
    %4 = vector.load %arg2[%c0_2, %c0_3] : memref<128x256xbf16, #tpu.memory_space<vmem>>, vector<128x256xbf16>
    %c0_4 = arith.constant 0 : index
    %c0_5 = arith.constant 0 : index
    %5 = vector.load %arg3[%c0_4, %c0_5] : memref<256x128xbf16, #tpu.memory_space<vmem>>, vector<256x128xbf16>
    %cst = arith.constant dense<0.000000e+00> : vector<128x128xf32>
    %6 = tpu.matmul %4, %5, %cst {dimension_numbers = #tpu.dot_dimension_numbers<[1], [0], [0], [1], [0, 0, 1, 1], [], []>} : vector<128x256xbf16>, vector<256x128xbf16>, vector<128x128xf32> -> vector<128x128xf32>
    %7 = arith.addf %3, %6 : vector<128x128xf32>
    %c0_6 = arith.constant 0 : index
    %c0_7 = arith.constant 0 : index
    %8 = vector.load %arg6[%c0_6, %c0_7] : memref<128x128xf32, #tpu.memory_space<vmem>>, vector<128x128xf32>
    tpu.vector_store %arg6[%c0_6, %c0_7], %7 {strides = array<i32>} : memref<128x128xf32, #tpu.memory_space<vmem>>, vector<128x128xf32>,
    %c0_i32_8 = arith.constant 0 : i32
    %9 = arith.cmpi eq, %arg1, %c0_i32_8 : i32
    %10 = arith.extui %9 : i1 to i32
    %c0_i32_9 = arith.constant 0 : i32
    %11 = arith.cmpi ne, %10, %c0_i32_9 : i32
    scf.if %11 {
      %c0_10 = arith.constant 0 : index
      %c0_11 = arith.constant 0 : index
      %12 = vector.load %arg6[%c0_10, %c0_11] : memref<128x128xf32, #tpu.memory_space<vmem>>, vector<128x128xf32>
      %cst_12 = arith.constant dense<0.000000e+00> : vector<128xf32>
      %13 = vector.multi_reduction <add>, %12, %cst_12 [0] : vector<128x128xf32> to vector<128xf32>
      %14 = vector.shape_cast %13 : vector<128xf32> to vector<1x128xf32>
      %15 = arith.mulf %12, %12 : vector<128x128xf32>
      %cst_13 = arith.constant dense<0.000000e+00> : vector<128xf32>
      %16 = vector.multi_reduction <add>, %15, %cst_13 [0] : vector<128x128xf32> to vector<128xf32>
      %17 = vector.shape_cast %16 : vector<128xf32> to vector<1x128xf32>
      %18 = tpu.concatenate %14, %17 in 0 : vector<1x128xf32>, vector<1x128xf32> -> vector<2x128xf32>
      %c0_14 = arith.constant 0 : index
      %c0_15 = arith.constant 0 : index
      %c0_16 = arith.constant 0 : index
      %19 = vector.load %arg5[%c0_14, %c0_15, %c0_16] : memref<1x2x128xf32, #tpu.memory_space<vmem>>, vector<1x2x128xf32>
      %20 = vector.shape_cast %19 : vector<1x2x128xf32> to vector<2x128xf32>
      %21 = vector.shape_cast %18 : vector<2x128xf32> to vector<1x2x128xf32>
      tpu.vector_store %arg5[%c0_14, %c0_15, %c0_16], %21 {strides = array<i32>} : memref<1x2x128xf32, #tpu.memory_space<vmem>>, vector<1x2x128xf32>,
      %c0_17 = arith.constant 0 : index
      %c0_18 = arith.constant 0 : index
      %22 = vector.load %arg4[%c0_17, %c0_18] : memref<128x128xf32, #tpu.memory_space<vmem>>, vector<128x128xf32>
      tpu.vector_store %arg4[%c0_17, %c0_18], %12 {strides = array<i32>} : memref<128x128xf32, #tpu.memory_space<vmem>>, vector<128x128xf32>,
    } else {
    }
    return
  }
  func.func @transform_0(%arg0: i32, %arg1: i32) -> (i32, i32) {
    %c0_i32 = arith.constant 0 : i32
    return %arg0, %arg1 : i32, i32
  }
  func.func @transform_1(%arg0: i32, %arg1: i32) -> (i32, i32) {
    %c0_i32 = arith.constant 0 : i32
    %c0_i32_0 = arith.constant 0 : i32
    return %arg1, %c0_i32 : i32, i32
  }
  func.func @transform_2(%arg0: i32, %arg1: i32) -> (i32, i32) {
    %c0_i32 = arith.constant 0 : i32
    %c0_i32_0 = arith.constant 0 : i32
    return %arg0, %c0_i32 : i32, i32
  }
  func.func @transform_3(%arg0: i32, %arg1: i32) -> (i32, i32, i32) {
    %c0_i32 = arith.constant 0 : i32
    %c0_i32_0 = arith.constant 0 : i32
    %c0_i32_1 = arith.constant 0 : i32
    return %arg0, %c0_i32, %c0_i32_0 : i32, i32, i32
  }
}

module attributes {stable_mosaic.version = 11 : i64} {
  func.func @_conv_gemm_kernel(%arg0: i32, %arg1: i32, %arg2: memref<32x512xbf16, #tpu.memory_space<vmem>>, %arg3: memref<512x128xbf16, #tpu.memory_space<vmem>>, %arg4: memref<32x128xf32, #tpu.memory_space<vmem>>, %arg5: memref<1x2x128xf32, #tpu.memory_space<vmem>>, %arg6: memref<32x128xf32, #tpu.memory_space<vmem>>) attributes {dimension_semantics = [#tpu.dimension_semantics<parallel>, #tpu.dimension_semantics<arbitrary>], iteration_bounds = array<i64: 1, 1>, scalar_prefetch = 0 : i64, scratch_operands = 1 : i64, tpu.core_type = #tpu.core_type<tc>, window_params = [{transform_indices = @transform_0, window_bounds = array<i64: 32, 512>}, {transform_indices = @transform_1, window_bounds = array<i64: 512, 128>}, {transform_indices = @transform_2, window_bounds = array<i64: 32, 128>}, {transform_indices = @transform_3, window_bounds = array<i64: 1, 2, 128>}]} {
    %c0_i32 = arith.constant 0 : i32
    %0 = arith.cmpi eq, %arg1, %c0_i32 : i32
    %1 = arith.extui %0 : i1 to i32
    %c0_i32_0 = arith.constant 0 : i32
    %2 = arith.cmpi ne, %1, %c0_i32_0 : i32
    scf.if %2 {
      %cst_10 = arith.constant 0.000000e+00 : f32
      %12 = vector.broadcast %cst_10 : f32 to vector<32x128xf32>
      %c0_11 = arith.constant 0 : index
      %c0_12 = arith.constant 0 : index
      %13 = vector.load %arg6[%c0_11, %c0_12] : memref<32x128xf32, #tpu.memory_space<vmem>>, vector<32x128xf32>
      tpu.vector_store %arg6[%c0_11, %c0_12], %12 {strides = array<i32>} : memref<32x128xf32, #tpu.memory_space<vmem>>, vector<32x128xf32>,
    } else {
    }
    %c0 = arith.constant 0 : index
    %c0_1 = arith.constant 0 : index
    %3 = vector.load %arg6[%c0, %c0_1] : memref<32x128xf32, #tpu.memory_space<vmem>>, vector<32x128xf32>
    %c0_2 = arith.constant 0 : index
    %c0_3 = arith.constant 0 : index
    %4 = vector.load %arg2[%c0_2, %c0_3] : memref<32x512xbf16, #tpu.memory_space<vmem>>, vector<32x512xbf16>
    %c0_4 = arith.constant 0 : index
    %c0_5 = arith.constant 0 : index
    %5 = vector.load %arg3[%c0_4, %c0_5] : memref<512x128xbf16, #tpu.memory_space<vmem>>, vector<512x128xbf16>
    %cst = arith.constant dense<0.000000e+00> : vector<32x128xf32>
    %6 = tpu.matmul %4, %5, %cst {dimension_numbers = #tpu.dot_dimension_numbers<[1], [0], [0], [1], [0, 0, 1, 1], [], []>} : vector<32x512xbf16>, vector<512x128xbf16>, vector<32x128xf32> -> vector<32x128xf32>
    %7 = arith.addf %3, %6 : vector<32x128xf32>
    %c0_6 = arith.constant 0 : index
    %c0_7 = arith.constant 0 : index
    %8 = vector.load %arg6[%c0_6, %c0_7] : memref<32x128xf32, #tpu.memory_space<vmem>>, vector<32x128xf32>
    tpu.vector_store %arg6[%c0_6, %c0_7], %7 {strides = array<i32>} : memref<32x128xf32, #tpu.memory_space<vmem>>, vector<32x128xf32>,
    %c0_i32_8 = arith.constant 0 : i32
    %9 = arith.cmpi eq, %arg1, %c0_i32_8 : i32
    %10 = arith.extui %9 : i1 to i32
    %c0_i32_9 = arith.constant 0 : i32
    %11 = arith.cmpi ne, %10, %c0_i32_9 : i32
    scf.if %11 {
      %c0_10 = arith.constant 0 : index
      %c0_11 = arith.constant 0 : index
      %12 = vector.load %arg6[%c0_10, %c0_11] : memref<32x128xf32, #tpu.memory_space<vmem>>, vector<32x128xf32>
      %cst_12 = arith.constant dense<0.000000e+00> : vector<128xf32>
      %13 = vector.multi_reduction <add>, %12, %cst_12 [0] : vector<32x128xf32> to vector<128xf32>
      %14 = vector.shape_cast %13 : vector<128xf32> to vector<1x128xf32>
      %15 = arith.mulf %12, %12 : vector<32x128xf32>
      %cst_13 = arith.constant dense<0.000000e+00> : vector<128xf32>
      %16 = vector.multi_reduction <add>, %15, %cst_13 [0] : vector<32x128xf32> to vector<128xf32>
      %17 = vector.shape_cast %16 : vector<128xf32> to vector<1x128xf32>
      %18 = tpu.concatenate %14, %17 in 0 : vector<1x128xf32>, vector<1x128xf32> -> vector<2x128xf32>
      %c0_14 = arith.constant 0 : index
      %c0_15 = arith.constant 0 : index
      %c0_16 = arith.constant 0 : index
      %19 = vector.load %arg5[%c0_14, %c0_15, %c0_16] : memref<1x2x128xf32, #tpu.memory_space<vmem>>, vector<1x2x128xf32>
      %20 = vector.shape_cast %19 : vector<1x2x128xf32> to vector<2x128xf32>
      %21 = vector.shape_cast %18 : vector<2x128xf32> to vector<1x2x128xf32>
      tpu.vector_store %arg5[%c0_14, %c0_15, %c0_16], %21 {strides = array<i32>} : memref<1x2x128xf32, #tpu.memory_space<vmem>>, vector<1x2x128xf32>,
      %c0_17 = arith.constant 0 : index
      %c0_18 = arith.constant 0 : index
      %22 = vector.load %arg4[%c0_17, %c0_18] : memref<32x128xf32, #tpu.memory_space<vmem>>, vector<32x128xf32>
      tpu.vector_store %arg4[%c0_17, %c0_18], %12 {strides = array<i32>} : memref<32x128xf32, #tpu.memory_space<vmem>>, vector<32x128xf32>,
    } else {
    }
    return
  }
  func.func @transform_0(%arg0: i32, %arg1: i32) -> (i32, i32) {
    %c0_i32 = arith.constant 0 : i32
    return %arg0, %arg1 : i32, i32
  }
  func.func @transform_1(%arg0: i32, %arg1: i32) -> (i32, i32) {
    %c0_i32 = arith.constant 0 : i32
    %c0_i32_0 = arith.constant 0 : i32
    return %arg1, %c0_i32 : i32, i32
  }
  func.func @transform_2(%arg0: i32, %arg1: i32) -> (i32, i32) {
    %c0_i32 = arith.constant 0 : i32
    %c0_i32_0 = arith.constant 0 : i32
    return %arg0, %c0_i32 : i32, i32
  }
  func.func @transform_3(%arg0: i32, %arg1: i32) -> (i32, i32, i32) {
    %c0_i32 = arith.constant 0 : i32
    %c0_i32_0 = arith.constant 0 : i32
    %c0_i32_1 = arith.constant 0 : i32
    return %arg0, %c0_i32, %c0_i32_0 : i32, i32, i32
  }
}

module attributes {stable_mosaic.version = 11 : i64} {
  func.func @_affine_lrelu_kernel(%arg0: i32, %arg1: memref<32x128xf32, #tpu.memory_space<vmem>>, %arg2: memref<1x128xf32, #tpu.memory_space<vmem>>, %arg3: memref<1x128xf32, #tpu.memory_space<vmem>>, %arg4: memref<32x128xbf16, #tpu.memory_space<vmem>>) attributes {dimension_semantics = [#tpu.dimension_semantics<parallel>], iteration_bounds = array<i64: 1>, scalar_prefetch = 0 : i64, scratch_operands = 0 : i64, tpu.core_type = #tpu.core_type<tc>, window_params = [{transform_indices = @transform_0, window_bounds = array<i64: 32, 128>}, {pipeline_mode = #tpu.pipeline_mode<synchronous>, transform_indices = @transform_1, window_bounds = array<i64: 1, 128>}, {pipeline_mode = #tpu.pipeline_mode<synchronous>, transform_indices = @transform_2, window_bounds = array<i64: 1, 128>}, {transform_indices = @transform_3, window_bounds = array<i64: 32, 128>}]} {
    %c0 = arith.constant 0 : index
    %c0_0 = arith.constant 0 : index
    %0 = vector.load %arg1[%c0, %c0_0] : memref<32x128xf32, #tpu.memory_space<vmem>>, vector<32x128xf32>
    %c0_1 = arith.constant 0 : index
    %c0_2 = arith.constant 0 : index
    %1 = vector.load %arg2[%c0_1, %c0_2] : memref<1x128xf32, #tpu.memory_space<vmem>>, vector<1x128xf32>
    %2 = vector.broadcast %1 : vector<1x128xf32> to vector<32x128xf32>
    %3 = arith.mulf %0, %2 : vector<32x128xf32>
    %c0_3 = arith.constant 0 : index
    %c0_4 = arith.constant 0 : index
    %4 = vector.load %arg3[%c0_3, %c0_4] : memref<1x128xf32, #tpu.memory_space<vmem>>, vector<1x128xf32>
    %5 = vector.broadcast %4 : vector<1x128xf32> to vector<32x128xf32>
    %6 = arith.addf %3, %5 : vector<32x128xf32>
    %cst = arith.constant 0.000000e+00 : f32
    %7 = vector.broadcast %cst : f32 to vector<32x128xf32>
    %8 = arith.cmpf oge, %6, %7 : vector<32x128xf32>
    %cst_5 = arith.constant 2.000000e-01 : f32
    %9 = vector.broadcast %cst_5 : f32 to vector<32x128xf32>
    %10 = arith.mulf %9, %6 : vector<32x128xf32>
    %11 = arith.select %8, %6, %10 : vector<32x128xi1>, vector<32x128xf32>
    %12 = arith.truncf %11 : vector<32x128xf32> to vector<32x128xbf16>
    %c0_6 = arith.constant 0 : index
    %c0_7 = arith.constant 0 : index
    %13 = vector.load %arg4[%c0_6, %c0_7] : memref<32x128xbf16, #tpu.memory_space<vmem>>, vector<32x128xbf16>
    tpu.vector_store %arg4[%c0_6, %c0_7], %12 {strides = array<i32>} : memref<32x128xbf16, #tpu.memory_space<vmem>>, vector<32x128xbf16>,
    return
  }
  func.func @transform_0(%arg0: i32) -> (i32, i32) {
    %c0_i32 = arith.constant 0 : i32
    %c0_i32_0 = arith.constant 0 : i32
    return %arg0, %c0_i32 : i32, i32
  }
  func.func @transform_1(%arg0: i32) -> (i32, i32) {
    %c0_i32 = arith.constant 0 : i32
    %c0_i32_0 = arith.constant 0 : i32
    %c0_i32_1 = arith.constant 0 : i32
    return %c0_i32, %c0_i32_0 : i32, i32
  }
  func.func @transform_2(%arg0: i32) -> (i32, i32) {
    %c0_i32 = arith.constant 0 : i32
    %c0_i32_0 = arith.constant 0 : i32
    %c0_i32_1 = arith.constant 0 : i32
    return %c0_i32, %c0_i32_0 : i32, i32
  }
  func.func @transform_3(%arg0: i32) -> (i32, i32) {
    %c0_i32 = arith.constant 0 : i32
    %c0_i32_0 = arith.constant 0 : i32
    return %arg0, %c0_i32 : i32, i32
  }
}

module attributes {stable_mosaic.version = 11 : i64} {
  func.func @_conv_gemm_kernel(%arg0: i32, %arg1: i32, %arg2: memref<8x512xbf16, #tpu.memory_space<vmem>>, %arg3: memref<512x128xbf16, #tpu.memory_space<vmem>>, %arg4: memref<8x128xf32, #tpu.memory_space<vmem>>, %arg5: memref<1x2x128xf32, #tpu.memory_space<vmem>>, %arg6: memref<8x128xf32, #tpu.memory_space<vmem>>) attributes {dimension_semantics = [#tpu.dimension_semantics<parallel>, #tpu.dimension_semantics<arbitrary>], iteration_bounds = array<i64: 1, 2>, scalar_prefetch = 0 : i64, scratch_operands = 1 : i64, tpu.core_type = #tpu.core_type<tc>, window_params = [{transform_indices = @transform_0, window_bounds = array<i64: 8, 512>}, {transform_indices = @transform_1, window_bounds = array<i64: 512, 128>}, {transform_indices = @transform_2, window_bounds = array<i64: 8, 128>}, {transform_indices = @transform_3, window_bounds = array<i64: 1, 2, 128>}]} {
    %c0_i32 = arith.constant 0 : i32
    %0 = arith.cmpi eq, %arg1, %c0_i32 : i32
    %1 = arith.extui %0 : i1 to i32
    %c0_i32_0 = arith.constant 0 : i32
    %2 = arith.cmpi ne, %1, %c0_i32_0 : i32
    scf.if %2 {
      %cst_9 = arith.constant 0.000000e+00 : f32
      %12 = vector.broadcast %cst_9 : f32 to vector<8x128xf32>
      %c0_10 = arith.constant 0 : index
      %c0_11 = arith.constant 0 : index
      %13 = vector.load %arg6[%c0_10, %c0_11] : memref<8x128xf32, #tpu.memory_space<vmem>>, vector<8x128xf32>
      tpu.vector_store %arg6[%c0_10, %c0_11], %12 {strides = array<i32>} : memref<8x128xf32, #tpu.memory_space<vmem>>, vector<8x128xf32>,
    } else {
    }
    %c0 = arith.constant 0 : index
    %c0_1 = arith.constant 0 : index
    %3 = vector.load %arg6[%c0, %c0_1] : memref<8x128xf32, #tpu.memory_space<vmem>>, vector<8x128xf32>
    %c0_2 = arith.constant 0 : index
    %c0_3 = arith.constant 0 : index
    %4 = vector.load %arg2[%c0_2, %c0_3] : memref<8x512xbf16, #tpu.memory_space<vmem>>, vector<8x512xbf16>
    %c0_4 = arith.constant 0 : index
    %c0_5 = arith.constant 0 : index
    %5 = vector.load %arg3[%c0_4, %c0_5] : memref<512x128xbf16, #tpu.memory_space<vmem>>, vector<512x128xbf16>
    %cst = arith.constant dense<0.000000e+00> : vector<8x128xf32>
    %6 = tpu.matmul %4, %5, %cst {dimension_numbers = #tpu.dot_dimension_numbers<[1], [0], [0], [1], [0, 0, 1, 1], [], []>} : vector<8x512xbf16>, vector<512x128xbf16>, vector<8x128xf32> -> vector<8x128xf32>
    %7 = arith.addf %3, %6 : vector<8x128xf32>
    %c0_6 = arith.constant 0 : index
    %c0_7 = arith.constant 0 : index
    %8 = vector.load %arg6[%c0_6, %c0_7] : memref<8x128xf32, #tpu.memory_space<vmem>>, vector<8x128xf32>
    tpu.vector_store %arg6[%c0_6, %c0_7], %7 {strides = array<i32>} : memref<8x128xf32, #tpu.memory_space<vmem>>, vector<8x128xf32>,
    %c1_i32 = arith.constant 1 : i32
    %9 = arith.cmpi eq, %arg1, %c1_i32 : i32
    %10 = arith.extui %9 : i1 to i32
    %c0_i32_8 = arith.constant 0 : i32
    %11 = arith.cmpi ne, %10, %c0_i32_8 : i32
    scf.if %11 {
      %c0_9 = arith.constant 0 : index
      %c0_10 = arith.constant 0 : index
      %12 = vector.load %arg6[%c0_9, %c0_10] : memref<8x128xf32, #tpu.memory_space<vmem>>, vector<8x128xf32>
      %cst_11 = arith.constant dense<0.000000e+00> : vector<128xf32>
      %13 = vector.multi_reduction <add>, %12, %cst_11 [0] : vector<8x128xf32> to vector<128xf32>
      %14 = vector.shape_cast %13 : vector<128xf32> to vector<1x128xf32>
      %15 = arith.mulf %12, %12 : vector<8x128xf32>
      %cst_12 = arith.constant dense<0.000000e+00> : vector<128xf32>
      %16 = vector.multi_reduction <add>, %15, %cst_12 [0] : vector<8x128xf32> to vector<128xf32>
      %17 = vector.shape_cast %16 : vector<128xf32> to vector<1x128xf32>
      %18 = tpu.concatenate %14, %17 in 0 : vector<1x128xf32>, vector<1x128xf32> -> vector<2x128xf32>
      %c0_13 = arith.constant 0 : index
      %c0_14 = arith.constant 0 : index
      %c0_15 = arith.constant 0 : index
      %19 = vector.load %arg5[%c0_13, %c0_14, %c0_15] : memref<1x2x128xf32, #tpu.memory_space<vmem>>, vector<1x2x128xf32>
      %20 = vector.shape_cast %19 : vector<1x2x128xf32> to vector<2x128xf32>
      %21 = vector.shape_cast %18 : vector<2x128xf32> to vector<1x2x128xf32>
      tpu.vector_store %arg5[%c0_13, %c0_14, %c0_15], %21 {strides = array<i32>} : memref<1x2x128xf32, #tpu.memory_space<vmem>>, vector<1x2x128xf32>,
      %c0_16 = arith.constant 0 : index
      %c0_17 = arith.constant 0 : index
      %22 = vector.load %arg4[%c0_16, %c0_17] : memref<8x128xf32, #tpu.memory_space<vmem>>, vector<8x128xf32>
      tpu.vector_store %arg4[%c0_16, %c0_17], %12 {strides = array<i32>} : memref<8x128xf32, #tpu.memory_space<vmem>>, vector<8x128xf32>,
    } else {
    }
    return
  }
  func.func @transform_0(%arg0: i32, %arg1: i32) -> (i32, i32) {
    %c0_i32 = arith.constant 0 : i32
    return %arg0, %arg1 : i32, i32
  }
  func.func @transform_1(%arg0: i32, %arg1: i32) -> (i32, i32) {
    %c0_i32 = arith.constant 0 : i32
    %c0_i32_0 = arith.constant 0 : i32
    return %arg1, %c0_i32 : i32, i32
  }
  func.func @transform_2(%arg0: i32, %arg1: i32) -> (i32, i32) {
    %c0_i32 = arith.constant 0 : i32
    %c0_i32_0 = arith.constant 0 : i32
    return %arg0, %c0_i32 : i32, i32
  }
  func.func @transform_3(%arg0: i32, %arg1: i32) -> (i32, i32, i32) {
    %c0_i32 = arith.constant 0 : i32
    %c0_i32_0 = arith.constant 0 : i32
    %c0_i32_1 = arith.constant 0 : i32
    return %arg0, %c0_i32, %c0_i32_0 : i32, i32, i32
  }
}

</mosaic_0001>

<bundles_post_ra>
// kernel: discriminator_forward.8
= control target key start
LH: loop header
LB: loop body
LE: loop exit
PB: predicated region body
PF: predicated region fallthrough
CT: control target
= control target key end

     0   :  { %9 = vsyncpa [#allocation4], 0  ;;  %s3218_s0 = inlined_call_operand.vmem [shape: bf16[2048,128], index: 0, kind: input, shape index: {}]   ;;  %s3219_s1 = inlined_call_operand.vmem [shape: bf16[128,128], index: 1, kind: input, shape index: {}]   ;;  %s3220_s2 = inlined_call_operand.vmem [shape: bf16[2048,128], index: 2, kind: output, shape index: {0}]   ;;  %s3221_s3 = inlined_call_operand.hbm [shape: f32[4,2,128], index: 3, kind: output, shape index: {1}]  }
   0x1   :  { %11 = vsyncpa [#allocation4 + $0x1], 0  ;;  %s2721_s12 = smov 0   ;;  %s2723_s13 = smov 0  }
   0x2   :  { %s2725_s14 = smov 0   ;;  %s2727_s15 = smov 0  }
   0x3   :  { %s2729_s16 = smov 0   ;;  %s2731_s17 = smov 0  }
   0x4 LB: > { %s2017_s18 = sadd.s32 4294967295, %s2698_s17   ;;  %s2018_s19 = sadd.s32 4294967294, %s2698_s17   ;;  %s2698_s17 = sphi %s2731_s17, %s17_s17   ;;  %s2694_s16 = sphi %s2729_s16, %s3228_s16   ;;  %s2690_s15 = sphi %s2727_s15, %s3227_s15   ;;  %s2686_s14 = sphi %s2725_s14, %s3226_s14   ;;  %s2682_s13 = sphi %s2723_s13, %s3225_s13   ;;  %s2678_s12 = sphi %s2721_s12, %s3224_s12  }
   0x5   : > { %s29_s20 = sadd.s32 1, %s2694_s16  ;;  %s116_s21 = sadd.s32 1, %s2686_s14 }
   0x6   : > { %p31_p0 = scmp.ge.s32.totalorder %s29_s20, 4  ;;  %p126_p1 = scmp.ne.s32.totalorder %s2686_s14, %s2682_s13 }
   0x7   : > { %p127_p2 = scmp.eq.s32.totalorder %s2017_s18, 3  ;;  %p132_p3 = scmp.ne.s32.totalorder %s2682_s13, %s2678_s12 }
   0x8   : > { %s3230_s20 = smov (%p31_p0, %s29_s20), 0  ;;  %p133_p5 = scmp.eq.s32.totalorder %s2018_s19, 3 }
   0x9   : > { %p2761_p4 = por %p127_p2, %p126_p1  ;;  %s113_s23 = ssub.s32 %s2694_s16, %s3230_s20 }
   0xa   : > { %p2022_p6 = scmp.ge.s32.totalorder %s2698_s17, 1  ;;  %p114_p7 = scmp.eq.s32.totalorder %s113_s23, 0 }
   0xb   : > { %p2768_p8 = por %p133_p5, %p132_p3  ;;  %p172_p9 = scmp.lt.s32.totalorder %s2698_s17, 5 }
   0xc   : > { %s2774_s25 = scalar_select %p114_p7, %s2686_s14, %s116_s21  }
   0xd   : > { %p173_p10 = pnand %p2022_p6, %p172_p9 }
   0xe   : > { %s2024_s28 = sshll.u32 (!%p173_p10), %s2690_s15, 6  ;;  %s2133_s8 = sshll.u32 (!%p173_p10), %s2690_s15, 5 }
   0xf   : > { %176 = sbr.rel (%p173_p10) target bundleno = 406 (0x196), region = 28  ;;  %p210_p11 = scmp.lt.s32.totalorder (!%p173_p10), %s2024_s28, 255 }
  0x10   : > { %s3178_s19 = scalar_lea.hbm (!%p173_p10), %s3221_s3, %s2133_s8  ;;  %s2700_s15 = smov (!%p173_p10), [#allocation3]  }
  0x11   : > { %s2626_s26 = sshll.u32 (!%p173_p10), %s2700_s15, 4  ;;  %s2627_s26 = int_to_ptr.vmem [resolvable:$false] %s2626_s26 }
  0x12   : > { %s2628_s27 = scalar_lea.vmem (!%p173_p10), %s2627_s26, 64 }
  0x14   : > { %v2582_v0 = vld [vmem:[%s3219_s1 + $0x38] sm:$0xff]   ;;  %v2583_v1 = vld [vmem:[%s3219_s1 + $0x30] sm:$0xff]   ;;  %s3232_s28 = smov (!%p210_p11, %s2024_s28), 255  ;;  %v2584_v2 = vld [vmem:[%s3219_s1 + $0x28] sm:$0xff]  }
  0x15   : > { %2431 = vmatprep.subr.bf16.mxu0 %v2582_v0  ;;  %2511 = vmatprep.subr.bf16.mxu1 %v2582_v0  ;;  %s2025_s6 = sshll.u32 %s3232_s28, 2  ;;  %v2585_v3 = vld [vmem:[%s3219_s1 + $0x20] sm:$0xff]   ;;  %v2586_v5 = vld [vmem:[%s3219_s1 + $0x18] sm:$0xff]   ;;  %v2587_v6 = vld [vmem:[%s3219_s1 + $0x10] sm:$0xff]   ;;  %s206_s28 = sand.u32 1, %s2682_s13  }
  0x16   : > { %2432 = vmatpush3.bf16.msra.mxu0 %v2582_v0  ;;  %2519 = vmatpush3.bf16.msra.mxu1 %v2582_v0  ;;  %s2794_s9 = scalar_lea.vmem %s3218_s0, %s2025_s6  ;;  %v2588_v7 = vld [vmem:[%s3219_s1 + $0x8] sm:$0xff]   ;;  %v2589_v9 = vld [vmem:[%s3219_s1] sm:$0xff]   ;;  %s2861_s7 = scalar_lea.vmem %s3220_s2, %s2025_s6 }
  0x17   : > { %2433 = vmatprep.subr.bf16.mxu0 %v2583_v1  ;;  %2512 = vmatprep.subr.bf16.mxu1 %v2583_v1  ;;  %v2590_v4 = vld [vmem:[%s2794_s9] sm:$0xff]   ;;  %v2591_v10 = vld [vmem:[%s2794_s9 + $0x8] sm:$0xff]   ;;  %v2592_v11 = vld [vmem:[%s2794_s9 + $0x10] sm:$0xff]   ;;  %s2023_s6 = sshll.u32 %s206_s28, 1  ;;  %s1890_s21 = scalar_lea.sflag [#allocation4], %s206_s28 }
  0x18   : > { %2447 = vmatprep.mubr.bf16.mxu0 %v2590_v4  ;;  %v2605_v8 = vld [vmem:[%s2794_s9 + $0x80] sm:$0xff]   ;;  %v2607_v12 = vld [vmem:[%s2794_s9 + $0x88] sm:$0xff]   ;;  %v2608_v13 = vld [vmem:[%s2794_s9 + $0x90] sm:$0xff]  }
  0x19   : > { %2479 = vmatprep.mubr.bf16.mxu1 %v2605_v8  ;;  %v2593_v14 = vld [vmem:[%s2794_s9 + $0x18] sm:$0xff]   ;;  %v2594_v15 = vld [vmem:[%s2794_s9 + $0x20] sm:$0xff]   ;;  %v2595_v18 = vld [vmem:[%s2794_s9 + $0x28] sm:$0xff]  }
  0x1a   : > { %2434 = vmatpush3.bf16.msra.mxu0 %v2583_v1  ;;  %2520 = vmatpush3.bf16.msra.mxu1 %v2583_v1  ;;  %v2609_v16 = vld [vmem:[%s2794_s9 + $0x98] sm:$0xff]   ;;  %v2610_v17 = vld [vmem:[%s2794_s9 + $0xa0] sm:$0xff]   ;;  %v2611_v19 = vld [vmem:[%s2794_s9 + $0xa8] sm:$0xff]  }
  0x1b   : > { %2435 = vmatprep.subr.bf16.mxu0 %v2584_v2  ;;  %2513 = vmatprep.subr.bf16.mxu1 %v2584_v2  ;;  %v2596_v20 = vld [vmem:[%s2794_s9 + $0x30] sm:$0xff]   ;;  %v2597_v22 = vld [vmem:[%s2794_s9 + $0x38] sm:$0xff]   ;;  %v2598_v24 = vld [vmem:[%s2794_s9 + $0x40] sm:$0xff]  }
  0x1c   : > { %v2612_v21 = vld [vmem:[%s2794_s9 + $0xb0] sm:$0xff]   ;;  %v2613_v23 = vld [vmem:[%s2794_s9 + $0xb8] sm:$0xff]   ;;  %v2614_v25 = vld [vmem:[%s2794_s9 + $0xc0] sm:$0xff]  }
  0x1d   : > { %v2599_v26 = vld [vmem:[%s2794_s9 + $0x48] sm:$0xff]   ;;  %v2600_v28 = vld [vmem:[%s2794_s9 + $0x50] sm:$0xff]   ;;  %v2601_v30 = vld [vmem:[%s2794_s9 + $0x58] sm:$0xff]  }
  0x1e   : > { %2436 = vmatpush3.bf16.msra.mxu0 %v2584_v2  ;;  %2521 = vmatpush3.bf16.msra.mxu1 %v2584_v2  ;;  %v2615_v27 = vld [vmem:[%s2794_s9 + $0xc8] sm:$0xff]   ;;  %v2616_v29 = vld [vmem:[%s2794_s9 + $0xd0] sm:$0xff]   ;;  %v2617_v31 = vld [vmem:[%s2794_s9 + $0xd8] sm:$0xff]  }
  0x1f   : > { %2437 = vmatprep.subr.bf16.mxu0 %v2585_v3  ;;  %2514 = vmatprep.subr.bf16.mxu1 %v2585_v3  ;;  %v2602_v32 = vld [vmem:[%s2794_s9 + $0x60] sm:$0xff]   ;;  %v2603_v34 = vld [vmem:[%s2794_s9 + $0x68] sm:$0xff]   ;;  %v2604_v36 = vld [vmem:[%s2794_s9 + $0x70] sm:$0xff]  }
  0x20   : > { %v2618_v33 = vld [vmem:[%s2794_s9 + $0xe0] sm:$0xff]   ;;  %v2619_v35 = vld [vmem:[%s2794_s9 + $0xe8] sm:$0xff]   ;;  %v2620_v37 = vld [vmem:[%s2794_s9 + $0xf0] sm:$0xff]  }
  0x21   : > { %v2606_v38 = vld [vmem:[%s2794_s9 + $0x78] sm:$0xff]  }
  0x22   : > { %2438 = vmatpush3.bf16.msra.mxu0 %v2585_v3  ;;  %2522 = vmatpush3.bf16.msra.mxu1 %v2585_v3  ;;  %v2621_v39 = vld [vmem:[%s2794_s9 + $0xf8] sm:$0xff]   ;;  %s208_s9 = scalar_lea.vmem [#allocation3], %s2023_s6 }
  0x23   : > { %2439 = vmatprep.subr.bf16.mxu0 %v2586_v5  ;;  %2515 = vmatprep.subr.bf16.mxu1 %v2586_v5  ;;  %s1907_s10 = sshll.u32 %s208_s9, 4  ;;  %s1908_s10 = int_to_ptr.vmem [resolvable:$true] %s1907_s10 }
  0x24   : > { %s2622_s23 = scalar_lea.vmem %s1908_s10, 32  ;;  %p2629_p1 = scmp.lt.s32.totalorder %s1908_s10, %s2627_s26 }
  0x25   : > { %p2623_p12 = scmp.ne.s32.totalorder %s1908_s10, %s2622_s23  ;;  %p2630_p2 = scmp.lt.s32.totalorder %s2628_s27, %s2622_s23 }
  0x26   : > { %2440 = vmatpush3.bf16.msra.mxu0 %v2586_v5  ;;  %2523 = vmatpush3.bf16.msra.mxu1 %v2586_v5 }
  0x27   : > { %2441 = vmatprep.subr.bf16.mxu0 %v2587_v6  ;;  %2516 = vmatprep.subr.bf16.mxu1 %v2587_v6  ;;  %p2624_p13 = pnand %p2623_p12, %p2761_p4  ;;  %p2631_p3 = por %p2630_p2, %p2629_p1 }
  0x29   : > { %p2625_p0 = pneg %p2624_p13 }
  0x2a   : > { %2442 = vmatpush3.bf16.msra.mxu0 %v2587_v6  ;;  %2524 = vmatpush3.bf16.msra.mxu1 %v2587_v6 }
  0x2b   : > { %2443 = vmatprep.subr.bf16.mxu0 %v2588_v7  ;;  %2517 = vmatprep.subr.bf16.mxu1 %v2588_v7  ;;  %p2632_p5 = pnand %p2631_p3, %p2625_p0 }
  0x2e   : > { %2444 = vmatpush3.bf16.msra.mxu0 %v2588_v7  ;;  %2525 = vmatpush3.bf16.msra.mxu1 %v2588_v7 }
  0x2f   : > { %2445 = vmatprep.subr.bf16.mxu0 %v2589_v9  ;;  %2518 = vmatprep.subr.bf16.mxu1 %v2589_v9 }
  0x32   : > { %2446 = vmatpush3.bf16.msra.mxu0 %v2589_v9  ;;  %2526 = vmatpush3.bf16.msra.mxu1 %v2589_v9 }
  0x35   : > { %2448 = vmatmul.mubr.bf16.vlgmr.msra.gmra.mxu0 %v2591_v10  ;;  %2480 = vmatmul.mubr.bf16.vlgmr.msra.gmra.mxu1 %v2607_v12 }
  0x36   : > { %2451 = vmatprep.mubr.bf16.mxu0 %v2592_v11  ;;  %2483 = vmatprep.mubr.bf16.mxu1 %v2608_v13 }
  0x3d   : > { %2452 = vmatmul.mubr.bf16.gmra.mxu0 %v2593_v14  ;;  %2484 = vmatmul.mubr.bf16.gmra.mxu1 %v2609_v16 }
  0x3e   : > { %2455 = vmatprep.mubr.bf16.mxu0 %v2594_v15  ;;  %2487 = vmatprep.mubr.bf16.mxu1 %v2610_v17 }
  0x45   : > { %2456 = vmatmul.mubr.bf16.gmra.mxu0 %v2595_v18  ;;  %2488 = vmatmul.mubr.bf16.gmra.mxu1 %v2611_v19 }
  0x46   : > { %2459 = vmatprep.mubr.bf16.mxu0 %v2596_v20  ;;  %2491 = vmatprep.mubr.bf16.mxu1 %v2612_v21 }
  0x4d   : > { %2460 = vmatmul.mubr.bf16.gmra.mxu0 %v2597_v22  ;;  %2492 = vmatmul.mubr.bf16.gmra.mxu1 %v2613_v23 }
  0x4e   : > { %2463 = vmatprep.mubr.bf16.mxu0 %v2598_v24  ;;  %2495 = vmatprep.mubr.bf16.mxu1 %v2614_v25 }
  0x55   : > { %2464 = vmatmul.mubr.bf16.gmra.mxu0 %v2599_v26  ;;  %2496 = vmatmul.mubr.bf16.gmra.mxu1 %v2615_v27 }
  0x56   : > { %2467 = vmatprep.mubr.bf16.mxu0 %v2600_v28  ;;  %2499 = vmatprep.mubr.bf16.mxu1 %v2616_v29 }
  0x5d   : > { %2468 = vmatmul.mubr.bf16.gmra.mxu0 %v2601_v30  ;;  %2500 = vmatmul.mubr.bf16.gmra.mxu1 %v2617_v31 }
  0x5e   : > { %2471 = vmatprep.mubr.bf16.mxu0 %v2602_v32  ;;  %2503 = vmatprep.mubr.bf16.mxu1 %v2618_v33 }
  0x65   : > { %2472 = vmatmul.mubr.bf16.gmra.mxu0 %v2603_v34  ;;  %2504 = vmatmul.mubr.bf16.gmra.mxu1 %v2619_v35 }
  0x66   : > { %2475 = vmatprep.mubr.bf16.mxu0 %v2604_v36  ;;  %2507 = vmatprep.mubr.bf16.mxu1 %v2620_v37 }
  0x6d   : > { %2476 = vmatmul.mubr.bf16.gmra.mxu0 %v2606_v38  ;;  %2508 = vmatmul.mubr.bf16.gmra.mxu1 %v2621_v39 }
  0xf5   : > { %v2449_v40 = vpop.f32.mrf.mxu0  ;;  %v2843_v41 = vpop.f32.mrf.mxu1 }
  0xf6   : > { %vm1374_vm0 = vcmp.ge.f32.partialorder %v2449_v40, 0.0  ;;  %v1438_v42 = vmul.f32 0.2, %v2449_v40  ;;  %v1470_v44 = vmul.f32 0.2, %v2843_v41  ;;  %vm1406_vm1 = vcmp.ge.f32.partialorder %v2843_v41, 0.0 }
  0xf7   : > { %v717_v43 = vpop.f32.mrf.mxu0  ;;  %v2846_v45 = vpop.f32.mrf.mxu1  ;;  %v1238_v1 = vmul.f32 %v2449_v40, %v2449_v40 }
  0xf8   : > { %v1502_v46 = vsel %vm1374_vm0, %v2449_v40, %v1438_v42  ;;  %v1236_v49 = vmul.f32 %v717_v43, %v717_v43  ;;  %vm1372_vm2 = vcmp.ge.f32.partialorder %v717_v43, 0.0  ;;  %v1436_v51 = vmul.f32 0.2, %v717_v43 }
  0xf9   : > { %v2450_v47 = vpop.f32.mrf.mxu0  ;;  %v2849_v48 = vpop.f32.mrf.mxu1  ;;  %v1534_v53 = vsel %vm1406_vm1, %v2843_v41, %v1470_v44  ;;  %v1468_v62 = vmul.f32 0.2, %v2846_v45  ;;  %vm1404_vm6 = vcmp.ge.f32.partialorder %v2846_v45, 0.0 }
  0xfa   : > { %vm1375_vm3 = vcmp.ge.f32.partialorder %v2450_v47, 0.0  ;;  %v1439_v50 = vmul.f32 0.2, %v2450_v47  ;;  %vm1407_vm4 = vcmp.ge.f32.partialorder %v2849_v48, 0.0  ;;  %v1471_v54 = vmul.f32 0.2, %v2849_v48 }
  0xfb   : > { %v720_v52 = vpop.f32.mrf.mxu0  ;;  %v2854_v55 = vpop.f32.mrf.mxu1  ;;  %v1500_v4 = vsel %vm1372_vm2, %v717_v43, %v1436_v51  ;;  %v1239_v5 = vmul.f32 %v2450_v47, %v2450_v47  ;;  %v1532_v15 = vsel %vm1404_vm6, %v2846_v45, %v1468_v62 }
  0xfc   : > { %v1503_v56 = vsel %vm1375_vm3, %v2450_v47, %v1439_v50  ;;  %v1167_v57 = vadd.f32 %v720_v52, %v717_v43  ;;  %v1237_v58 = vmul.f32 %v720_v52, %v720_v52  ;;  %vm1373_vm5 = vcmp.ge.f32.partialorder %v720_v52, 0.0 }
  0xfd   : > { %v2208_v59 = vpack.c.bf16 %v1503_v56, %v1502_v46  ;;  %v1437_v60 = vmul.f32 0.2, %v720_v52  ;;  %v2453_v61 = vpop.f32.mrf.mxu0  ;;  %v1535_v63 = vsel %vm1407_vm4, %v2849_v48, %v1471_v54  ;;  %v2865_v0 = vpop.f32.mrf.mxu1  ;;  %vm1405_vm7 = vcmp.ge.f32.partialorder %v2854_v55, 0.0 }
  0xfe   : > { %v1168_v2 = vadd.f32 %v2449_v40, %v1167_v57  ;;  %v1300_v3 = vadd.f32 %v1237_v58, %v1236_v49  ;;  %v2288_v8 = vpack.c.bf16 %v1535_v63, %v1534_v53  ;;  %vm1378_vm8 = vcmp.ge.f32.partialorder %v2453_v61, 0.0 }
  0xff   : > { %2360 = vst [vmem:[%s2861_s7 + $0x8] sm:$0xff] %v2208_v59   ;;  %v1501_v6 = vsel %vm1373_vm5, %v720_v52, %v1437_v60  ;;  %v733_v7 = vpop.f32.mrf.mxu0  ;;  %v2870_v9 = vpop.f32.mrf.mxu1  ;;  %v1442_v13 = vmul.f32 0.2, %v2453_v61  ;;  %v1469_v16 = vmul.f32 0.2, %v2854_v55  ;;  %v1242_v35 = vmul.f32 %v2453_v61, %v2453_v61 }
 0x100   : > { %v1301_v10 = vadd.f32 %v1300_v3, %v1238_v1  ;;  %v2203_v11 = vpack.c.bf16 %v1501_v6, %v1500_v4  ;;  %v1169_v12 = vadd.f32 %v2450_v47, %v1168_v2  ;;  %2376 = vst [vmem:[%s2861_s7 + $0x88] sm:$0xff] %v2288_v8   ;;  %v1240_v19 = vmul.f32 %v733_v7, %v733_v7 }
 0x101   : > { %v2454_v14 = vpop.f32.mrf.mxu0  ;;  %v2876_v17 = vpop.f32.mrf.mxu1  ;;  %vm1376_vm10 = vcmp.ge.f32.partialorder %v733_v7, 0.0  ;;  %v1440_v21 = vmul.f32 0.2, %v733_v7  ;;  %v1533_v24 = vsel %vm1405_vm7, %v2854_v55, %v1469_v16  ;;  %v1506_v29 = vsel %vm1378_vm8, %v2453_v61, %v1442_v13 }
 0x102   : > { %2204 = vst [vmem:[%s2861_s7] sm:$0xff] %v2203_v11   ;;  %v1170_v18 = vadd.f32 %v1169_v12, %v733_v7  ;;  %v1302_v20 = vadd.f32 %v1301_v10, %v1239_v5  ;;  %vm1379_vm9 = vcmp.ge.f32.partialorder %v2454_v14, 0.0  ;;  %v1443_v22 = vmul.f32 0.2, %v2454_v14 }
 0x103   : > { %v736_v23 = vpop.f32.mrf.mxu0  ;;  %v2882_v25 = vpop.f32.mrf.mxu1  ;;  %v2283_v33 = vpack.c.bf16 %v1533_v24, %v1532_v15  ;;  %v1504_v39 = vsel %vm1376_vm10, %v733_v7, %v1440_v21  ;;  %v1243_v44 = vmul.f32 %v2454_v14, %v2454_v14  ;;  %vm1410_vm15 = vcmp.ge.f32.partialorder %v2865_v0, 0.0 }
 0x104   : > { %v1303_v26 = vadd.f32 %v1302_v20, %v1240_v19  ;;  %v1171_v27 = vadd.f32 %v1170_v18, %v736_v23  ;;  %v1241_v28 = vmul.f32 %v736_v23, %v736_v23  ;;  %vm1377_vm11 = vcmp.ge.f32.partialorder %v736_v23, 0.0 }
 0x105   : > { %v1507_v30 = vsel %vm1379_vm9, %v2454_v14, %v1443_v22  ;;  %v1441_v31 = vmul.f32 0.2, %v736_v23  ;;  %v2457_v32 = vpop.f32.mrf.mxu0  ;;  %v2885_v34 = vpop.f32.mrf.mxu1  ;;  %2375 = vst [vmem:[%s2861_s7 + $0x80] sm:$0xff] %v2283_v33   ;;  %v1474_v11 = vmul.f32 0.2, %v2865_v0  ;;  %vm1408_vm1 = vcmp.ge.f32.partialorder %v2870_v9, 0.0 }
 0x106   : > { %v2218_v36 = vpack.c.bf16 %v1507_v30, %v1506_v29  ;;  %v1172_v37 = vadd.f32 %v2453_v61, %v1171_v27  ;;  %v1304_v38 = vadd.f32 %v1303_v26, %v1241_v28  ;;  %vm1382_vm12 = vcmp.ge.f32.partialorder %v2457_v32, 0.0 }
 0x107   : > { %v1505_v40 = vsel %vm1377_vm11, %v736_v23, %v1441_v31  ;;  %v749_v42 = vpop.f32.mrf.mxu0  ;;  %v2889_v43 = vpop.f32.mrf.mxu1  ;;  %v1446_v50 = vmul.f32 0.2, %v2457_v32  ;;  %v1246_v1 = vmul.f32 %v2457_v32, %v2457_v32  ;;  %v1472_v21 = vmul.f32 0.2, %v2870_v9 }
 0x108   : > { %2362 = vst [vmem:[%s2861_s7 + $0x18] sm:$0xff] %v2218_v36   ;;  %v1305_v46 = vadd.f32 %v1304_v38, %v1242_v35  ;;  %v2213_v47 = vpack.c.bf16 %v1505_v40, %v1504_v39  ;;  %v1173_v49 = vadd.f32 %v2454_v14, %v1172_v37  ;;  %v1244_v54 = vmul.f32 %v749_v42, %v749_v42 }
 0x109   : > { %v2458_v51 = vpop.f32.mrf.mxu0  ;;  %v2892_v52 = vpop.f32.mrf.mxu1  ;;  %vm1380_vm14 = vcmp.ge.f32.partialorder %v749_v42, 0.0  ;;  %v1444_v57 = vmul.f32 0.2, %v749_v42  ;;  %v1510_v2 = vsel %vm1382_vm12, %v2457_v32, %v1446_v50  ;;  %vm1411_vm5 = vcmp.ge.f32.partialorder %v2876_v17, 0.0 }
 0x10a   : > { %2361 = vst [vmem:[%s2861_s7 + $0x10] sm:$0xff] %v2213_v47   ;;  %v1174_v53 = vadd.f32 %v1173_v49, %v749_v42  ;;  %v1306_v56 = vadd.f32 %v1305_v46, %v1243_v44  ;;  %vm1383_vm13 = vcmp.ge.f32.partialorder %v2458_v51, 0.0  ;;  %v1447_v58 = vmul.f32 0.2, %v2458_v51 }
 0x10b   : > { %v752_v59 = vpop.f32.mrf.mxu0  ;;  %v2896_v60 = vpop.f32.mrf.mxu1  ;;  %v1508_v12 = vsel %vm1380_vm14, %v749_v42, %v1444_v57  ;;  %v1247_v13 = vmul.f32 %v2458_v51, %v2458_v51  ;;  %v1475_v33 = vmul.f32 0.2, %v2876_v17  ;;  %vm1409_vm7 = vcmp.ge.f32.partialorder %v2882_v25, 0.0 }
 0x10c   : > { %v1307_v61 = vadd.f32 %v1306_v56, %v1244_v54  ;;  %v1175_v62 = vadd.f32 %v1174_v53, %v752_v59  ;;  %v1245_v63 = vmul.f32 %v752_v59, %v752_v59  ;;  %vm1381_vm0 = vcmp.ge.f32.partialorder %v752_v59, 0.0 }
 0x10d   : > { %v1511_v3 = vsel %vm1383_vm13, %v2458_v51, %v1447_v58  ;;  %v1445_v4 = vmul.f32 0.2, %v752_v59  ;;  %v2461_v5 = vpop.f32.mrf.mxu0  ;;  %v2899_v6 = vpop.f32.mrf.mxu1  ;;  %v1539_v46 = vsel %vm1411_vm5, %v2876_v17, %v1475_v33  ;;  %vm1414_vm13 = vcmp.ge.f32.partialorder %v2885_v34, 0.0 }
 0x10e   : > { %v2228_v7 = vpack.c.bf16 %v1511_v3, %v1510_v2  ;;  %v1176_v8 = vadd.f32 %v2457_v32, %v1175_v62  ;;  %v1308_v10 = vadd.f32 %v1307_v61, %v1245_v63  ;;  %vm1386_vm2 = vcmp.ge.f32.partialorder %v2461_v5, 0.0 }
 0x10f   : > { %v1509_v14 = vsel %vm1381_vm0, %v752_v59, %v1445_v4  ;;  %v765_v15 = vpop.f32.mrf.mxu0  ;;  %v2904_v16 = vpop.f32.mrf.mxu1  ;;  %v1450_v22 = vmul.f32 0.2, %v2461_v5  ;;  %v1538_v32 = vsel %vm1410_vm15, %v2865_v0, %v1474_v11  ;;  %v1250_v49 = vmul.f32 %v2461_v5, %v2461_v5 }
 0x110   : > { %2364 = vst [vmem:[%s2861_s7 + $0x28] sm:$0xff] %v2228_v7   ;;  %v1309_v18 = vadd.f32 %v1308_v10, %v1246_v1  ;;  %v2223_v19 = vpack.c.bf16 %v1509_v14, %v1508_v12  ;;  %v1177_v20 = vadd.f32 %v2458_v51, %v1176_v8  ;;  %v1248_v23 = vmul.f32 %v765_v15, %v765_v15 }
 0x111   : > { %vm1384_vm3 = vcmp.ge.f32.partialorder %v765_v15, 0.0  ;;  %v2462_v24 = vpop.f32.mrf.mxu0  ;;  %v2908_v26 = vpop.f32.mrf.mxu1  ;;  %v1448_v29 = vmul.f32 0.2, %v765_v15  ;;  %v1514_v39 = vsel %vm1386_vm2, %v2461_v5, %v1450_v22  ;;  %v2298_v59 = vpack.c.bf16 %v1539_v46, %v1538_v32 }
 0x112   : > { %2363 = vst [vmem:[%s2861_s7 + $0x20] sm:$0xff] %v2223_v19   ;;  %v1178_v27 = vadd.f32 %v1177_v20, %v765_v15  ;;  %v1310_v28 = vadd.f32 %v1309_v18, %v1247_v13  ;;  %vm1387_vm4 = vcmp.ge.f32.partialorder %v2462_v24, 0.0  ;;  %v1451_v30 = vmul.f32 0.2, %v2462_v24 }
 0x113   : > { %v768_v31 = vpop.f32.mrf.mxu0  ;;  %v2916_v35 = vpop.f32.mrf.mxu1  ;;  %v1512_v54 = vsel %vm1384_vm3, %v765_v15, %v1448_v29  ;;  %v1251_v56 = vmul.f32 %v2462_v24, %v2462_v24  ;;  %v1536_v4 = vsel %vm1408_vm1, %v2870_v9, %v1472_v21  ;;  %2378 = vst [vmem:[%s2861_s7 + $0x98] sm:$0xff] %v2298_v59   ;;  %vm1412_vm1 = vcmp.ge.f32.partialorder %v2889_v43, 0.0 }
 0x114   : > { %v1311_v36 = vadd.f32 %v1310_v28, %v1248_v23  ;;  %v1179_v37 = vadd.f32 %v1178_v27, %v768_v31  ;;  %v1249_v38 = vmul.f32 %v768_v31, %v768_v31  ;;  %vm1385_vm6 = vcmp.ge.f32.partialorder %v768_v31, 0.0 }
 0x115   : > { %v1515_v40 = vsel %vm1387_vm4, %v2462_v24, %v1451_v30  ;;  %v1449_v42 = vmul.f32 0.2, %v768_v31  ;;  %v2465_v44 = vpop.f32.mrf.mxu0  ;;  %v2920_v47 = vpop.f32.mrf.mxu1  ;;  %vm1415_vm5 = vcmp.ge.f32.partialorder %v2892_v52, 0.0 }
 0x116   : > { %v2238_v50 = vpack.c.bf16 %v1515_v40, %v1514_v39  ;;  %v1180_v51 = vadd.f32 %v2461_v5, %v1179_v37  ;;  %v1312_v53 = vadd.f32 %v1311_v36, %v1249_v38  ;;  %vm1390_vm8 = vcmp.ge.f32.partialorder %v2465_v44, 0.0 }
 0x117   : > { %v1513_v57 = vsel %vm1385_vm6, %v768_v31, %v1449_v42  ;;  %v781_v58 = vpop.f32.mrf.mxu0  ;;  %v2923_v61 = vpop.f32.mrf.mxu1  ;;  %v1454_v2 = vmul.f32 0.2, %v2465_v44  ;;  %v1473_v5 = vmul.f32 0.2, %v2882_v25  ;;  %v1254_v28 = vmul.f32 %v2465_v44, %v2465_v44 }
 0x118   : > { %2366 = vst [vmem:[%s2861_s7 + $0x38] sm:$0xff] %v2238_v50   ;;  %v1313_v62 = vadd.f32 %v1312_v53, %v1250_v49  ;;  %v2233_v63 = vpack.c.bf16 %v1513_v57, %v1512_v54  ;;  %v1181_v1 = vadd.f32 %v2462_v24, %v1180_v51  ;;  %v1252_v8 = vmul.f32 %v781_v58, %v781_v58 }
 0x119   : > { %v2466_v3 = vpop.f32.mrf.mxu0  ;;  %vm1388_vm10 = vcmp.ge.f32.partialorder %v781_v58, 0.0  ;;  %v1452_v11 = vmul.f32 0.2, %v781_v58  ;;  %v1537_v14 = vsel %vm1409_vm7, %v2882_v25, %v1473_v5  ;;  %v2936_v15 = vpop.f32.mrf.mxu1  ;;  %v1518_v21 = vsel %vm1390_vm8, %v2465_v44, %v1454_v2 }
 0x11a   : > { %2365 = vst [vmem:[%s2861_s7 + $0x30] sm:$0xff] %v2233_v63   ;;  %v1182_v7 = vadd.f32 %v1181_v1, %v781_v58  ;;  %v1314_v10 = vadd.f32 %v1313_v62, %v1251_v56  ;;  %vm1391_vm9 = vcmp.ge.f32.partialorder %v2466_v3, 0.0  ;;  %v1455_v12 = vmul.f32 0.2, %v2466_v3 }
 0x11b   : > { %v784_v13 = vpop.f32.mrf.mxu0  ;;  %v2293_v27 = vpack.c.bf16 %v1537_v14, %v1536_v4  ;;  %v1516_v32 = vsel %vm1388_vm10, %v781_v58, %v1452_v11  ;;  %v2941_v37 = vpop.f32.mrf.mxu1  ;;  %v1255_v38 = vmul.f32 %v2466_v3, %v2466_v3  ;;  %vm1413_vm8 = vcmp.ge.f32.partialorder %v2896_v60, 0.0 }
 0x11c   : > { %v1315_v18 = vadd.f32 %v1314_v10, %v1252_v8  ;;  %v1183_v19 = vadd.f32 %v1182_v7, %v784_v13  ;;  %v1253_v20 = vmul.f32 %v784_v13, %v784_v13  ;;  %vm1389_vm11 = vcmp.ge.f32.partialorder %v784_v13, 0.0 }
 0x11d   : > { %v1519_v22 = vsel %vm1391_vm9, %v2466_v3, %v1455_v12  ;;  %v1453_v23 = vmul.f32 0.2, %v784_v13  ;;  %v2469_v24 = vpop.f32.mrf.mxu0  ;;  %2377 = vst [vmem:[%s2861_s7 + $0x90] sm:$0xff] %v2293_v27   ;;  %v2947_v59 = vpop.f32.mrf.mxu1 }
 0x11e   : > { %v2248_v29 = vpack.c.bf16 %v1519_v22, %v1518_v21  ;;  %v1184_v30 = vadd.f32 %v2465_v44, %v1183_v19  ;;  %v1316_v31 = vadd.f32 %v1315_v18, %v1253_v20  ;;  %vm1394_vm12 = vcmp.ge.f32.partialorder %v2469_v24, 0.0 }
 0x11f   : > { %v1517_v33 = vsel %vm1389_vm11, %v784_v13, %v1453_v23  ;;  %v797_v36 = vpop.f32.mrf.mxu0  ;;  %v1458_v46 = vmul.f32 0.2, %v2469_v24  ;;  %v1478_v44 = vmul.f32 0.2, %v2885_v34  ;;  %v1258_v54 = vmul.f32 %v2469_v24, %v2469_v24  ;;  %v2956_v20 = vpop.f32.mrf.mxu1 }
 0x120   : > { %2368 = vst [vmem:[%s2861_s7 + $0x48] sm:$0xff] %v2248_v29   ;;  %v1317_v39 = vadd.f32 %v1316_v31, %v1254_v28  ;;  %v2243_v40 = vpack.c.bf16 %v1517_v33, %v1516_v32  ;;  %v1185_v42 = vadd.f32 %v2466_v3, %v1184_v30  ;;  %v1256_v51 = vmul.f32 %v797_v36, %v797_v36 }
 0x121   : > { %v2470_v49 = vpop.f32.mrf.mxu0  ;;  %vm1392_vm15 = vcmp.ge.f32.partialorder %v797_v36, 0.0  ;;  %v1456_v56 = vmul.f32 0.2, %v797_v36  ;;  %v1522_v2 = vsel %vm1394_vm12, %v2469_v24, %v1458_v46  ;;  %v1542_v7 = vsel %vm1414_vm13, %v2885_v34, %v1478_v44 }
 0x122   : > { %2367 = vst [vmem:[%s2861_s7 + $0x40] sm:$0xff] %v2243_v40   ;;  %v1186_v50 = vadd.f32 %v1185_v42, %v797_v36  ;;  %v1318_v53 = vadd.f32 %v1317_v39, %v1255_v38  ;;  %vm1395_vm14 = vcmp.ge.f32.partialorder %v2470_v49, 0.0  ;;  %v1459_v57 = vmul.f32 0.2, %v2470_v49  ;;  %v2965_v40 = vpop.f32.mrf.mxu1 }
 0x123   : > { %v800_v58 = vpop.f32.mrf.mxu0  ;;  %v1259_v8 = vmul.f32 %v2470_v49, %v2470_v49  ;;  %v1520_v13 = vsel %vm1392_vm15, %v797_v36, %v1456_v56  ;;  %v1476_v19 = vmul.f32 0.2, %v2889_v43  ;;  %v1479_v39 = vmul.f32 0.2, %v2892_v52 }
 0x124   : > { %v1319_v62 = vadd.f32 %v1318_v53, %v1256_v51  ;;  %v1187_v63 = vadd.f32 %v1186_v50, %v800_v58  ;;  %v1257_v1 = vmul.f32 %v800_v58, %v800_v58  ;;  %vm1393_vm0 = vcmp.ge.f32.partialorder %v800_v58, 0.0 }
 0x125   : > { %v1523_v3 = vsel %vm1395_vm14, %v2470_v49, %v1459_v57  ;;  %v1457_v4 = vmul.f32 0.2, %v800_v58  ;;  %v2473_v5 = vpop.f32.mrf.mxu0  ;;  %v1540_v38 = vsel %vm1412_vm1, %v2889_v43, %v1476_v19  ;;  %vm1418_vm12 = vcmp.ge.f32.partialorder %v2899_v6, 0.0 }
 0x126   : > { %v2258_v10 = vpack.c.bf16 %v1523_v3, %v1522_v2  ;;  %v1188_v11 = vadd.f32 %v2469_v24, %v1187_v63  ;;  %v1320_v12 = vadd.f32 %v1319_v62, %v1257_v1  ;;  %v1262_v23 = vmul.f32 %v2473_v5, %v2473_v5 }
 0x127   : > { %v1521_v14 = vsel %vm1393_vm0, %v800_v58, %v1457_v4  ;;  %v813_v18 = vpop.f32.mrf.mxu0  ;;  %vm1398_vm2 = vcmp.ge.f32.partialorder %v2473_v5, 0.0  ;;  %v1462_v28 = vmul.f32 0.2, %v2473_v5  ;;  %vm1416_vm13 = vcmp.ge.f32.partialorder %v2904_v16, 0.0 }
 0x128   : > { %2370 = vst [vmem:[%s2861_s7 + $0x58] sm:$0xff] %v2258_v10   ;;  %v1321_v21 = vadd.f32 %v1320_v12, %v1258_v54  ;;  %v2253_v22 = vpack.c.bf16 %v1521_v14, %v1520_v13  ;;  %v1189_v27 = vadd.f32 %v2470_v49, %v1188_v11  ;;  %v1260_v24 = vmul.f32 %v813_v18, %v813_v18 }
 0x129   : > { %vm1396_vm3 = vcmp.ge.f32.partialorder %v813_v18, 0.0  ;;  %v2474_v29 = vpop.f32.mrf.mxu0  ;;  %v1460_v32 = vmul.f32 0.2, %v813_v18  ;;  %v1526_v44 = vsel %vm1398_vm2, %v2473_v5, %v1462_v28  ;;  %v1543_v54 = vsel %vm1415_vm5, %v2892_v52, %v1479_v39 }
 0x12a   : > { %2369 = vst [vmem:[%s2861_s7 + $0x50] sm:$0xff] %v2253_v22   ;;  %v1190_v30 = vadd.f32 %v1189_v27, %v813_v18  ;;  %v1322_v31 = vadd.f32 %v1321_v21, %v1259_v8  ;;  %vm1399_vm4 = vcmp.ge.f32.partialorder %v2474_v29, 0.0  ;;  %v1463_v33 = vmul.f32 0.2, %v2474_v29  ;;  %v2970_v8 = vpop.f32.mrf.mxu1 }
 0x12b   : > { %v816_v36 = vpop.f32.mrf.mxu0  ;;  %v1263_v56 = vmul.f32 %v2474_v29, %v2474_v29  ;;  %v1524_v63 = vsel %vm1396_vm3, %v813_v18, %v1460_v32  ;;  %v2308_v4 = vpack.c.bf16 %v1543_v54, %v1542_v7  ;;  %v1477_v18 = vmul.f32 0.2, %v2896_v60 }
 0x12c   : > { %v1323_v42 = vadd.f32 %v1322_v31, %v1260_v24  ;;  %v1191_v46 = vadd.f32 %v1190_v30, %v816_v36  ;;  %v1261_v49 = vmul.f32 %v816_v36, %v816_v36  ;;  %vm1397_vm6 = vcmp.ge.f32.partialorder %v816_v36, 0.0  ;;  %v2980_v24 = vpop.f32.mrf.mxu1 }
 0x12d   : > { %v1527_v50 = vsel %vm1399_vm4, %v2474_v29, %v1463_v33  ;;  %v1461_v51 = vmul.f32 0.2, %v816_v36  ;;  %v2477_v53 = vpop.f32.mrf.mxu0  ;;  %2380 = vst [vmem:[%s2861_s7 + $0xa8] sm:$0xff] %v2308_v4   ;;  %v1541_v28 = vsel %vm1413_vm8, %v2896_v60, %v1477_v18  ;;  %vm1419_vm14 = vcmp.ge.f32.partialorder %v2908_v26, 0.0 }
 0x12e   : > { %v2268_v57 = vpack.c.bf16 %v1527_v50, %v1526_v44  ;;  %v1192_v58 = vadd.f32 %v2473_v5, %v1191_v46  ;;  %v1324_v62 = vadd.f32 %v1323_v42, %v1261_v49  ;;  %v1466_v2 = vmul.f32 0.2, %v2477_v53  ;;  %v2988_v54 = vpop.f32.mrf.mxu1 }
 0x12f   : > { %v1525_v1 = vsel %vm1397_vm6, %v816_v36, %v1461_v51  ;;  %v829_v3 = vpop.f32.mrf.mxu0  ;;  %vm1402_vm7 = vcmp.ge.f32.partialorder %v2477_v53, 0.0  ;;  %v1266_v12 = vmul.f32 %v2477_v53, %v2477_v53  ;;  %v2303_v39 = vpack.c.bf16 %v1541_v28, %v1540_v38 }
 0x130   : > { %2372 = vst [vmem:[%s2861_s7 + $0x68] sm:$0xff] %v2268_v57   ;;  %v1325_v10 = vadd.f32 %v1324_v62, %v1262_v23  ;;  %v2263_v11 = vpack.c.bf16 %v1525_v1, %v1524_v63  ;;  %v1264_v13 = vmul.f32 %v829_v3, %v829_v3  ;;  %v1193_v14 = vadd.f32 %v2474_v29, %v1192_v58 }
 0x131   : > { %v2478_v5 = vpop.f32.mrf.mxu0  ;;  %v1464_v19 = vmul.f32 0.2, %v829_v3  ;;  %v1530_v22 = vsel %vm1402_vm7, %v2477_v53, %v1466_v2  ;;  %vm1400_vm10 = vcmp.ge.f32.partialorder %v829_v3, 0.0  ;;  %v1482_v49 = vmul.f32 0.2, %v2899_v6  ;;  %2379 = vst [vmem:[%s2861_s7 + $0xa0] sm:$0xff] %v2303_v39  }
 0x132   : > { %2371 = vst [vmem:[%s2861_s7 + $0x60] sm:$0xff] %v2263_v11   ;;  %vm1403_vm9 = vcmp.ge.f32.partialorder %v2478_v5, 0.0  ;;  %v1467_v21 = vmul.f32 0.2, %v2478_v5  ;;  %v1326_v7 = vadd.f32 %v1325_v10, %v1263_v56  ;;  %v1194_v23 = vadd.f32 %v1193_v14, %v829_v3 }
 0x133   : > { %v832_v27 = vpop.f32.mrf.mxu0  ;;  %v1528_v46 = vsel %vm1400_vm10, %v829_v3, %v1464_v19  ;;  %v1480_v51 = vmul.f32 0.2, %v2904_v16  ;;  %v1268_v38 = vmul.f32 %v2846_v45, %v2846_v45  ;;  %v1267_v56 = vmul.f32 %v2478_v5, %v2478_v5 }
 0x134   : > { %v1531_v29 = vsel %vm1403_vm9, %v2478_v5, %v1467_v21  ;;  %v1265_v30 = vmul.f32 %v832_v27, %v832_v27  ;;  %v1327_v31 = vadd.f32 %v1326_v7, %v1264_v13  ;;  %vm1401_vm11 = vcmp.ge.f32.partialorder %v832_v27, 0.0 }
 0x135   : > { %v2278_v32 = vpack.c.bf16 %v1531_v29, %v1530_v22  ;;  %v1195_v33 = vadd.f32 %v1194_v23, %v832_v27  ;;  %v1465_v36 = vmul.f32 0.2, %v832_v27  ;;  %v1546_v63 = vsel %vm1418_vm12, %v2899_v6, %v1482_v49 }
 0x136   : > { %v1328_v42 = vadd.f32 %v1327_v31, %v1265_v30  ;;  %v1544_v2 = vsel %vm1416_vm13, %v2904_v16, %v1480_v51  ;;  %vm1417_vm15 = vcmp.ge.f32.partialorder %v2916_v35, 0.0  ;;  %v1481_v3 = vmul.f32 0.2, %v2916_v35 }
 0x137   : > { %2374 = vst [vmem:[%s2861_s7 + $0x78] sm:$0xff] %v2278_v32   ;;  %v1196_v44 = vadd.f32 %v2477_v53, %v1195_v33  ;;  %v1529_v50 = vsel %vm1401_vm11, %v832_v27, %v1465_v36  ;;  %v1483_v53 = vmul.f32 0.2, %v2908_v26  ;;  %v1269_v10 = vmul.f32 %v2854_v55, %v2854_v55 }
 0x138   : > { %v1329_v57 = vadd.f32 %v1328_v42, %v1266_v12  ;;  %v2273_v58 = vpack.c.bf16 %v1529_v50, %v1528_v46  ;;  %vm1422_vm0 = vcmp.ge.f32.partialorder %v2920_v47, 0.0  ;;  %v3004_v12 = vpop.f32.mrf.mxu1  ;;  %v1545_v14 = vsel %vm1417_vm15, %v2916_v35, %v1481_v3 }
 0x139   : > { %v1197_v62 = vadd.f32 %v2478_v5, %v1196_v44  ;;  %v1547_v11 = vsel %vm1419_vm14, %v2908_v26, %v1483_v53  ;;  %v1486_v18 = vmul.f32 0.2, %v2920_v47  ;;  %v2313_v21 = vpack.c.bf16 %v1545_v14, %v1544_v2 }
 0x13a   : > { %v1330_v1 = vadd.f32 %v1329_v57, %v1267_v56  ;;  %2373 = vst [vmem:[%s2861_s7 + $0x70] sm:$0xff] %v2273_v58   ;;  %v2318_v5 = vpack.c.bf16 %v1547_v11, %v1546_v63  ;;  %vm1420_vm1 = vcmp.ge.f32.partialorder %v2923_v61, 0.0  ;;  %v1271_v7 = vmul.f32 %v2849_v48, %v2849_v48  ;;  %v3023_v29 = vpop.f32.mrf.mxu1 }
 0x13b   : > { %v1198_v4 = vadd.f32 %v1197_v62, %v2846_v45  ;;  %v1270_v45 = vmul.f32 %v2843_v41, %v2843_v41  ;;  %v1484_v27 = vmul.f32 0.2, %v2923_v61  ;;  %2381 = vst [vmem:[%s2861_s7 + $0xb0] sm:$0xff] %v2313_v21   ;;  %vm1423_vm2 = vcmp.ge.f32.partialorder %v2936_v15, 0.0 }
 0x13c   : > { %v1331_v13 = vadd.f32 %v1330_v1, %v1268_v38  ;;  %2382 = vst [vmem:[%s2861_s7 + $0xb8] sm:$0xff] %v2318_v5   ;;  %v1487_v28 = vmul.f32 0.2, %v2936_v15  ;;  %vm1421_vm3 = vcmp.ge.f32.partialorder %v2941_v37, 0.0  ;;  %v1485_v32 = vmul.f32 0.2, %v2941_v37 }
 0x13d   : > { %v1199_v19 = vadd.f32 %v1198_v4, %v2854_v55  ;;  %v1550_v55 = vsel %vm1422_vm0, %v2920_v47, %v1486_v18  ;;  %v1548_v31 = vsel %vm1420_vm1, %v2923_v61, %v1484_v27  ;;  %v1272_v33 = vmul.f32 %v2870_v9, %v2870_v9 }
 0x13e   : > { %v1332_v22 = vadd.f32 %v1331_v13, %v1269_v10  ;;  %v1551_v36 = vsel %vm1423_vm2, %v2936_v15, %v1487_v28  ;;  %vm1426_vm4 = vcmp.ge.f32.partialorder %v2947_v59, 0.0  ;;  %v1549_v46 = vsel %vm1421_vm3, %v2941_v37, %v1485_v32 }
 0x13f   : > { %v1200_v23 = vadd.f32 %v2843_v41, %v1199_v19  ;;  %v2328_v42 = vpack.c.bf16 %v1551_v36, %v1550_v55  ;;  %v1490_v49 = vmul.f32 0.2, %v2947_v59  ;;  %v2323_v50 = vpack.c.bf16 %v1549_v46, %v1548_v31 }
 0x140   : > { %v1333_v30 = vadd.f32 %v1332_v22, %v1270_v45  ;;  %vm1424_vm5 = vcmp.ge.f32.partialorder %v2956_v20, 0.0  ;;  %v1274_v51 = vmul.f32 %v2865_v0, %v2865_v0  ;;  %v1273_v56 = vmul.f32 %v2882_v25, %v2882_v25 }
 0x141   : > { %v1201_v41 = vadd.f32 %v2849_v48, %v1200_v23  ;;  %v3037_v48 = vpop.f32.mrf.mxu1  ;;  %2384 = vst [vmem:[%s2861_s7 + $0xc8] sm:$0xff] %v2328_v42   ;;  %v1488_v57 = vmul.f32 0.2, %v2956_v20  ;;  %2383 = vst [vmem:[%s2861_s7 + $0xc0] sm:$0xff] %v2323_v50   ;;  %vm1427_vm6 = vcmp.ge.f32.partialorder %v2965_v40, 0.0  ;;  %vm1425_vm7 = vcmp.ge.f32.partialorder %v2970_v8, 0.0 }
 0x142   : > { %v1334_v39 = vadd.f32 %v1333_v30, %v1271_v7  ;;  %v1491_v62 = vmul.f32 0.2, %v2965_v40  ;;  %v1489_v1 = vmul.f32 0.2, %v2970_v8  ;;  %vm1430_vm8 = vcmp.ge.f32.partialorder %v2980_v24, 0.0 }
 0x143   : > { %v1202_v44 = vadd.f32 %v1201_v41, %v2870_v9  ;;  %v1554_v9 = vsel %vm1426_vm4, %v2947_v59, %v1490_v49  ;;  %v1552_v53 = vsel %vm1424_vm5, %v2956_v20, %v1488_v57  ;;  %v3060_v4 = vpop.f32.mrf.mxu1  ;;  %v1494_v5 = vmul.f32 0.2, %v2980_v24 }
 0x144   : > { %v1335_v38 = vadd.f32 %v1334_v39, %v1272_v33  ;;  %v1555_v3 = vsel %vm1427_vm6, %v2965_v40, %v1491_v62  ;;  %v1553_v13 = vsel %vm1425_vm7, %v2970_v8, %v1489_v1  ;;  %vm1428_vm9 = vcmp.ge.f32.partialorder %v2988_v54, 0.0 }
 0x145   : > { %v1203_v58 = vadd.f32 %v1202_v44, %v2882_v25  ;;  %v1275_v25 = vmul.f32 %v2876_v17, %v2876_v17  ;;  %v2338_v11 = vpack.c.bf16 %v1555_v3, %v1554_v9  ;;  %v2333_v18 = vpack.c.bf16 %v1553_v13, %v1552_v53  ;;  %v3079_v27 = vpop.f32.mrf.mxu1 }
 0x146   : > { %v1336_v63 = vadd.f32 %v1335_v38, %v1273_v56  ;;  %v1277_v21 = vmul.f32 %v2896_v60, %v2896_v60  ;;  %v1492_v45 = vmul.f32 0.2, %v2988_v54  ;;  %vm1431_vm10 = vcmp.ge.f32.partialorder %v3004_v12, 0.0 }
 0x147   : > { %v1204_v2 = vadd.f32 %v2865_v0, %v1203_v58  ;;  %v1276_v0 = vmul.f32 %v2889_v43, %v2889_v43  ;;  %2386 = vst [vmem:[%s2861_s7 + $0xd8] sm:$0xff] %v2338_v11   ;;  %2385 = vst [vmem:[%s2861_s7 + $0xd0] sm:$0xff] %v2333_v18   ;;  %v1495_v22 = vmul.f32 0.2, %v3004_v12  ;;  %vm1429_vm11 = vcmp.ge.f32.partialorder %v3023_v29, 0.0  ;;  %v3093_v46 = vpop.f32.mrf.mxu1 }
 0x148   : > { %v1337_v10 = vadd.f32 %v1336_v63, %v1274_v51  ;;  %v1556_v55 = vsel %vm1428_vm9, %v2988_v54, %v1492_v45  ;;  %v1493_v28 = vmul.f32 0.2, %v3023_v29  ;;  %vm1434_vm12 = vcmp.ge.f32.partialorder %v3037_v48, 0.0 }
 0x149   : > { %v1205_v14 = vadd.f32 %v2876_v17, %v1204_v2  ;;  %v1558_v17 = vsel %vm1430_vm8, %v2980_v24, %v1494_v5  ;;  %v1559_v31 = vsel %vm1431_vm10, %v3004_v12, %v1495_v22  ;;  %v1498_v36 = vmul.f32 0.2, %v3037_v48 }
 0x14a   : > { %v1338_v19 = vadd.f32 %v1337_v10, %v1275_v25  ;;  %v2348_v41 = vpack.c.bf16 %v1559_v31, %v1558_v17  ;;  %v1557_v33 = vsel %vm1429_vm11, %v3023_v29, %v1493_v28  ;;  %vm1432_vm13 = vcmp.ge.f32.partialorder %v3060_v4, 0.0 }
 0x14b   : > { %v1206_v7 = vadd.f32 %v1205_v14, %v2889_v43  ;;  %v1278_v43 = vmul.f32 %v2885_v34, %v2885_v34  ;;  %v2343_v42 = vpack.c.bf16 %v1557_v33, %v1556_v55  ;;  %v1280_v44 = vmul.f32 %v2904_v16, %v2904_v16 }
 0x14c   : > { %v1339_v23 = vadd.f32 %v1338_v19, %v1276_v0  ;;  %2388 = vst [vmem:[%s2861_s7 + $0xe8] sm:$0xff] %v2348_v41   ;;  %v1496_v50 = vmul.f32 0.2, %v3060_v4  ;;  %vm1435_vm14 = vcmp.ge.f32.partialorder %v3079_v27, 0.0  ;;  %v1499_v38 = vmul.f32 0.2, %v3079_v27 }
 0x14d   : > { %v1207_v30 = vadd.f32 %v1206_v7, %v2896_v60  ;;  %v1279_v60 = vmul.f32 %v2892_v52, %v2892_v52  ;;  %2387 = vst [vmem:[%s2861_s7 + $0xe0] sm:$0xff] %v2343_v42   ;;  %vm1433_vm15 = vcmp.ge.f32.partialorder %v3093_v46, 0.0  ;;  %v1497_v57 = vmul.f32 0.2, %v3093_v46 }
 0x14e   : > { %v1340_v32 = vadd.f32 %v1339_v23, %v1277_v21  ;;  %v1560_v58 = vsel %vm1432_vm13, %v3060_v4, %v1496_v50  ;;  %v1563_v9 = vsel %vm1435_vm14, %v3079_v27, %v1499_v38  ;;  %v1281_v63 = vmul.f32 %v2916_v35, %v2916_v35 }
 0x14f   : > { %v1208_v39 = vadd.f32 %v2885_v34, %v1207_v30  ;;  %v1562_v34 = vsel %vm1434_vm12, %v3037_v48, %v1498_v36  ;;  %v1561_v1 = vsel %vm1433_vm15, %v3093_v46, %v1497_v57  ;;  %v1282_v3 = vmul.f32 %v2899_v6, %v2899_v6 }
 0x150   : > { %v1341_v49 = vadd.f32 %v1340_v32, %v1278_v43  ;;  %v2358_v53 = vpack.c.bf16 %v1563_v9, %v1562_v34  ;;  %v2353_v2 = vpack.c.bf16 %v1561_v1, %v1560_v58  ;;  %v1284_v14 = vmul.f32 %v2923_v61, %v2923_v61 }
 0x151   : > { %v1209_v51 = vadd.f32 %v2892_v52, %v1208_v39  ;;  %v1285_v19 = vmul.f32 %v2941_v37, %v2941_v37  ;;  %vm1369_vm0 = vcmask 1040384  }
 0x152   : > { %v1342_v56 = vadd.f32 %v1341_v49, %v1279_v60  ;;  %2390 = vst [vmem:[%s2861_s7 + $0xf8] sm:$0xff] %v2358_v53   ;;  %2389 = vst [vmem:[%s2861_s7 + $0xf0] sm:$0xff] %v2353_v2  }
 0x153   : > { %v1210_v52 = vadd.f32 %v1209_v51, %v2904_v16  ;;  %v1283_v16 = vmul.f32 %v2908_v26, %v2908_v26 }
 0x154   : > { %v1343_v62 = vadd.f32 %v1342_v56, %v1280_v44 }
 0x155   : > { %v1211_v25 = vadd.f32 %v1210_v52, %v2916_v35 }
 0x156   : > { %v1344_v10 = vadd.f32 %v1343_v62, %v1281_v63 }
 0x157   : > { %v1212_v11 = vadd.f32 %v2899_v6, %v1211_v25  ;;  %v1286_v6 = vmul.f32 %v2920_v47, %v2920_v47 }
 0x158   : > { %v1345_v13 = vadd.f32 %v1344_v10, %v1282_v3 }
 0x159   : > { %v1213_v5 = vadd.f32 %v2908_v26, %v1212_v11  ;;  %v1287_v26 = vmul.f32 %v2936_v15, %v2936_v15 }
 0x15a   : > { %v1346_v18 = vadd.f32 %v1345_v13, %v1283_v16 }
 0x15b   : > { %v1214_v35 = vadd.f32 %v1213_v5, %v2923_v61  ;;  %v1288_v61 = vmul.f32 %v2956_v20, %v2956_v20 }
 0x15c   : > { %v1347_v0 = vadd.f32 %v1346_v18, %v1284_v14 }
 0x15d   : > { %v1215_v21 = vadd.f32 %v1214_v35, %v2941_v37  ;;  %v1289_v37 = vmul.f32 %v2970_v8, %v2970_v8 }
 0x15e   : > { %v1348_v45 = vadd.f32 %v1347_v0, %v1285_v19 }
 0x15f   : > { %v1216_v7 = vadd.f32 %v2920_v47, %v1215_v21  ;;  %v1290_v47 = vmul.f32 %v2947_v59, %v2947_v59 }
 0x160   : > { %v1349_v17 = vadd.f32 %v1348_v45, %v1286_v6 }
 0x161   : > { %v1217_v22 = vadd.f32 %v2936_v15, %v1216_v7  ;;  %v1291_v15 = vmul.f32 %v2965_v40, %v2965_v40 }
 0x162   : > { %v1350_v23 = vadd.f32 %v1349_v17, %v1287_v26 }
 0x163   : > { %v1218_v55 = vadd.f32 %v1217_v22, %v2956_v20  ;;  %v1292_v20 = vmul.f32 %v2988_v54, %v2988_v54 }
 0x164   : > { %v1351_v28 = vadd.f32 %v1350_v23, %v1288_v61 }
 0x165   : > { %v1219_v43 = vadd.f32 %v1218_v55, %v2970_v8  ;;  %v1293_v8 = vmul.f32 %v3023_v29, %v3023_v29 }
 0x166   : > { %v1352_v30 = vadd.f32 %v1351_v28, %v1289_v37 }
 0x167   : > { %v1220_v31 = vadd.f32 %v2947_v59, %v1219_v43  ;;  %v1294_v59 = vmul.f32 %v2980_v24, %v2980_v24 }
 0x168   : > { %v1353_v32 = vadd.f32 %v1352_v30, %v1290_v47 }
 0x169   : > { %v1221_v41 = vadd.f32 %v2965_v40, %v1220_v31  ;;  %v1295_v40 = vmul.f32 %v3004_v12, %v3004_v12 }
 0x16a   : > { %v1354_v33 = vadd.f32 %v1353_v32, %v1291_v15 }
 0x16b   : > { %v1222_v36 = vadd.f32 %v1221_v41, %v2988_v54  ;;  %v1296_v54 = vmul.f32 %v3060_v4, %v3060_v4 }
 0x16c   : > { %v1355_v39 = vadd.f32 %v1354_v33, %v1292_v20 }
 0x16d   : > { %v1223_v42 = vadd.f32 %v1222_v36, %v3023_v29  ;;  %v1297_v29 = vmul.f32 %v3093_v46, %v3093_v46 }
 0x16e   : > { %v1356_v60 = vadd.f32 %v1355_v39, %v1293_v8 }
 0x16f   : > { %v1224_v49 = vadd.f32 %v2980_v24, %v1223_v42  ;;  %v1298_v24 = vmul.f32 %v3037_v48, %v3037_v48 }
 0x170   : > { %v1357_v44 = vadd.f32 %v1356_v60, %v1294_v59 }
 0x171   : > { %v1225_v50 = vadd.f32 %v3004_v12, %v1224_v49  ;;  %v1299_v12 = vmul.f32 %v3079_v27, %v3079_v27 }
 0x172   : > { %v1358_v51 = vadd.f32 %v1357_v44, %v1295_v40 }
 0x173   : > { %v1226_v34 = vadd.f32 %v1225_v50, %v3060_v4 }
 0x174   : > { %v1359_v38 = vadd.f32 %v1358_v51, %v1296_v54 }
 0x175   : > { %v1227_v56 = vadd.f32 %v1226_v34, %v3093_v46 }
 0x176   : > { %v1360_v57 = vadd.f32 %v1359_v38, %v1297_v29 }
 0x177   : > { %v1228_v58 = vadd.f32 %v3037_v48, %v1227_v56 }
 0x178   : > { %v1361_v52 = vadd.f32 %v1360_v57, %v1298_v24 }
 0x179   : > { %v1229_v9 = vadd.f32 %v3079_v27, %v1228_v58 }
 0x17a   : > { %v1362_v4 = vadd.f32 %v1361_v52, %v1299_v12 }
 0x17b   : > { %v1230_v62 = vrot.slane %v1229_v9, 4 }
 0x17c   : > { %v1363_v63 = vrot.slane %v1362_v4, 4 }
 0x17d   : > { %v1231_v53 = vadd.f32 %v1230_v62, %v1229_v9 }
 0x17e   : > { %v1364_v46 = vadd.f32 %v1363_v63, %v1362_v4 }
 0x17f   : > { %v1232_v1 = vrot.slane %v1231_v53, 2 }
 0x180   : > { %v1365_v25 = vrot.slane %v1364_v46, 2 }
 0x181   : > { %v1233_v2 = vadd.f32 %v1232_v1, %v1231_v53 }
 0x182   : > { %v1366_v3 = vadd.f32 %v1365_v25, %v1364_v46 }
 0x183   : > { %v1234_v48 = vrot.slane %v1233_v2, 1 }
 0x184   : > { %v1367_v10 = vrot.slane %v1366_v3, 1 }
 0x185   : > { %v1235_v11 = vadd.f32 %v1234_v48, %v1233_v2 }
 0x186   : > { %v1368_v27 = vadd.f32 %v1367_v10, %v1366_v3 }
 0x188   : > { %v1370_v16 = vsel %vm1369_vm0, %v1235_v11, %v1368_v27 }
 0x189   : > { %1371 = vst [vmem:[%s208_s9] sm:$0x3] %v1370_v16 }
 0x18a   : > { %2635 = shalt.err (!%p2632_p5)
}
 0x18b   : > { %s2636_s29 = scalar_lea.hbm %s3178_s19, 32  ;;  %s2640_s5 = scalar_lea.hbm %s3221_s3, 128 }
 0x18c   : > { %p2637_p6 = scmp.ne.s32.totalorder %s3178_s19, %s2636_s29  ;;  %p2641_p10 = scmp.lt.s32.totalorder %s3178_s19, %s3221_s3 }
 0x18d   : > { %p2642_p11 = scmp.lt.s32.totalorder %s2640_s5, %s2636_s29 }
 0x18e   : > { %p2638_p7 = pnand %p2637_p6, %p2761_p4 }
 0x18f   : > { %p2643_p12 = por %p2642_p11, %p2641_p10 }
 0x190   : > { %p2639_p9 = pneg %p2638_p7 }
 0x192   : > { %p2644_p13 = pnand %p2643_p12, %p2639_p9 }
 0x194   : > { %2647 = shalt.err (!%p2644_p13)
}
 0x195   : > { %2527 = dma.vmem_to_hbm [thread:$0]  (%p2761_p4), %s1908_s10, 32, %s3178_s19, %s1890_s21  }
 0x196 PF: > { %p2533_p0 = scmp.ge.s32.totalorder %s2698_s17, 2  ;;  %s1927_s6 = sand.u32 1, %s2678_s12  }
 0x197   : > { %s1928_s8 = scalar_lea.sflag [#allocation4], %s1927_s6 }
 0x198   : > { %p2530_p1 = pnand %p2533_p0, %p2768_p8 }
 0x19a   : > { %p2531_p2 = pneg %p2530_p1 }
 0x19c   : > { %2673 = dma.done.wait (%p2531_p2), %s1928_s8, 32  }
 0x19d   : > { %2675 = vsyncadd (%p2531_p2), %s1928_s8, 4294967264  ;;  %s17_s17 = sadd.s32 1, %s2698_s17   ;;  %s3224_s12 = smov %s2682_s13 }
 0x19e   : > { %p14_p3 = scmp.ge.s32.totalorder %s17_s17, 6   ;;  %s3225_s13 = smov %s2686_s14 }
 0x19f   : > { %s3226_s14 = smov %s2774_s25  ;;  %s3227_s15 = smov %s2694_s16 }
 0x1a0   : > { %s3228_s16 = smov %s3230_s20  ;;  %16 = sbr.rel (!%p14_p3) target bundleno = 4 (0x4), region = 86 }
 0x1a5   :  { %1933 = vsyncpa [#allocation4], 1 }
 0x1a6   :  { %1935 = vsyncpa [#allocation4 + $0x1], 1 }

// kernel: discriminator_forward.10
= control target key start
LH: loop header
LB: loop body
LE: loop exit
PB: predicated region body
PF: predicated region fallthrough
CT: control target
= control target key end

     0   :  { %s1503_s0 = inlined_call_operand.vmem [shape: f32[512,128], index: 0, kind: input, shape index: {}]   ;;  %s1504_s1 = inlined_call_operand.vmem [shape: f32[1,128], index: 1, kind: input, shape index: {}]   ;;  %s1505_s2 = inlined_call_operand.vmem [shape: f32[1,128], index: 2, kind: input, shape index: {}]   ;;  %s1506_s3 = inlined_call_operand.vmem [shape: bf16[512,128], index: 3, kind: output, shape index: {}]  }
   0x1   :  { %v14_v0 = vld [vmem:[%s1503_s0] sm:$0xff]  ;;  %v15_v1 = vld [vmem:[%s1503_s0 + $0x8] sm:$0xff]  ;;  %v16_v6 = vld [vmem:[%s1503_s0 + $0x10] sm:$0xff] }
   0x2   :  { %v1086_v2 = vld [vmem:[%s1504_s1] ss:$0 sm:$0xff]  ;;  %v17_v7 = vld [vmem:[%s1503_s0 + $0x18] sm:$0xff]  ;;  %v19_v11 = vld [vmem:[%s1503_s0 + $0x28] sm:$0xff] }
   0x3   :  { %v85_v3 = vmul.f32 %v1086_v2, %v14_v0  ;;  %v86_v4 = vmul.f32 %v1086_v2, %v15_v1  ;;  %v1093_v5 = vld [vmem:[%s1505_s2] ss:$0 sm:$0xff]  ;;  %v87_v8 = vmul.f32 %v1086_v2, %v16_v6  ;;  %v88_v9 = vmul.f32 %v1086_v2, %v17_v7  ;;  %v20_v12 = vld [vmem:[%s1503_s0 + $0x30] sm:$0xff]  ;;  %v21_v17 = vld [vmem:[%s1503_s0 + $0x38] sm:$0xff] }
   0x4   :  { %v18_v10 = vld [vmem:[%s1503_s0 + $0x20] sm:$0xff]  ;;  %v90_v16 = vmul.f32 %v1086_v2, %v19_v11  ;;  %v91_v20 = vmul.f32 %v1086_v2, %v20_v12  ;;  %v92_v21 = vmul.f32 %v1086_v2, %v21_v17  ;;  %v23_v35 = vld [vmem:[%s1503_s0 + $0x48] sm:$0xff]  ;;  %v24_v36 = vld [vmem:[%s1503_s0 + $0x50] sm:$0xff] }
   0x5   :  { %v156_v13 = vadd.f32 %v1093_v5, %v85_v3  ;;  %v157_v14 = vadd.f32 %v1093_v5, %v86_v4  ;;  %v89_v15 = vmul.f32 %v1086_v2, %v18_v10  ;;  %v158_v18 = vadd.f32 %v1093_v5, %v87_v8  ;;  %v22_v34 = vld [vmem:[%s1503_s0 + $0x40] sm:$0xff]  ;;  %v25_v42 = vld [vmem:[%s1503_s0 + $0x58] sm:$0xff]  ;;  %v27_v48 = vld [vmem:[%s1503_s0 + $0x68] sm:$0xff] }
   0x6   :  { %v159_v19 = vadd.f32 %v1093_v5, %v88_v9  ;;  %v161_v29 = vadd.f32 %v1093_v5, %v90_v16  ;;  %v162_v33 = vadd.f32 %v1093_v5, %v91_v20  ;;  %v163_v40 = vadd.f32 %v1093_v5, %v92_v21  ;;  %v26_v47 = vld [vmem:[%s1503_s0 + $0x60] sm:$0xff]  ;;  %v28_v60 = vld [vmem:[%s1503_s0 + $0x70] sm:$0xff]  ;;  %v29_v7 = vld [vmem:[%s1503_s0 + $0x78] sm:$0xff] }
   0x7   :  { %vm220_vm0 = vcmp.ge.f32.partialorder %v156_v13, 0.0  ;;  %vm221_vm1 = vcmp.ge.f32.partialorder %v157_v14, 0.0  ;;  %v284_v22 = vmul.f32 0.2, %v156_v13  ;;  %v285_v23 = vmul.f32 0.2, %v157_v14 }
   0x8   :  { %vm222_vm2 = vcmp.ge.f32.partialorder %v158_v18, 0.0  ;;  %vm223_vm3 = vcmp.ge.f32.partialorder %v159_v19, 0.0  ;;  %v286_v24 = vmul.f32 0.2, %v158_v18  ;;  %v287_v25 = vmul.f32 0.2, %v159_v19 }
   0x9   :  { %v348_v26 = vsel %vm220_vm0, %v156_v13, %v284_v22  ;;  %v349_v27 = vsel %vm221_vm1, %v157_v14, %v285_v23  ;;  %v160_v28 = vadd.f32 %v1093_v5, %v89_v15  ;;  %vm225_vm5 = vcmp.ge.f32.partialorder %v161_v29, 0.0  ;;  %v30_v12 = vld [vmem:[%s1503_s0 + $0x80] sm:$0xff]  ;;  %v31_v13 = vld [vmem:[%s1503_s0 + $0x88] sm:$0xff]  ;;  %v32_v20 = vld [vmem:[%s1503_s0 + $0x90] sm:$0xff] }
   0xa   :  { %v869_v30 = vpack.c.bf16 %v349_v27, %v348_v26  ;;  %v350_v31 = vsel %vm222_vm2, %v158_v18, %v286_v24  ;;  %v351_v32 = vsel %vm223_vm3, %v159_v19, %v287_v25  ;;  %v289_v39 = vmul.f32 0.2, %v161_v29  ;;  %v33_v25 = vld [vmem:[%s1503_s0 + $0x98] sm:$0xff] }
   0xb   :  { %v874_v37 = vpack.c.bf16 %v351_v32, %v350_v31  ;;  %vm224_vm4 = vcmp.ge.f32.partialorder %v160_v28, 0.0  ;;  %v288_v38 = vmul.f32 0.2, %v160_v28  ;;  %vm226_vm6 = vcmp.ge.f32.partialorder %v162_v33, 0.0 }
   0xc   :  { %870 = vst [vmem:[%s1506_s3] sm:$0xff] %v869_v30   ;;  %v290_v41 = vmul.f32 0.2, %v162_v33  ;;  %v93_v44 = vmul.f32 %v1086_v2, %v22_v34  ;;  %v94_v45 = vmul.f32 %v1086_v2, %v23_v35  ;;  %v95_v46 = vmul.f32 %v1086_v2, %v24_v36 }
   0xd   :  { %1026 = vst [vmem:[%s1506_s3 + $0x8] sm:$0xff] %v874_v37   ;;  %v352_v43 = vsel %vm224_vm4, %v160_v28, %v288_v38  ;;  %v353_v49 = vsel %vm225_vm5, %v161_v29, %v289_v39  ;;  %vm227_vm7 = vcmp.ge.f32.partialorder %v163_v40, 0.0  ;;  %v291_v50 = vmul.f32 0.2, %v163_v40  ;;  %v35_v37 = vld [vmem:[%s1503_s0 + $0xa8] sm:$0xff] }
   0xe   :  { %v354_v51 = vsel %vm226_vm6, %v162_v33, %v290_v41  ;;  %v879_v52 = vpack.c.bf16 %v353_v49, %v352_v43  ;;  %v164_v53 = vadd.f32 %v1093_v5, %v93_v44  ;;  %v165_v54 = vadd.f32 %v1093_v5, %v94_v45  ;;  %v34_v33 = vld [vmem:[%s1503_s0 + $0xa0] sm:$0xff]  ;;  %v36_v44 = vld [vmem:[%s1503_s0 + $0xb0] sm:$0xff]  ;;  %v37_v49 = vld [vmem:[%s1503_s0 + $0xb8] sm:$0xff] }
   0xf   :  { %v96_v55 = vmul.f32 %v1086_v2, %v25_v42  ;;  %v355_v56 = vsel %vm227_vm7, %v163_v40, %v291_v50  ;;  %v166_v57 = vadd.f32 %v1093_v5, %v95_v46  ;;  %v97_v58 = vmul.f32 %v1086_v2, %v26_v47  ;;  %v38_v50 = vld [vmem:[%s1503_s0 + $0xc0] sm:$0xff] }
  0x10   :  { %v98_v59 = vmul.f32 %v1086_v2, %v27_v48  ;;  %1027 = vst [vmem:[%s1506_s3 + $0x10] sm:$0xff] %v879_v52   ;;  %v884_v61 = vpack.c.bf16 %v355_v56, %v354_v51  ;;  %vm228_vm8 = vcmp.ge.f32.partialorder %v164_v53, 0.0  ;;  %vm229_vm9 = vcmp.ge.f32.partialorder %v165_v54, 0.0  ;;  %v39_v51 = vld [vmem:[%s1503_s0 + $0xc8] sm:$0xff] }
  0x11   :  { %v292_v62 = vmul.f32 0.2, %v164_v53  ;;  %v293_v63 = vmul.f32 0.2, %v165_v54  ;;  %v167_v0 = vadd.f32 %v1093_v5, %v96_v55  ;;  %vm230_vm10 = vcmp.ge.f32.partialorder %v166_v57, 0.0 }
  0x12   :  { %v294_v1 = vmul.f32 0.2, %v166_v57  ;;  %1028 = vst [vmem:[%s1506_s3 + $0x18] sm:$0xff] %v884_v61   ;;  %v168_v4 = vadd.f32 %v1093_v5, %v97_v58  ;;  %v169_v6 = vadd.f32 %v1093_v5, %v98_v59  ;;  %v99_v8 = vmul.f32 %v1086_v2, %v28_v60 }
  0x13   :  { %v356_v3 = vsel %vm228_vm8, %v164_v53, %v292_v62  ;;  %v357_v9 = vsel %vm229_vm9, %v165_v54, %v293_v63  ;;  %vm231_vm11 = vcmp.ge.f32.partialorder %v167_v0, 0.0  ;;  %v295_v10 = vmul.f32 0.2, %v167_v0  ;;  %v40_v62 = vld [vmem:[%s1503_s0 + $0xd0] sm:$0xff] }
  0x14   :  { %v358_v11 = vsel %vm230_vm10, %v166_v57, %v294_v1  ;;  %v889_v14 = vpack.c.bf16 %v357_v9, %v356_v3  ;;  %vm232_vm12 = vcmp.ge.f32.partialorder %v168_v4, 0.0  ;;  %vm233_vm13 = vcmp.ge.f32.partialorder %v169_v6, 0.0 }
  0x15   :  { %v296_v15 = vmul.f32 0.2, %v168_v4  ;;  %v359_v16 = vsel %vm231_vm11, %v167_v0, %v295_v10  ;;  %v297_v17 = vmul.f32 0.2, %v169_v6  ;;  %v100_v18 = vmul.f32 %v1086_v2, %v29_v7  ;;  %v41_v10 = vld [vmem:[%s1503_s0 + $0xd8] sm:$0xff] }
  0x16   :  { %v170_v19 = vadd.f32 %v1093_v5, %v99_v8  ;;  %1029 = vst [vmem:[%s1506_s3 + $0x20] sm:$0xff] %v889_v14   ;;  %v894_v21 = vpack.c.bf16 %v359_v16, %v358_v11  ;;  %v101_v23 = vmul.f32 %v1086_v2, %v30_v12  ;;  %v102_v24 = vmul.f32 %v1086_v2, %v31_v13  ;;  %v42_v14 = vld [vmem:[%s1503_s0 + $0xe0] sm:$0xff] }
  0x17   :  { %v360_v22 = vsel %vm232_vm12, %v168_v4, %v296_v15  ;;  %v361_v26 = vsel %vm233_vm13, %v169_v6, %v297_v17  ;;  %v171_v27 = vadd.f32 %v1093_v5, %v100_v18  ;;  %v103_v32 = vmul.f32 %v1086_v2, %v32_v20  ;;  %v43_v15 = vld [vmem:[%s1503_s0 + $0xe8] sm:$0xff] }
  0x18   :  { %vm234_vm14 = vcmp.ge.f32.partialorder %v170_v19, 0.0  ;;  %v298_v28 = vmul.f32 0.2, %v170_v19  ;;  %1030 = vst [vmem:[%s1506_s3 + $0x28] sm:$0xff] %v894_v21   ;;  %v899_v29 = vpack.c.bf16 %v361_v26, %v360_v22  ;;  %v172_v30 = vadd.f32 %v1093_v5, %v101_v23  ;;  %v44_v26 = vld [vmem:[%s1503_s0 + $0xf0] sm:$0xff] }
  0x19   :  { %v173_v31 = vadd.f32 %v1093_v5, %v102_v24  ;;  %vm235_vm15 = vcmp.ge.f32.partialorder %v171_v27, 0.0  ;;  %v299_v34 = vmul.f32 0.2, %v171_v27  ;;  %v104_v36 = vmul.f32 %v1086_v2, %v33_v25 }
  0x1a   :  { %v362_v35 = vsel %vm234_vm14, %v170_v19, %v298_v28  ;;  %1031 = vst [vmem:[%s1506_s3 + $0x30] sm:$0xff] %v899_v29   ;;  %vm236_vm0 = vcmp.ge.f32.partialorder %v172_v30, 0.0  ;;  %v300_v38 = vmul.f32 0.2, %v172_v30  ;;  %v174_v41 = vadd.f32 %v1093_v5, %v103_v32 }
  0x1b   :  { %vm237_vm1 = vcmp.ge.f32.partialorder %v173_v31, 0.0  ;;  %v301_v39 = vmul.f32 0.2, %v173_v31  ;;  %v363_v40 = vsel %vm235_vm15, %v171_v27, %v299_v34  ;;  %v175_v42 = vadd.f32 %v1093_v5, %v104_v36 }
  0x1c   :  { %v105_v43 = vmul.f32 %v1086_v2, %v34_v33  ;;  %v904_v45 = vpack.c.bf16 %v363_v40, %v362_v35  ;;  %v364_v46 = vsel %vm236_vm0, %v172_v30, %v300_v38  ;;  %v106_v48 = vmul.f32 %v1086_v2, %v35_v37  ;;  %v46_v38 = vld [vmem:[%s1503_s0 + $0x100] sm:$0xff] }
  0x1d   :  { %v365_v47 = vsel %vm237_vm1, %v173_v31, %v301_v39  ;;  %vm238_vm2 = vcmp.ge.f32.partialorder %v174_v41, 0.0  ;;  %vm239_vm3 = vcmp.ge.f32.partialorder %v175_v42, 0.0  ;;  %v302_v53 = vmul.f32 0.2, %v174_v41  ;;  %v45_v31 = vld [vmem:[%s1503_s0 + $0xf8] sm:$0xff] }
  0x1e   :  { %v909_v52 = vpack.c.bf16 %v365_v47, %v364_v46  ;;  %1032 = vst [vmem:[%s1506_s3 + $0x38] sm:$0xff] %v904_v45   ;;  %v303_v54 = vmul.f32 0.2, %v175_v42  ;;  %v176_v55 = vadd.f32 %v1093_v5, %v105_v43  ;;  %v177_v56 = vadd.f32 %v1093_v5, %v106_v48 }
  0x1f   :  { %v107_v57 = vmul.f32 %v1086_v2, %v36_v44  ;;  %v366_v58 = vsel %vm238_vm2, %v174_v41, %v302_v53  ;;  %v108_v59 = vmul.f32 %v1086_v2, %v37_v49  ;;  %v109_v60 = vmul.f32 %v1086_v2, %v38_v50  ;;  %v48_v50 = vld [vmem:[%s1503_s0 + $0x110] sm:$0xff] }
  0x20   :  { %1033 = vst [vmem:[%s1506_s3 + $0x40] sm:$0xff] %v909_v52   ;;  %v110_v61 = vmul.f32 %v1086_v2, %v39_v51  ;;  %v367_v63 = vsel %vm239_vm3, %v175_v42, %v303_v54  ;;  %vm240_vm4 = vcmp.ge.f32.partialorder %v176_v55, 0.0  ;;  %vm241_vm5 = vcmp.ge.f32.partialorder %v177_v56, 0.0  ;;  %v47_v42 = vld [vmem:[%s1503_s0 + $0x108] sm:$0xff]  ;;  %v49_v51 = vld [vmem:[%s1503_s0 + $0x118] sm:$0xff] }
  0x21   :  { %v304_v0 = vmul.f32 0.2, %v176_v55  ;;  %v914_v1 = vpack.c.bf16 %v367_v63, %v366_v58  ;;  %v305_v3 = vmul.f32 0.2, %v177_v56  ;;  %v178_v4 = vadd.f32 %v1093_v5, %v107_v57  ;;  %v51_v63 = vld [vmem:[%s1503_s0 + $0x128] sm:$0xff] }
  0x22   :  { %v179_v6 = vadd.f32 %v1093_v5, %v108_v59  ;;  %v180_v8 = vadd.f32 %v1093_v5, %v109_v60  ;;  %v181_v9 = vadd.f32 %v1093_v5, %v110_v61  ;;  %v111_v11 = vmul.f32 %v1086_v2, %v40_v62 }
  0x23   :  { %v368_v7 = vsel %vm240_vm4, %v176_v55, %v304_v0  ;;  %1034 = vst [vmem:[%s1506_s3 + $0x48] sm:$0xff] %v914_v1   ;;  %v369_v12 = vsel %vm241_vm5, %v177_v56, %v305_v3  ;;  %vm242_vm6 = vcmp.ge.f32.partialorder %v178_v4, 0.0  ;;  %v306_v13 = vmul.f32 0.2, %v178_v4  ;;  %v50_v55 = vld [vmem:[%s1503_s0 + $0x120] sm:$0xff] }
  0x24   :  { %vm243_vm7 = vcmp.ge.f32.partialorder %v179_v6, 0.0  ;;  %v919_v16 = vpack.c.bf16 %v369_v12, %v368_v7  ;;  %v307_v17 = vmul.f32 0.2, %v179_v6  ;;  %vm244_vm8 = vcmp.ge.f32.partialorder %v180_v8, 0.0 }
  0x25   :  { %vm245_vm9 = vcmp.ge.f32.partialorder %v181_v9, 0.0  ;;  %v370_v18 = vsel %vm242_vm6, %v178_v4, %v306_v13  ;;  %v308_v19 = vmul.f32 0.2, %v180_v8  ;;  %v309_v20 = vmul.f32 0.2, %v181_v9  ;;  %v52_v4 = vld [vmem:[%s1503_s0 + $0x130] sm:$0xff] }
  0x26   :  { %v112_v21 = vmul.f32 %v1086_v2, %v41_v10  ;;  %1035 = vst [vmem:[%s1506_s3 + $0x50] sm:$0xff] %v919_v16   ;;  %v371_v22 = vsel %vm243_vm7, %v179_v6, %v307_v17  ;;  %v182_v23 = vadd.f32 %v1093_v5, %v111_v11  ;;  %v113_v24 = vmul.f32 %v1086_v2, %v42_v14  ;;  %v53_v13 = vld [vmem:[%s1503_s0 + $0x138] sm:$0xff] }
  0x27   :  { %v114_v25 = vmul.f32 %v1086_v2, %v43_v15  ;;  %v924_v27 = vpack.c.bf16 %v371_v22, %v370_v18  ;;  %v372_v28 = vsel %vm244_vm8, %v180_v8, %v308_v19  ;;  %v373_v29 = vsel %vm245_vm9, %v181_v9, %v309_v20  ;;  %v54_v20 = vld [vmem:[%s1503_s0 + $0x140] sm:$0xff] }
  0x28   :  { %v183_v30 = vadd.f32 %v1093_v5, %v112_v21  ;;  %v929_v32 = vpack.c.bf16 %v373_v29, %v372_v28  ;;  %vm246_vm10 = vcmp.ge.f32.partialorder %v182_v23, 0.0  ;;  %v310_v33 = vmul.f32 0.2, %v182_v23 }
  0x29   :  { %v184_v34 = vadd.f32 %v1093_v5, %v113_v24  ;;  %1036 = vst [vmem:[%s1506_s3 + $0x58] sm:$0xff] %v924_v27   ;;  %v185_v36 = vadd.f32 %v1093_v5, %v114_v25  ;;  %v115_v37 = vmul.f32 %v1086_v2, %v44_v26  ;;  %v116_v41 = vmul.f32 %v1086_v2, %v45_v31  ;;  %v55_v24 = vld [vmem:[%s1503_s0 + $0x148] sm:$0xff] }
  0x2a   :  { %vm247_vm11 = vcmp.ge.f32.partialorder %v183_v30, 0.0  ;;  %v311_v35 = vmul.f32 0.2, %v183_v30  ;;  %1037 = vst [vmem:[%s1506_s3 + $0x60] sm:$0xff] %v929_v32   ;;  %v374_v39 = vsel %vm246_vm10, %v182_v23, %v310_v33  ;;  %v117_v49 = vmul.f32 %v1086_v2, %v46_v38  ;;  %v56_v32 = vld [vmem:[%s1503_s0 + $0x150] sm:$0xff]  ;;  %v57_v33 = vld [vmem:[%s1503_s0 + $0x158] sm:$0xff] }
  0x2b   :  { %vm248_vm12 = vcmp.ge.f32.partialorder %v184_v34, 0.0  ;;  %v312_v40 = vmul.f32 0.2, %v184_v34  ;;  %vm249_vm13 = vcmp.ge.f32.partialorder %v185_v36, 0.0  ;;  %v313_v44 = vmul.f32 0.2, %v185_v36 }
  0x2c   :  { %v375_v43 = vsel %vm247_vm11, %v183_v30, %v311_v35  ;;  %v186_v45 = vadd.f32 %v1093_v5, %v115_v37  ;;  %v187_v48 = vadd.f32 %v1093_v5, %v116_v41  ;;  %v118_v54 = vmul.f32 %v1086_v2, %v47_v42  ;;  %v58_v37 = vld [vmem:[%s1503_s0 + $0x160] sm:$0xff] }
  0x2d   :  { %v934_v46 = vpack.c.bf16 %v375_v43, %v374_v39  ;;  %v376_v47 = vsel %vm248_vm12, %v184_v34, %v312_v40  ;;  %v377_v52 = vsel %vm249_vm13, %v185_v36, %v313_v44  ;;  %v188_v58 = vadd.f32 %v1093_v5, %v117_v49  ;;  %v60_v49 = vld [vmem:[%s1503_s0 + $0x170] sm:$0xff] }
  0x2e   :  { %vm250_vm14 = vcmp.ge.f32.partialorder %v186_v45, 0.0  ;;  %v314_v53 = vmul.f32 0.2, %v186_v45  ;;  %v939_v56 = vpack.c.bf16 %v377_v52, %v376_v47  ;;  %vm251_vm15 = vcmp.ge.f32.partialorder %v187_v48, 0.0 }
  0x2f   :  { %1038 = vst [vmem:[%s1506_s3 + $0x68] sm:$0xff] %v934_v46   ;;  %v315_v57 = vmul.f32 0.2, %v187_v48  ;;  %v189_v60 = vadd.f32 %v1093_v5, %v118_v54  ;;  %v119_v61 = vmul.f32 %v1086_v2, %v48_v50  ;;  %v120_v62 = vmul.f32 %v1086_v2, %v49_v51 }
  0x30   :  { %v378_v59 = vsel %vm250_vm14, %v186_v45, %v314_v53  ;;  %1039 = vst [vmem:[%s1506_s3 + $0x70] sm:$0xff] %v939_v56   ;;  %vm252_vm0 = vcmp.ge.f32.partialorder %v188_v58, 0.0  ;;  %v316_v1 = vmul.f32 0.2, %v188_v58  ;;  %v121_v3 = vmul.f32 %v1086_v2, %v50_v55  ;;  %v59_v45 = vld [vmem:[%s1503_s0 + $0x168] sm:$0xff] }
  0x31   :  { %v379_v0 = vsel %vm251_vm15, %v187_v48, %v315_v57  ;;  %vm253_vm1 = vcmp.ge.f32.partialorder %v189_v60, 0.0  ;;  %v317_v7 = vmul.f32 0.2, %v189_v60  ;;  %v190_v8 = vadd.f32 %v1093_v5, %v119_v61  ;;  %v61_v57 = vld [vmem:[%s1503_s0 + $0x178] sm:$0xff] }
  0x32   :  { %v944_v6 = vpack.c.bf16 %v379_v0, %v378_v59  ;;  %v380_v9 = vsel %vm252_vm0, %v188_v58, %v316_v1  ;;  %v191_v10 = vadd.f32 %v1093_v5, %v120_v62  ;;  %v122_v11 = vmul.f32 %v1086_v2, %v51_v63  ;;  %v62_v0 = vld [vmem:[%s1503_s0 + $0x180] sm:$0xff] }
  0x33   :  { %v192_v12 = vadd.f32 %v1093_v5, %v121_v3  ;;  %v381_v14 = vsel %vm253_vm1, %v189_v60, %v317_v7  ;;  %vm254_vm2 = vcmp.ge.f32.partialorder %v190_v8, 0.0  ;;  %v318_v15 = vmul.f32 0.2, %v190_v8 }
  0x34   :  { %1040 = vst [vmem:[%s1506_s3 + $0x78] sm:$0xff] %v944_v6   ;;  %v123_v16 = vmul.f32 %v1086_v2, %v52_v4  ;;  %v949_v17 = vpack.c.bf16 %v381_v14, %v380_v9  ;;  %vm255_vm3 = vcmp.ge.f32.partialorder %v191_v10, 0.0  ;;  %v319_v18 = vmul.f32 0.2, %v191_v10  ;;  %v63_v6 = vld [vmem:[%s1503_s0 + $0x188] sm:$0xff]  ;;  %v64_v14 = vld [vmem:[%s1503_s0 + $0x190] sm:$0xff] }
  0x35   :  { %v193_v19 = vadd.f32 %v1093_v5, %v122_v11  ;;  %v382_v21 = vsel %vm254_vm2, %v190_v8, %v318_v15  ;;  %vm256_vm4 = vcmp.ge.f32.partialorder %v192_v12, 0.0  ;;  %v320_v22 = vmul.f32 0.2, %v192_v12  ;;  %v65_v15 = vld [vmem:[%s1503_s0 + $0x198] sm:$0xff] }
  0x36   :  { %v124_v23 = vmul.f32 %v1086_v2, %v53_v13  ;;  %1041 = vst [vmem:[%s1506_s3 + $0x80] sm:$0xff] %v949_v17   ;;  %v383_v25 = vsel %vm255_vm3, %v191_v10, %v319_v18  ;;  %v194_v27 = vadd.f32 %v1093_v5, %v123_v16  ;;  %v125_v31 = vmul.f32 %v1086_v2, %v54_v20 }
  0x37   :  { %vm257_vm5 = vcmp.ge.f32.partialorder %v193_v19, 0.0  ;;  %v321_v26 = vmul.f32 0.2, %v193_v19  ;;  %v954_v28 = vpack.c.bf16 %v383_v25, %v382_v21  ;;  %v384_v29 = vsel %vm256_vm4, %v192_v12, %v320_v22 }
  0x38   :  { %v195_v30 = vadd.f32 %v1093_v5, %v124_v23  ;;  %vm258_vm6 = vcmp.ge.f32.partialorder %v194_v27, 0.0  ;;  %v322_v35 = vmul.f32 0.2, %v194_v27  ;;  %v126_v36 = vmul.f32 %v1086_v2, %v55_v24 }
  0x39   :  { %v385_v34 = vsel %vm257_vm5, %v193_v19, %v321_v26  ;;  %1042 = vst [vmem:[%s1506_s3 + $0x88] sm:$0xff] %v954_v28   ;;  %v196_v40 = vadd.f32 %v1093_v5, %v125_v31  ;;  %v127_v43 = vmul.f32 %v1086_v2, %v56_v32  ;;  %v128_v44 = vmul.f32 %v1086_v2, %v57_v33  ;;  %v66_v19 = vld [vmem:[%s1503_s0 + $0x1a0] sm:$0xff]  ;;  %v68_v31 = vld [vmem:[%s1503_s0 + $0x1b0] sm:$0xff] }
  0x3a   :  { %v959_v38 = vpack.c.bf16 %v385_v34, %v384_v29  ;;  %vm259_vm7 = vcmp.ge.f32.partialorder %v195_v30, 0.0  ;;  %v323_v39 = vmul.f32 0.2, %v195_v30  ;;  %v386_v41 = vsel %vm258_vm6, %v194_v27, %v322_v35  ;;  %v67_v27 = vld [vmem:[%s1503_s0 + $0x1a8] sm:$0xff] }
  0x3b   :  { %v197_v42 = vadd.f32 %v1093_v5, %v126_v36  ;;  %vm260_vm8 = vcmp.ge.f32.partialorder %v196_v40, 0.0  ;;  %v324_v47 = vmul.f32 0.2, %v196_v40  ;;  %v129_v48 = vmul.f32 %v1086_v2, %v58_v37 }
  0x3c   :  { %1043 = vst [vmem:[%s1506_s3 + $0x90] sm:$0xff] %v959_v38   ;;  %v387_v46 = vsel %vm259_vm7, %v195_v30, %v323_v39  ;;  %v198_v52 = vadd.f32 %v1093_v5, %v127_v43  ;;  %v199_v54 = vadd.f32 %v1093_v5, %v128_v44  ;;  %v130_v55 = vmul.f32 %v1086_v2, %v59_v45  ;;  %v69_v39 = vld [vmem:[%s1503_s0 + $0x1b8] sm:$0xff] }
  0x3d   :  { %v964_v50 = vpack.c.bf16 %v387_v46, %v386_v41  ;;  %vm261_vm9 = vcmp.ge.f32.partialorder %v197_v42, 0.0  ;;  %v325_v51 = vmul.f32 0.2, %v197_v42  ;;  %v388_v53 = vsel %vm260_vm8, %v196_v40, %v324_v47  ;;  %v70_v46 = vld [vmem:[%s1503_s0 + $0x1c0] sm:$0xff] }
  0x3e   :  { %v200_v56 = vadd.f32 %v1093_v5, %v129_v48  ;;  %vm262_vm10 = vcmp.ge.f32.partialorder %v198_v52, 0.0  ;;  %v326_v59 = vmul.f32 0.2, %v198_v52  ;;  %v131_v60 = vmul.f32 %v1086_v2, %v60_v49 }
  0x3f   :  { %1044 = vst [vmem:[%s1506_s3 + $0x98] sm:$0xff] %v964_v50   ;;  %v389_v58 = vsel %vm261_vm9, %v197_v42, %v325_v51  ;;  %vm263_vm11 = vcmp.ge.f32.partialorder %v199_v54, 0.0  ;;  %v327_v62 = vmul.f32 0.2, %v199_v54  ;;  %v201_v63 = vadd.f32 %v1093_v5, %v130_v55  ;;  %v71_v50 = vld [vmem:[%s1503_s0 + $0x1c8] sm:$0xff] }
  0x40   :  { %v969_v61 = vpack.c.bf16 %v389_v58, %v388_v53  ;;  %v390_v1 = vsel %vm262_vm10, %v198_v52, %v326_v59  ;;  %vm264_vm12 = vcmp.ge.f32.partialorder %v200_v56, 0.0  ;;  %v328_v3 = vmul.f32 0.2, %v200_v56  ;;  %v72_v58 = vld [vmem:[%s1503_s0 + $0x1d0] sm:$0xff]  ;;  %v73_v59 = vld [vmem:[%s1503_s0 + $0x1d8] sm:$0xff] }
  0x41   :  { %v132_v4 = vmul.f32 %v1086_v2, %v61_v57  ;;  %v391_v7 = vsel %vm263_vm11, %v199_v54, %v327_v62  ;;  %vm265_vm13 = vcmp.ge.f32.partialorder %v201_v63, 0.0  ;;  %v329_v8 = vmul.f32 0.2, %v201_v63 }
  0x42   :  { %1045 = vst [vmem:[%s1506_s3 + $0xa0] sm:$0xff] %v969_v61   ;;  %v202_v9 = vadd.f32 %v1093_v5, %v131_v60  ;;  %v974_v10 = vpack.c.bf16 %v391_v7, %v390_v1  ;;  %v392_v11 = vsel %vm264_vm12, %v200_v56, %v328_v3  ;;  %v133_v13 = vmul.f32 %v1086_v2, %v62_v0 }
  0x43   :  { %v203_v12 = vadd.f32 %v1093_v5, %v132_v4  ;;  %v393_v16 = vsel %vm265_vm13, %v201_v63, %v329_v8  ;;  %v134_v18 = vmul.f32 %v1086_v2, %v63_v6  ;;  %v135_v25 = vmul.f32 %v1086_v2, %v64_v14  ;;  %v74_v63 = vld [vmem:[%s1503_s0 + $0x1e0] sm:$0xff] }
  0x44   :  { %vm266_vm14 = vcmp.ge.f32.partialorder %v202_v9, 0.0  ;;  %v330_v17 = vmul.f32 0.2, %v202_v9  ;;  %1046 = vst [vmem:[%s1506_s3 + $0xa8] sm:$0xff] %v974_v10   ;;  %v979_v20 = vpack.c.bf16 %v393_v16, %v392_v11  ;;  %v204_v22 = vadd.f32 %v1093_v5, %v133_v13  ;;  %v76_v13 = vld [vmem:[%s1503_s0 + $0x1f0] sm:$0xff] }
  0x45   :  { %vm267_vm15 = vcmp.ge.f32.partialorder %v203_v12, 0.0  ;;  %v331_v21 = vmul.f32 0.2, %v203_v12  ;;  %v205_v24 = vadd.f32 %v1093_v5, %v134_v18  ;;  %v136_v26 = vmul.f32 %v1086_v2, %v65_v15 }
  0x46   :  { %v394_v23 = vsel %vm266_vm14, %v202_v9, %v330_v17  ;;  %1047 = vst [vmem:[%s1506_s3 + $0xb0] sm:$0xff] %v979_v20   ;;  %vm268_vm0 = vcmp.ge.f32.partialorder %v204_v22, 0.0  ;;  %v332_v29 = vmul.f32 0.2, %v204_v22  ;;  %v137_v30 = vmul.f32 %v1086_v2, %v66_v19  ;;  %v75_v9 = vld [vmem:[%s1503_s0 + $0x1e8] sm:$0xff] }
  0x47   :  { %v395_v28 = vsel %vm267_vm15, %v203_v12, %v331_v21  ;;  %vm269_vm1 = vcmp.ge.f32.partialorder %v205_v24, 0.0  ;;  %v333_v33 = vmul.f32 0.2, %v205_v24  ;;  %v206_v34 = vadd.f32 %v1093_v5, %v135_v25  ;;  %v77_v21 = vld [vmem:[%s1503_s0 + $0x1f8] sm:$0xff] }
  0x48   :  { %v984_v32 = vpack.c.bf16 %v395_v28, %v394_v23  ;;  %v396_v35 = vsel %vm268_vm0, %v204_v22, %v332_v29  ;;  %v207_v36 = vadd.f32 %v1093_v5, %v136_v26  ;;  %v138_v37 = vmul.f32 %v1086_v2, %v67_v27 }
  0x49   :  { %v208_v38 = vadd.f32 %v1093_v5, %v137_v30  ;;  %v397_v40 = vsel %vm269_vm1, %v205_v24, %v333_v33  ;;  %vm270_vm2 = vcmp.ge.f32.partialorder %v206_v34, 0.0  ;;  %v334_v41 = vmul.f32 0.2, %v206_v34 }
  0x4a   :  { %1048 = vst [vmem:[%s1506_s3 + $0xb8] sm:$0xff] %v984_v32   ;;  %v139_v42 = vmul.f32 %v1086_v2, %v68_v31  ;;  %v989_v43 = vpack.c.bf16 %v397_v40, %v396_v35  ;;  %vm271_vm3 = vcmp.ge.f32.partialorder %v207_v36, 0.0  ;;  %v335_v44 = vmul.f32 0.2, %v207_v36 }
  0x4b   :  { %v209_v45 = vadd.f32 %v1093_v5, %v138_v37  ;;  %v398_v47 = vsel %vm270_vm2, %v206_v34, %v334_v41  ;;  %vm272_vm4 = vcmp.ge.f32.partialorder %v208_v38, 0.0  ;;  %v336_v48 = vmul.f32 0.2, %v208_v38 }
  0x4c   :  { %v140_v49 = vmul.f32 %v1086_v2, %v69_v39  ;;  %1049 = vst [vmem:[%s1506_s3 + $0xc0] sm:$0xff] %v989_v43   ;;  %v399_v51 = vsel %vm271_vm3, %v207_v36, %v335_v44  ;;  %v210_v53 = vadd.f32 %v1093_v5, %v139_v42  ;;  %v141_v57 = vmul.f32 %v1086_v2, %v70_v46 }
  0x4d   :  { %vm273_vm5 = vcmp.ge.f32.partialorder %v209_v45, 0.0  ;;  %v337_v52 = vmul.f32 0.2, %v209_v45  ;;  %v994_v54 = vpack.c.bf16 %v399_v51, %v398_v47  ;;  %v400_v55 = vsel %vm272_vm4, %v208_v38, %v336_v48 }
  0x4e   :  { %v211_v56 = vadd.f32 %v1093_v5, %v140_v49  ;;  %vm274_vm6 = vcmp.ge.f32.partialorder %v210_v53, 0.0  ;;  %v338_v61 = vmul.f32 0.2, %v210_v53  ;;  %v142_v62 = vmul.f32 %v1086_v2, %v71_v50 }
  0x4f   :  { %v401_v60 = vsel %vm273_vm5, %v209_v45, %v337_v52  ;;  %1050 = vst [vmem:[%s1506_s3 + $0xc8] sm:$0xff] %v994_v54   ;;  %v212_v3 = vadd.f32 %v1093_v5, %v141_v57  ;;  %v143_v7 = vmul.f32 %v1086_v2, %v72_v58  ;;  %v144_v8 = vmul.f32 %v1086_v2, %v73_v59 }
  0x50   :  { %v999_v0 = vpack.c.bf16 %v401_v60, %v400_v55  ;;  %vm275_vm7 = vcmp.ge.f32.partialorder %v211_v56, 0.0  ;;  %v339_v1 = vmul.f32 0.2, %v211_v56  ;;  %v402_v4 = vsel %vm274_vm6, %v210_v53, %v338_v61 }
  0x51   :  { %v213_v6 = vadd.f32 %v1093_v5, %v142_v62  ;;  %vm276_vm8 = vcmp.ge.f32.partialorder %v212_v3, 0.0  ;;  %v340_v11 = vmul.f32 0.2, %v212_v3  ;;  %v145_v12 = vmul.f32 %v1086_v2, %v74_v63 }
  0x52   :  { %1051 = vst [vmem:[%s1506_s3 + $0xd0] sm:$0xff] %v999_v0   ;;  %v403_v10 = vsel %vm275_vm7, %v211_v56, %v339_v1  ;;  %v214_v16 = vadd.f32 %v1093_v5, %v143_v7  ;;  %v215_v18 = vadd.f32 %v1093_v5, %v144_v8  ;;  %v146_v19 = vmul.f32 %v1086_v2, %v75_v9 }
  0x53   :  { %v1004_v14 = vpack.c.bf16 %v403_v10, %v402_v4  ;;  %vm277_vm9 = vcmp.ge.f32.partialorder %v213_v6, 0.0  ;;  %v341_v15 = vmul.f32 0.2, %v213_v6  ;;  %v404_v17 = vsel %vm276_vm8, %v212_v3, %v340_v11 }
  0x54   :  { %v216_v20 = vadd.f32 %v1093_v5, %v145_v12  ;;  %vm278_vm10 = vcmp.ge.f32.partialorder %v214_v16, 0.0  ;;  %v342_v23 = vmul.f32 0.2, %v214_v16  ;;  %v147_v24 = vmul.f32 %v1086_v2, %v76_v13 }
  0x55   :  { %1052 = vst [vmem:[%s1506_s3 + $0xd8] sm:$0xff] %v1004_v14   ;;  %v405_v22 = vsel %vm277_vm9, %v213_v6, %v341_v15  ;;  %vm279_vm11 = vcmp.ge.f32.partialorder %v215_v18, 0.0  ;;  %v343_v26 = vmul.f32 0.2, %v215_v18  ;;  %v217_v27 = vadd.f32 %v1093_v5, %v146_v19 }
  0x56   :  { %v1009_v25 = vpack.c.bf16 %v405_v22, %v404_v17  ;;  %v406_v28 = vsel %vm278_vm10, %v214_v16, %v342_v23  ;;  %vm280_vm12 = vcmp.ge.f32.partialorder %v216_v20, 0.0  ;;  %v344_v29 = vmul.f32 0.2, %v216_v20 }
  0x57   :  { %v148_v30 = vmul.f32 %v1086_v2, %v77_v21  ;;  %v407_v31 = vsel %vm279_vm11, %v215_v18, %v343_v26  ;;  %vm281_vm13 = vcmp.ge.f32.partialorder %v217_v27, 0.0  ;;  %v345_v32 = vmul.f32 0.2, %v217_v27 }
  0x58   :  { %1053 = vst [vmem:[%s1506_s3 + $0xe0] sm:$0xff] %v1009_v25   ;;  %v218_v33 = vadd.f32 %v1093_v5, %v147_v24  ;;  %v1014_v34 = vpack.c.bf16 %v407_v31, %v406_v28  ;;  %v408_v35 = vsel %vm280_vm12, %v216_v20, %v344_v29 }
  0x59   :  { %v219_v36 = vadd.f32 %v1093_v5, %v148_v30  ;;  %v409_v37 = vsel %vm281_vm13, %v217_v27, %v345_v32 }
  0x5a   :  { %vm282_vm14 = vcmp.ge.f32.partialorder %v218_v33, 0.0  ;;  %v346_v38 = vmul.f32 0.2, %v218_v33  ;;  %1054 = vst [vmem:[%s1506_s3 + $0xe8] sm:$0xff] %v1014_v34   ;;  %v1019_v2 = vpack.c.bf16 %v409_v37, %v408_v35 }
  0x5b   :  { %vm283_vm15 = vcmp.ge.f32.partialorder %v219_v36, 0.0  ;;  %v347_v39 = vmul.f32 0.2, %v219_v36 }
  0x5c   :  { %v410_v40 = vsel %vm282_vm14, %v218_v33, %v346_v38  ;;  %1055 = vst [vmem:[%s1506_s3 + $0xf0] sm:$0xff] %v1019_v2  }
  0x5d   :  { %v411_v41 = vsel %vm283_vm15, %v219_v36, %v347_v39 }
  0x5e   :  { %v1024_v42 = vpack.c.bf16 %v411_v41, %v410_v40 }
  0x60   :  { %1056 = vst [vmem:[%s1506_s3 + $0xf8] sm:$0xff] %v1024_v42  }

// kernel: discriminator_forward.9
= control target key start
LH: loop header
LB: loop body
LE: loop exit
PB: predicated region body
PF: predicated region fallthrough
CT: control target
= control target key end

     0   :  { %vm1152_vm0 = vcmask 1040384   ;;  %s1970_s1 = inlined_call_operand.vmem [shape: bf16[128,128], index: 1, kind: input, shape index: {}]   ;;  %s1971_s0 = inlined_call_operand.vmem [shape: bf16[512,128], index: 0, kind: input, shape index: {}]   ;;  %s1972_s2 = inlined_call_operand.vmem [shape: f32[512,128], index: 2, kind: output, shape index: {0}]   ;;  %s1973_s3 = inlined_call_operand.vmem [shape: f32[1,2,128], index: 3, kind: output, shape index: {1}]  }
   0x1   :  { %v1403_v0 = vld [vmem:[%s1970_s1 + $0x38] sm:$0xff]   ;;  %v1404_v1 = vld [vmem:[%s1970_s1 + $0x30] sm:$0xff]   ;;  %v1405_v2 = vld [vmem:[%s1970_s1 + $0x28] sm:$0xff]  }
   0x2   :  { %1307 = vmatprep.subr.bf16.mxu0 %v1403_v0  ;;  %1387 = vmatprep.subr.bf16.mxu1 %v1403_v0  ;;  %v1406_v3 = vld [vmem:[%s1970_s1 + $0x20] sm:$0xff]   ;;  %v1407_v5 = vld [vmem:[%s1970_s1 + $0x18] sm:$0xff]   ;;  %v1408_v6 = vld [vmem:[%s1970_s1 + $0x10] sm:$0xff]  }
   0x3   :  { %1308 = vmatpush3.bf16.msra.mxu0 %v1403_v0  ;;  %1395 = vmatpush3.bf16.msra.mxu1 %v1403_v0  ;;  %v1411_v4 = vld [vmem:[%s1971_s0] sm:$0xff]   ;;  %v1409_v7 = vld [vmem:[%s1970_s1 + $0x8] sm:$0xff]   ;;  %v1413_v11 = vld [vmem:[%s1971_s0 + $0x10] sm:$0xff]  }
   0x4   :  { %1309 = vmatprep.subr.bf16.mxu0 %v1404_v1  ;;  %1388 = vmatprep.subr.bf16.mxu1 %v1404_v1  ;;  %v1410_v8 = vld [vmem:[%s1970_s1] sm:$0xff]   ;;  %v1412_v10 = vld [vmem:[%s1971_s0 + $0x8] sm:$0xff]   ;;  %v1429_v13 = vld [vmem:[%s1971_s0 + $0x90] sm:$0xff]  }
   0x5   :  { %1323 = vmatprep.mubr.bf16.mxu0 %v1411_v4  ;;  %v1427_v9 = vld [vmem:[%s1971_s0 + $0x80] sm:$0xff]   ;;  %v1428_v12 = vld [vmem:[%s1971_s0 + $0x88] sm:$0xff]   ;;  %v1414_v14 = vld [vmem:[%s1971_s0 + $0x18] sm:$0xff]  }
   0x6   :  { %1355 = vmatprep.mubr.bf16.mxu1 %v1427_v9  ;;  %v1415_v15 = vld [vmem:[%s1971_s0 + $0x20] sm:$0xff]   ;;  %v1430_v16 = vld [vmem:[%s1971_s0 + $0x98] sm:$0xff]   ;;  %v1416_v18 = vld [vmem:[%s1971_s0 + $0x28] sm:$0xff]  }
   0x7   :  { %1310 = vmatpush3.bf16.msra.mxu0 %v1404_v1  ;;  %1396 = vmatpush3.bf16.msra.mxu1 %v1404_v1  ;;  %v1431_v17 = vld [vmem:[%s1971_s0 + $0xa0] sm:$0xff]   ;;  %v1432_v19 = vld [vmem:[%s1971_s0 + $0xa8] sm:$0xff]   ;;  %v1417_v20 = vld [vmem:[%s1971_s0 + $0x30] sm:$0xff]  }
   0x8   :  { %1311 = vmatprep.subr.bf16.mxu0 %v1405_v2  ;;  %1389 = vmatprep.subr.bf16.mxu1 %v1405_v2  ;;  %v1433_v21 = vld [vmem:[%s1971_s0 + $0xb0] sm:$0xff]   ;;  %v1418_v22 = vld [vmem:[%s1971_s0 + $0x38] sm:$0xff]   ;;  %v1419_v24 = vld [vmem:[%s1971_s0 + $0x40] sm:$0xff]  }
   0x9   :  { %v1434_v23 = vld [vmem:[%s1971_s0 + $0xb8] sm:$0xff]   ;;  %v1435_v25 = vld [vmem:[%s1971_s0 + $0xc0] sm:$0xff]   ;;  %v1420_v26 = vld [vmem:[%s1971_s0 + $0x48] sm:$0xff]  }
   0xa   :  { %v1436_v27 = vld [vmem:[%s1971_s0 + $0xc8] sm:$0xff]   ;;  %v1421_v28 = vld [vmem:[%s1971_s0 + $0x50] sm:$0xff]   ;;  %v1422_v30 = vld [vmem:[%s1971_s0 + $0x58] sm:$0xff]  }
   0xb   :  { %1312 = vmatpush3.bf16.msra.mxu0 %v1405_v2  ;;  %1397 = vmatpush3.bf16.msra.mxu1 %v1405_v2  ;;  %v1437_v29 = vld [vmem:[%s1971_s0 + $0xd0] sm:$0xff]   ;;  %v1438_v31 = vld [vmem:[%s1971_s0 + $0xd8] sm:$0xff]   ;;  %v1423_v32 = vld [vmem:[%s1971_s0 + $0x60] sm:$0xff]  }
   0xc   :  { %1313 = vmatprep.subr.bf16.mxu0 %v1406_v3  ;;  %1390 = vmatprep.subr.bf16.mxu1 %v1406_v3  ;;  %v1439_v33 = vld [vmem:[%s1971_s0 + $0xe0] sm:$0xff]   ;;  %v1424_v34 = vld [vmem:[%s1971_s0 + $0x68] sm:$0xff]   ;;  %v1425_v36 = vld [vmem:[%s1971_s0 + $0x70] sm:$0xff]  }
   0xd   :  { %v1440_v35 = vld [vmem:[%s1971_s0 + $0xe8] sm:$0xff]   ;;  %v1441_v37 = vld [vmem:[%s1971_s0 + $0xf0] sm:$0xff]   ;;  %v1426_v38 = vld [vmem:[%s1971_s0 + $0x78] sm:$0xff]  }
   0xe   :  { %v1442_v39 = vld [vmem:[%s1971_s0 + $0xf8] sm:$0xff]  }
   0xf   :  { %1314 = vmatpush3.bf16.msra.mxu0 %v1406_v3  ;;  %1398 = vmatpush3.bf16.msra.mxu1 %v1406_v3 }
  0x10   :  { %1315 = vmatprep.subr.bf16.mxu0 %v1407_v5  ;;  %1391 = vmatprep.subr.bf16.mxu1 %v1407_v5 }
  0x13   :  { %1316 = vmatpush3.bf16.msra.mxu0 %v1407_v5  ;;  %1399 = vmatpush3.bf16.msra.mxu1 %v1407_v5 }
  0x14   :  { %1317 = vmatprep.subr.bf16.mxu0 %v1408_v6  ;;  %1392 = vmatprep.subr.bf16.mxu1 %v1408_v6 }
  0x17   :  { %1318 = vmatpush3.bf16.msra.mxu0 %v1408_v6  ;;  %1400 = vmatpush3.bf16.msra.mxu1 %v1408_v6 }
  0x18   :  { %1319 = vmatprep.subr.bf16.mxu0 %v1409_v7  ;;  %1393 = vmatprep.subr.bf16.mxu1 %v1409_v7 }
  0x1b   :  { %1320 = vmatpush3.bf16.msra.mxu0 %v1409_v7  ;;  %1401 = vmatpush3.bf16.msra.mxu1 %v1409_v7 }
  0x1c   :  { %1321 = vmatprep.subr.bf16.mxu0 %v1410_v8  ;;  %1394 = vmatprep.subr.bf16.mxu1 %v1410_v8 }
  0x1f   :  { %1322 = vmatpush3.bf16.msra.mxu0 %v1410_v8  ;;  %1402 = vmatpush3.bf16.msra.mxu1 %v1410_v8 }
  0x22   :  { %1324 = vmatmul.mubr.bf16.vlgmr.msra.gmra.mxu0 %v1412_v10  ;;  %1356 = vmatmul.mubr.bf16.vlgmr.msra.gmra.mxu1 %v1428_v12 }
  0x23   :  { %1327 = vmatprep.mubr.bf16.mxu0 %v1413_v11  ;;  %1359 = vmatprep.mubr.bf16.mxu1 %v1429_v13 }
  0x2a   :  { %1328 = vmatmul.mubr.bf16.gmra.mxu0 %v1414_v14  ;;  %1360 = vmatmul.mubr.bf16.gmra.mxu1 %v1430_v16 }
  0x2b   :  { %1331 = vmatprep.mubr.bf16.mxu0 %v1415_v15  ;;  %1363 = vmatprep.mubr.bf16.mxu1 %v1431_v17 }
  0x32   :  { %1332 = vmatmul.mubr.bf16.gmra.mxu0 %v1416_v18  ;;  %1364 = vmatmul.mubr.bf16.gmra.mxu1 %v1432_v19 }
  0x33   :  { %1335 = vmatprep.mubr.bf16.mxu0 %v1417_v20  ;;  %1367 = vmatprep.mubr.bf16.mxu1 %v1433_v21 }
  0x3a   :  { %1336 = vmatmul.mubr.bf16.gmra.mxu0 %v1418_v22  ;;  %1368 = vmatmul.mubr.bf16.gmra.mxu1 %v1434_v23 }
  0x3b   :  { %1339 = vmatprep.mubr.bf16.mxu0 %v1419_v24  ;;  %1371 = vmatprep.mubr.bf16.mxu1 %v1435_v25 }
  0x42   :  { %1340 = vmatmul.mubr.bf16.gmra.mxu0 %v1420_v26  ;;  %1372 = vmatmul.mubr.bf16.gmra.mxu1 %v1436_v27 }
  0x43   :  { %1343 = vmatprep.mubr.bf16.mxu0 %v1421_v28  ;;  %1375 = vmatprep.mubr.bf16.mxu1 %v1437_v29 }
  0x4a   :  { %1344 = vmatmul.mubr.bf16.gmra.mxu0 %v1422_v30  ;;  %1376 = vmatmul.mubr.bf16.gmra.mxu1 %v1438_v31 }
  0x4b   :  { %1347 = vmatprep.mubr.bf16.mxu0 %v1423_v32  ;;  %1379 = vmatprep.mubr.bf16.mxu1 %v1439_v33 }
  0x52   :  { %1348 = vmatmul.mubr.bf16.gmra.mxu0 %v1424_v34  ;;  %1380 = vmatmul.mubr.bf16.gmra.mxu1 %v1440_v35 }
  0x53   :  { %1351 = vmatprep.mubr.bf16.mxu0 %v1425_v36  ;;  %1383 = vmatprep.mubr.bf16.mxu1 %v1441_v37 }
  0x5a   :  { %1352 = vmatmul.mubr.bf16.gmra.mxu0 %v1426_v38  ;;  %1384 = vmatmul.mubr.bf16.gmra.mxu1 %v1442_v39 }
  0xe2   :  { %v1325_v40 = vpop.f32.mrf.mxu0  ;;  %v1583_v41 = vpop.f32.mrf.mxu1 }
  0xe3   :  { %1157 = vst [vmem:[%s1972_s2 + $0x10] sm:$0xff] %v1325_v40  ;;  %1189 = vst [vmem:[%s1972_s2 + $0x110] sm:$0xff] %v1583_v41  ;;  %v1021_v53 = vmul.f32 %v1325_v40, %v1325_v40 }
  0xe4   :  { %v500_v42 = vpop.f32.mrf.mxu0  ;;  %v1592_v43 = vpop.f32.mrf.mxu1 }
  0xe5   :  { %1155 = vst [vmem:[%s1972_s2] sm:$0xff] %v500_v42  ;;  %1187 = vst [vmem:[%s1972_s2 + $0x100] sm:$0xff] %v1592_v43  ;;  %v1019_v48 = vmul.f32 %v500_v42, %v500_v42 }
  0xe6   :  { %v1326_v44 = vpop.f32.mrf.mxu0  ;;  %v1601_v45 = vpop.f32.mrf.mxu1 }
  0xe7   :  { %1158 = vst [vmem:[%s1972_s2 + $0x18] sm:$0xff] %v1326_v44  ;;  %1190 = vst [vmem:[%s1972_s2 + $0x118] sm:$0xff] %v1601_v45  ;;  %v1022_v58 = vmul.f32 %v1326_v44, %v1326_v44 }
  0xe8   :  { %v503_v46 = vpop.f32.mrf.mxu0  ;;  %v1610_v47 = vpop.f32.mrf.mxu1 }
  0xe9   :  { %v950_v49 = vadd.f32 %v503_v46, %v500_v42  ;;  %v1020_v50 = vmul.f32 %v503_v46, %v503_v46  ;;  %1156 = vst [vmem:[%s1972_s2 + $0x8] sm:$0xff] %v503_v46  ;;  %1188 = vst [vmem:[%s1972_s2 + $0x108] sm:$0xff] %v1610_v47 }
  0xea   :  { %v1329_v51 = vpop.f32.mrf.mxu0  ;;  %v1619_v52 = vpop.f32.mrf.mxu1 }
  0xeb   :  { %v951_v54 = vadd.f32 %v1325_v40, %v950_v49  ;;  %v1083_v55 = vadd.f32 %v1020_v50, %v1019_v48  ;;  %1161 = vst [vmem:[%s1972_s2 + $0x30] sm:$0xff] %v1329_v51  ;;  %1193 = vst [vmem:[%s1972_s2 + $0x130] sm:$0xff] %v1619_v52  ;;  %v1025_v9 = vmul.f32 %v1329_v51, %v1329_v51 }
  0xec   :  { %v516_v56 = vpop.f32.mrf.mxu0  ;;  %v1628_v57 = vpop.f32.mrf.mxu1 }
  0xed   :  { %v1084_v59 = vadd.f32 %v1083_v55, %v1021_v53  ;;  %v952_v60 = vadd.f32 %v1326_v44, %v951_v54  ;;  %1159 = vst [vmem:[%s1972_s2 + $0x20] sm:$0xff] %v516_v56  ;;  %1191 = vst [vmem:[%s1972_s2 + $0x120] sm:$0xff] %v1628_v57  ;;  %v1023_v0 = vmul.f32 %v516_v56, %v516_v56 }
  0xee   :  { %v1330_v61 = vpop.f32.mrf.mxu0  ;;  %v1637_v62 = vpop.f32.mrf.mxu1 }
  0xef   :  { %v953_v63 = vadd.f32 %v952_v60, %v516_v56  ;;  %v1085_v1 = vadd.f32 %v1084_v59, %v1022_v58  ;;  %1162 = vst [vmem:[%s1972_s2 + $0x38] sm:$0xff] %v1330_v61  ;;  %1194 = vst [vmem:[%s1972_s2 + $0x138] sm:$0xff] %v1637_v62  ;;  %v1026_v14 = vmul.f32 %v1330_v61, %v1330_v61 }
  0xf0   :  { %v519_v2 = vpop.f32.mrf.mxu0  ;;  %v1646_v3 = vpop.f32.mrf.mxu1 }
  0xf1   :  { %v1086_v4 = vadd.f32 %v1085_v1, %v1023_v0  ;;  %v954_v5 = vadd.f32 %v953_v63, %v519_v2  ;;  %v1024_v6 = vmul.f32 %v519_v2, %v519_v2  ;;  %1160 = vst [vmem:[%s1972_s2 + $0x28] sm:$0xff] %v519_v2  ;;  %1192 = vst [vmem:[%s1972_s2 + $0x128] sm:$0xff] %v1646_v3 }
  0xf2   :  { %v1333_v7 = vpop.f32.mrf.mxu0  ;;  %v1655_v8 = vpop.f32.mrf.mxu1 }
  0xf3   :  { %v955_v10 = vadd.f32 %v1329_v51, %v954_v5  ;;  %v1087_v11 = vadd.f32 %v1086_v4, %v1024_v6  ;;  %1165 = vst [vmem:[%s1972_s2 + $0x50] sm:$0xff] %v1333_v7  ;;  %1197 = vst [vmem:[%s1972_s2 + $0x150] sm:$0xff] %v1655_v8  ;;  %v1029_v29 = vmul.f32 %v1333_v7, %v1333_v7 }
  0xf4   :  { %v532_v12 = vpop.f32.mrf.mxu0  ;;  %v1664_v13 = vpop.f32.mrf.mxu1 }
  0xf5   :  { %v1088_v15 = vadd.f32 %v1087_v11, %v1025_v9  ;;  %v956_v16 = vadd.f32 %v1330_v61, %v955_v10  ;;  %1163 = vst [vmem:[%s1972_s2 + $0x40] sm:$0xff] %v532_v12  ;;  %1195 = vst [vmem:[%s1972_s2 + $0x140] sm:$0xff] %v1664_v13  ;;  %v1027_v20 = vmul.f32 %v532_v12, %v532_v12 }
  0xf6   :  { %v1334_v17 = vpop.f32.mrf.mxu0  ;;  %v1673_v18 = vpop.f32.mrf.mxu1 }
  0xf7   :  { %v957_v19 = vadd.f32 %v956_v16, %v532_v12  ;;  %v1089_v21 = vadd.f32 %v1088_v15, %v1026_v14  ;;  %1166 = vst [vmem:[%s1972_s2 + $0x58] sm:$0xff] %v1334_v17  ;;  %1198 = vst [vmem:[%s1972_s2 + $0x158] sm:$0xff] %v1673_v18  ;;  %v1030_v34 = vmul.f32 %v1334_v17, %v1334_v17 }
  0xf8   :  { %v535_v22 = vpop.f32.mrf.mxu0  ;;  %v1682_v23 = vpop.f32.mrf.mxu1 }
  0xf9   :  { %v1090_v24 = vadd.f32 %v1089_v21, %v1027_v20  ;;  %v958_v25 = vadd.f32 %v957_v19, %v535_v22  ;;  %v1028_v26 = vmul.f32 %v535_v22, %v535_v22  ;;  %1164 = vst [vmem:[%s1972_s2 + $0x48] sm:$0xff] %v535_v22  ;;  %1196 = vst [vmem:[%s1972_s2 + $0x148] sm:$0xff] %v1682_v23 }
  0xfa   :  { %v1337_v27 = vpop.f32.mrf.mxu0  ;;  %v1691_v28 = vpop.f32.mrf.mxu1 }
  0xfb   :  { %v959_v30 = vadd.f32 %v1333_v7, %v958_v25  ;;  %v1091_v31 = vadd.f32 %v1090_v24, %v1028_v26  ;;  %1169 = vst [vmem:[%s1972_s2 + $0x70] sm:$0xff] %v1337_v27  ;;  %1201 = vst [vmem:[%s1972_s2 + $0x170] sm:$0xff] %v1691_v28  ;;  %v1033_v54 = vmul.f32 %v1337_v27, %v1337_v27 }
  0xfc   :  { %v548_v32 = vpop.f32.mrf.mxu0  ;;  %v1700_v33 = vpop.f32.mrf.mxu1 }
  0xfd   :  { %v1092_v35 = vadd.f32 %v1091_v31, %v1029_v29  ;;  %v960_v36 = vadd.f32 %v1334_v17, %v959_v30  ;;  %1167 = vst [vmem:[%s1972_s2 + $0x60] sm:$0xff] %v548_v32  ;;  %1199 = vst [vmem:[%s1972_s2 + $0x160] sm:$0xff] %v1700_v33  ;;  %v1031_v40 = vmul.f32 %v548_v32, %v548_v32 }
  0xfe   :  { %v1338_v37 = vpop.f32.mrf.mxu0  ;;  %v1709_v38 = vpop.f32.mrf.mxu1 }
  0xff   :  { %v961_v39 = vadd.f32 %v960_v36, %v548_v32  ;;  %v1093_v42 = vadd.f32 %v1092_v35, %v1030_v34  ;;  %1170 = vst [vmem:[%s1972_s2 + $0x78] sm:$0xff] %v1338_v37  ;;  %1202 = vst [vmem:[%s1972_s2 + $0x178] sm:$0xff] %v1709_v38  ;;  %v1034_v60 = vmul.f32 %v1338_v37, %v1338_v37 }
 0x100   :  { %v551_v44 = vpop.f32.mrf.mxu0  ;;  %v1718_v46 = vpop.f32.mrf.mxu1 }
 0x101   :  { %v1094_v48 = vadd.f32 %v1093_v42, %v1031_v40  ;;  %v962_v49 = vadd.f32 %v961_v39, %v551_v44  ;;  %v1032_v50 = vmul.f32 %v551_v44, %v551_v44  ;;  %1168 = vst [vmem:[%s1972_s2 + $0x68] sm:$0xff] %v551_v44  ;;  %1200 = vst [vmem:[%s1972_s2 + $0x168] sm:$0xff] %v1718_v46 }
 0x102   :  { %v1341_v51 = vpop.f32.mrf.mxu0  ;;  %v1727_v53 = vpop.f32.mrf.mxu1 }
 0x103   :  { %v963_v55 = vadd.f32 %v1337_v27, %v962_v49  ;;  %v1095_v56 = vadd.f32 %v1094_v48, %v1032_v50  ;;  %1173 = vst [vmem:[%s1972_s2 + $0x90] sm:$0xff] %v1341_v51  ;;  %1205 = vst [vmem:[%s1972_s2 + $0x190] sm:$0xff] %v1727_v53  ;;  %v1037_v15 = vmul.f32 %v1341_v51, %v1341_v51 }
 0x104   :  { %v564_v58 = vpop.f32.mrf.mxu0  ;;  %v1736_v59 = vpop.f32.mrf.mxu1 }
 0x105   :  { %v1096_v61 = vadd.f32 %v1095_v56, %v1033_v54  ;;  %v964_v63 = vadd.f32 %v1338_v37, %v963_v55  ;;  %1171 = vst [vmem:[%s1972_s2 + $0x80] sm:$0xff] %v564_v58  ;;  %1203 = vst [vmem:[%s1972_s2 + $0x180] sm:$0xff] %v1736_v59  ;;  %v1035_v4 = vmul.f32 %v564_v58, %v564_v58 }
 0x106   :  { %v1342_v0 = vpop.f32.mrf.mxu0  ;;  %v1745_v1 = vpop.f32.mrf.mxu1 }
 0x107   :  { %v965_v2 = vadd.f32 %v964_v63, %v564_v58  ;;  %v1097_v5 = vadd.f32 %v1096_v61, %v1034_v60  ;;  %1174 = vst [vmem:[%s1972_s2 + $0x98] sm:$0xff] %v1342_v0  ;;  %1206 = vst [vmem:[%s1972_s2 + $0x198] sm:$0xff] %v1745_v1  ;;  %v1038_v21 = vmul.f32 %v1342_v0, %v1342_v0 }
 0x108   :  { %v567_v6 = vpop.f32.mrf.mxu0  ;;  %v1754_v7 = vpop.f32.mrf.mxu1 }
 0x109   :  { %v1098_v9 = vadd.f32 %v1097_v5, %v1035_v4  ;;  %v966_v10 = vadd.f32 %v965_v2, %v567_v6  ;;  %v1036_v11 = vmul.f32 %v567_v6, %v567_v6  ;;  %1172 = vst [vmem:[%s1972_s2 + $0x88] sm:$0xff] %v567_v6  ;;  %1204 = vst [vmem:[%s1972_s2 + $0x188] sm:$0xff] %v1754_v7 }
 0x10a   :  { %v1345_v12 = vpop.f32.mrf.mxu0  ;;  %v1763_v14 = vpop.f32.mrf.mxu1 }
 0x10b   :  { %v967_v16 = vadd.f32 %v1341_v51, %v966_v10  ;;  %v1099_v17 = vadd.f32 %v1098_v9, %v1036_v11  ;;  %1177 = vst [vmem:[%s1972_s2 + $0xb0] sm:$0xff] %v1345_v12  ;;  %1209 = vst [vmem:[%s1972_s2 + $0x1b0] sm:$0xff] %v1763_v14  ;;  %v1041_v40 = vmul.f32 %v1345_v12, %v1345_v12 }
 0x10c   :  { %v580_v19 = vpop.f32.mrf.mxu0  ;;  %v1772_v20 = vpop.f32.mrf.mxu1 }
 0x10d   :  { %v1100_v22 = vadd.f32 %v1099_v17, %v1037_v15  ;;  %v968_v24 = vadd.f32 %v1342_v0, %v967_v16  ;;  %1175 = vst [vmem:[%s1972_s2 + $0xa0] sm:$0xff] %v580_v19  ;;  %1207 = vst [vmem:[%s1972_s2 + $0x1a0] sm:$0xff] %v1772_v20  ;;  %v1039_v29 = vmul.f32 %v580_v19, %v580_v19 }
 0x10e   :  { %v1346_v25 = vpop.f32.mrf.mxu0  ;;  %v1781_v26 = vpop.f32.mrf.mxu1 }
 0x10f   :  { %v969_v27 = vadd.f32 %v968_v24, %v580_v19  ;;  %v1101_v30 = vadd.f32 %v1100_v22, %v1038_v21  ;;  %1178 = vst [vmem:[%s1972_s2 + $0xb8] sm:$0xff] %v1346_v25  ;;  %1210 = vst [vmem:[%s1972_s2 + $0x1b8] sm:$0xff] %v1781_v26  ;;  %v1042_v50 = vmul.f32 %v1346_v25, %v1346_v25 }
 0x110   :  { %v583_v31 = vpop.f32.mrf.mxu0  ;;  %v1790_v32 = vpop.f32.mrf.mxu1 }
 0x111   :  { %v1102_v34 = vadd.f32 %v1101_v30, %v1039_v29  ;;  %v970_v35 = vadd.f32 %v969_v27, %v583_v31  ;;  %v1040_v36 = vmul.f32 %v583_v31, %v583_v31  ;;  %1176 = vst [vmem:[%s1972_s2 + $0xa8] sm:$0xff] %v583_v31  ;;  %1208 = vst [vmem:[%s1972_s2 + $0x1a8] sm:$0xff] %v1790_v32 }
 0x112   :  { %v1349_v37 = vpop.f32.mrf.mxu0  ;;  %v1799_v39 = vpop.f32.mrf.mxu1 }
 0x113   :  { %v971_v42 = vadd.f32 %v1345_v12, %v970_v35  ;;  %v1103_v44 = vadd.f32 %v1102_v34, %v1040_v36  ;;  %1181 = vst [vmem:[%s1972_s2 + $0xd0] sm:$0xff] %v1349_v37  ;;  %1213 = vst [vmem:[%s1972_s2 + $0x1d0] sm:$0xff] %v1799_v39  ;;  %v1045_v10 = vmul.f32 %v1349_v37, %v1349_v37 }
 0x114   :  { %v596_v48 = vpop.f32.mrf.mxu0  ;;  %v1808_v49 = vpop.f32.mrf.mxu1 }
 0x115   :  { %v1104_v51 = vadd.f32 %v1103_v44, %v1041_v40  ;;  %v972_v54 = vadd.f32 %v1346_v25, %v971_v42  ;;  %1179 = vst [vmem:[%s1972_s2 + $0xc0] sm:$0xff] %v596_v48  ;;  %1211 = vst [vmem:[%s1972_s2 + $0x1c0] sm:$0xff] %v1808_v49  ;;  %v1043_v60 = vmul.f32 %v596_v48, %v596_v48 }
 0x116   :  { %v1350_v55 = vpop.f32.mrf.mxu0  ;;  %v1817_v56 = vpop.f32.mrf.mxu1 }
 0x117   :  { %v973_v58 = vadd.f32 %v972_v54, %v596_v48  ;;  %v1105_v61 = vadd.f32 %v1104_v51, %v1042_v50  ;;  %1182 = vst [vmem:[%s1972_s2 + $0xd8] sm:$0xff] %v1350_v55  ;;  %1214 = vst [vmem:[%s1972_s2 + $0x1d8] sm:$0xff] %v1817_v56  ;;  %v1046_v17 = vmul.f32 %v1350_v55, %v1350_v55 }
 0x118   :  { %v599_v63 = vpop.f32.mrf.mxu0  ;;  %v1826_v0 = vpop.f32.mrf.mxu1  ;;  %v1051_v51 = vmul.f32 %v1592_v43, %v1592_v43 }
 0x119   :  { %v1106_v2 = vadd.f32 %v1105_v61, %v1043_v60  ;;  %v974_v4 = vadd.f32 %v973_v58, %v599_v63  ;;  %v1044_v5 = vmul.f32 %v599_v63, %v599_v63  ;;  %1180 = vst [vmem:[%s1972_s2 + $0xc8] sm:$0xff] %v599_v63  ;;  %1212 = vst [vmem:[%s1972_s2 + $0x1c8] sm:$0xff] %v1826_v0 }
 0x11a   :  { %v1353_v6 = vpop.f32.mrf.mxu0  ;;  %v1835_v9 = vpop.f32.mrf.mxu1  ;;  %v1052_v60 = vmul.f32 %v1610_v47, %v1610_v47  ;;  %v1053_v63 = vmul.f32 %v1583_v41, %v1583_v41 }
 0x11b   :  { %v975_v11 = vadd.f32 %v1349_v37, %v974_v4  ;;  %v1107_v12 = vadd.f32 %v1106_v2, %v1044_v5  ;;  %1185 = vst [vmem:[%s1972_s2 + $0xf0] sm:$0xff] %v1353_v6  ;;  %1217 = vst [vmem:[%s1972_s2 + $0x1f0] sm:$0xff] %v1835_v9  ;;  %v1049_v37 = vmul.f32 %v1353_v6, %v1353_v6 }
 0x11c   :  { %v612_v15 = vpop.f32.mrf.mxu0  ;;  %v1844_v16 = vpop.f32.mrf.mxu1  ;;  %v1054_v5 = vmul.f32 %v1601_v45, %v1601_v45 }
 0x11d   :  { %v1108_v19 = vadd.f32 %v1107_v12, %v1045_v10  ;;  %v976_v21 = vadd.f32 %v1350_v55, %v975_v11  ;;  %1183 = vst [vmem:[%s1972_s2 + $0xe0] sm:$0xff] %v612_v15  ;;  %1215 = vst [vmem:[%s1972_s2 + $0x1e0] sm:$0xff] %v1844_v16  ;;  %v1047_v27 = vmul.f32 %v612_v15, %v612_v15 }
 0x11e   :  { %v1354_v22 = vpop.f32.mrf.mxu0  ;;  %v1853_v24 = vpop.f32.mrf.mxu1  ;;  %v1055_v11 = vmul.f32 %v1628_v57, %v1628_v57 }
 0x11f   :  { %v977_v25 = vadd.f32 %v976_v21, %v612_v15  ;;  %v1109_v29 = vadd.f32 %v1108_v19, %v1046_v17  ;;  %1186 = vst [vmem:[%s1972_s2 + $0xf8] sm:$0xff] %v1354_v22  ;;  %1218 = vst [vmem:[%s1972_s2 + $0x1f8] sm:$0xff] %v1853_v24  ;;  %v1050_v44 = vmul.f32 %v1354_v22, %v1354_v22 }
 0x120   :  { %v615_v30 = vpop.f32.mrf.mxu0  ;;  %v1862_v31 = vpop.f32.mrf.mxu1  ;;  %v1056_v17 = vmul.f32 %v1646_v3, %v1646_v3 }
 0x121   :  { %v1110_v34 = vadd.f32 %v1109_v29, %v1047_v27  ;;  %v978_v35 = vadd.f32 %v977_v25, %v615_v30  ;;  %v1048_v36 = vmul.f32 %v615_v30, %v615_v30  ;;  %1184 = vst [vmem:[%s1972_s2 + $0xe8] sm:$0xff] %v615_v30  ;;  %1216 = vst [vmem:[%s1972_s2 + $0x1e8] sm:$0xff] %v1862_v31 }
 0x122   :  { %v1059_v27 = vmul.f32 %v1664_v13, %v1664_v13 }
 0x123   :  { %v979_v40 = vadd.f32 %v1353_v6, %v978_v35  ;;  %v1111_v42 = vadd.f32 %v1110_v34, %v1048_v36  ;;  %v1060_v34 = vmul.f32 %v1682_v23, %v1682_v23 }
 0x125   :  { %v980_v48 = vadd.f32 %v1354_v22, %v979_v40  ;;  %v1112_v50 = vadd.f32 %v1111_v42, %v1049_v37  ;;  %v1063_v42 = vmul.f32 %v1700_v33, %v1700_v33 }
 0x127   :  { %v1113_v54 = vadd.f32 %v1112_v50, %v1050_v44  ;;  %v981_v55 = vadd.f32 %v980_v48, %v1592_v43  ;;  %v1064_v50 = vmul.f32 %v1718_v46, %v1718_v46 }
 0x129   :  { %v982_v58 = vadd.f32 %v981_v55, %v1610_v47  ;;  %v1114_v61 = vadd.f32 %v1113_v54, %v1051_v51 }
 0x12b   :  { %v983_v2 = vadd.f32 %v1583_v41, %v982_v58  ;;  %v1115_v4 = vadd.f32 %v1114_v61, %v1052_v60  ;;  %v1057_v41 = vmul.f32 %v1619_v52, %v1619_v52  ;;  %v1067_v60 = vmul.f32 %v1736_v59, %v1736_v59 }
 0x12d   :  { %v1116_v6 = vadd.f32 %v1115_v4, %v1053_v63  ;;  %v984_v10 = vadd.f32 %v1601_v45, %v983_v2  ;;  %v1058_v45 = vmul.f32 %v1637_v62, %v1637_v62  ;;  %v1068_v2 = vmul.f32 %v1754_v7, %v1754_v7 }
 0x12f   :  { %v985_v43 = vadd.f32 %v984_v10, %v1628_v57  ;;  %v1117_v12 = vadd.f32 %v1116_v6, %v1054_v5 }
 0x131   :  { %v1118_v47 = vadd.f32 %v1117_v12, %v1055_v11  ;;  %v986_v15 = vadd.f32 %v985_v43, %v1646_v3  ;;  %v1071_v43 = vmul.f32 %v1772_v20, %v1772_v20 }
 0x133   :  { %v987_v19 = vadd.f32 %v1619_v52, %v986_v15  ;;  %v1119_v21 = vadd.f32 %v1118_v47, %v1056_v17  ;;  %v1061_v52 = vmul.f32 %v1655_v8, %v1655_v8  ;;  %v1072_v47 = vmul.f32 %v1790_v32, %v1790_v32 }
 0x135   :  { %v1120_v22 = vadd.f32 %v1119_v21, %v1057_v41  ;;  %v988_v25 = vadd.f32 %v1637_v62, %v987_v19  ;;  %v1062_v62 = vmul.f32 %v1673_v18, %v1673_v18  ;;  %v1075_v21 = vmul.f32 %v1808_v49, %v1808_v49 }
 0x137   :  { %v989_v57 = vadd.f32 %v988_v25, %v1664_v13  ;;  %v1121_v29 = vadd.f32 %v1120_v22, %v1058_v45  ;;  %v1076_v25 = vmul.f32 %v1826_v0, %v1826_v0 }
 0x139   :  { %v1122_v30 = vadd.f32 %v1121_v29, %v1059_v27  ;;  %v990_v3 = vadd.f32 %v989_v57, %v1682_v23 }
 0x13b   :  { %v991_v35 = vadd.f32 %v1655_v8, %v990_v3  ;;  %v1123_v36 = vadd.f32 %v1122_v30, %v1060_v34  ;;  %v1065_v8 = vmul.f32 %v1691_v28, %v1691_v28  ;;  %v1079_v3 = vmul.f32 %v1844_v16, %v1844_v16 }
 0x13d   :  { %v1124_v37 = vadd.f32 %v1123_v36, %v1061_v52  ;;  %v992_v40 = vadd.f32 %v1673_v18, %v991_v35  ;;  %v1066_v18 = vmul.f32 %v1709_v38, %v1709_v38  ;;  %v1080_v35 = vmul.f32 %v1862_v31, %v1862_v31 }
 0x13f   :  { %v993_v13 = vadd.f32 %v992_v40, %v1700_v33  ;;  %v1125_v44 = vadd.f32 %v1124_v37, %v1062_v62 }
 0x141   :  { %v1126_v48 = vadd.f32 %v1125_v44, %v1063_v42  ;;  %v994_v23 = vadd.f32 %v993_v13, %v1718_v46 }
 0x143   :  { %v995_v51 = vadd.f32 %v1691_v28, %v994_v23  ;;  %v1127_v54 = vadd.f32 %v1126_v48, %v1064_v50  ;;  %v1069_v28 = vmul.f32 %v1727_v53, %v1727_v53 }
 0x145   :  { %v1128_v55 = vadd.f32 %v1127_v54, %v1065_v8  ;;  %v996_v58 = vadd.f32 %v1709_v38, %v995_v51  ;;  %v1070_v38 = vmul.f32 %v1745_v1, %v1745_v1 }
 0x147   :  { %v997_v33 = vadd.f32 %v996_v58, %v1736_v59  ;;  %v1129_v61 = vadd.f32 %v1128_v55, %v1066_v18 }
 0x149   :  { %v1130_v63 = vadd.f32 %v1129_v61, %v1067_v60  ;;  %v998_v46 = vadd.f32 %v997_v33, %v1754_v7 }
 0x14b   :  { %v999_v4 = vadd.f32 %v1727_v53, %v998_v46  ;;  %v1131_v5 = vadd.f32 %v1130_v63, %v1068_v2  ;;  %v1073_v53 = vmul.f32 %v1763_v14, %v1763_v14 }
 0x14d   :  { %v1132_v6 = vadd.f32 %v1131_v5, %v1069_v28  ;;  %v1000_v10 = vadd.f32 %v1745_v1, %v999_v4  ;;  %v1074_v1 = vmul.f32 %v1781_v26, %v1781_v26 }
 0x14f   :  { %v1001_v59 = vadd.f32 %v1000_v10, %v1772_v20  ;;  %v1133_v11 = vadd.f32 %v1132_v6, %v1070_v38 }
 0x151   :  { %v1134_v12 = vadd.f32 %v1133_v11, %v1071_v43  ;;  %v1002_v7 = vadd.f32 %v1001_v59, %v1790_v32 }
 0x153   :  { %v1003_v15 = vadd.f32 %v1763_v14, %v1002_v7  ;;  %v1135_v17 = vadd.f32 %v1134_v12, %v1072_v47  ;;  %v1077_v14 = vmul.f32 %v1799_v39, %v1799_v39 }
 0x155   :  { %v1136_v41 = vadd.f32 %v1135_v17, %v1073_v53  ;;  %v1004_v19 = vadd.f32 %v1781_v26, %v1003_v15  ;;  %v1078_v26 = vmul.f32 %v1817_v56, %v1817_v56 }
 0x157   :  { %v1005_v20 = vadd.f32 %v1004_v19, %v1808_v49  ;;  %v1137_v45 = vadd.f32 %v1136_v41, %v1074_v1 }
 0x159   :  { %v1138_v22 = vadd.f32 %v1137_v45, %v1075_v21  ;;  %v1006_v32 = vadd.f32 %v1005_v20, %v1826_v0 }
 0x15b   :  { %v1007_v57 = vadd.f32 %v1799_v39, %v1006_v32  ;;  %v1139_v27 = vadd.f32 %v1138_v22, %v1076_v25  ;;  %v1081_v39 = vmul.f32 %v1835_v9, %v1835_v9 }
 0x15d   :  { %v1140_v29 = vadd.f32 %v1139_v27, %v1077_v14  ;;  %v1008_v30 = vadd.f32 %v1817_v56, %v1007_v57  ;;  %v1082_v56 = vmul.f32 %v1853_v24, %v1853_v24 }
 0x15f   :  { %v1009_v49 = vadd.f32 %v1008_v30, %v1844_v16  ;;  %v1141_v34 = vadd.f32 %v1140_v29, %v1078_v26 }
 0x161   :  { %v1142_v52 = vadd.f32 %v1141_v34, %v1079_v3  ;;  %v1010_v0 = vadd.f32 %v1009_v49, %v1862_v31 }
 0x163   :  { %v1011_v36 = vadd.f32 %v1835_v9, %v1010_v0  ;;  %v1143_v62 = vadd.f32 %v1142_v52, %v1080_v35 }
 0x165   :  { %v1012_v37 = vadd.f32 %v1853_v24, %v1011_v36  ;;  %v1144_v40 = vadd.f32 %v1143_v62, %v1081_v39 }
 0x167   :  { %v1013_v16 = vrot.slane %v1012_v37, 4  ;;  %v1145_v13 = vadd.f32 %v1144_v40, %v1082_v56 }
 0x169   :  { %v1014_v42 = vadd.f32 %v1013_v16, %v1012_v37  ;;  %v1146_v44 = vrot.slane %v1145_v13, 4 }
 0x16b   :  { %v1015_v48 = vrot.slane %v1014_v42, 2  ;;  %v1147_v23 = vadd.f32 %v1146_v44, %v1145_v13 }
 0x16d   :  { %v1016_v50 = vadd.f32 %v1015_v48, %v1014_v42  ;;  %v1148_v31 = vrot.slane %v1147_v23, 2 }
 0x16f   :  { %v1017_v8 = vrot.slane %v1016_v50, 1  ;;  %v1149_v51 = vadd.f32 %v1148_v31, %v1147_v23 }
 0x171   :  { %v1150_v54 = vrot.slane %v1149_v51, 1  ;;  %v1018_v9 = vadd.f32 %v1017_v8, %v1016_v50 }
 0x173   :  { %v1151_v18 = vadd.f32 %v1150_v54, %v1149_v51 }
 0x175   :  { %v1153_v55 = vsel %vm1152_vm0, %v1018_v9, %v1151_v18 }
 0x176   :  { %1154 = vst [vmem:[%s1973_s3] sm:$0x3] %v1153_v55 }

// kernel: discriminator_forward.12
= control target key start
LH: loop header
LB: loop body
LE: loop exit
PB: predicated region body
PF: predicated region fallthrough
CT: control target
= control target key end

     0   :  { %s423_s0 = inlined_call_operand.vmem [shape: f32[128,128], index: 0, kind: input, shape index: {}]   ;;  %s424_s1 = inlined_call_operand.vmem [shape: f32[1,128], index: 1, kind: input, shape index: {}]   ;;  %s425_s2 = inlined_call_operand.vmem [shape: f32[1,128], index: 2, kind: input, shape index: {}]   ;;  %s426_s3 = inlined_call_operand.vmem [shape: bf16[128,128], index: 3, kind: output, shape index: {}]  }
   0x1   :  { %v14_v0 = vld [vmem:[%s423_s0] sm:$0xff]  ;;  %v15_v1 = vld [vmem:[%s423_s0 + $0x8] sm:$0xff]  ;;  %v16_v6 = vld [vmem:[%s423_s0 + $0x10] sm:$0xff] }
   0x2   :  { %v318_v2 = vld [vmem:[%s424_s1] ss:$0 sm:$0xff]  ;;  %v17_v7 = vld [vmem:[%s423_s0 + $0x18] sm:$0xff]  ;;  %v19_v11 = vld [vmem:[%s423_s0 + $0x28] sm:$0xff] }
   0x3   :  { %v37_v3 = vmul.f32 %v318_v2, %v14_v0  ;;  %v38_v4 = vmul.f32 %v318_v2, %v15_v1  ;;  %v325_v5 = vld [vmem:[%s425_s2] ss:$0 sm:$0xff]  ;;  %v39_v8 = vmul.f32 %v318_v2, %v16_v6  ;;  %v40_v9 = vmul.f32 %v318_v2, %v17_v7  ;;  %v20_v12 = vld [vmem:[%s423_s0 + $0x30] sm:$0xff]  ;;  %v21_v17 = vld [vmem:[%s423_s0 + $0x38] sm:$0xff] }
   0x4   :  { %v18_v10 = vld [vmem:[%s423_s0 + $0x20] sm:$0xff]  ;;  %v42_v16 = vmul.f32 %v318_v2, %v19_v11  ;;  %v43_v20 = vmul.f32 %v318_v2, %v20_v12  ;;  %v44_v21 = vmul.f32 %v318_v2, %v21_v17  ;;  %v23_v35 = vld [vmem:[%s423_s0 + $0x48] sm:$0xff]  ;;  %v24_v36 = vld [vmem:[%s423_s0 + $0x50] sm:$0xff] }
   0x5   :  { %v60_v13 = vadd.f32 %v325_v5, %v37_v3  ;;  %v61_v14 = vadd.f32 %v325_v5, %v38_v4  ;;  %v41_v15 = vmul.f32 %v318_v2, %v18_v10  ;;  %v62_v18 = vadd.f32 %v325_v5, %v39_v8  ;;  %v22_v34 = vld [vmem:[%s423_s0 + $0x40] sm:$0xff]  ;;  %v25_v42 = vld [vmem:[%s423_s0 + $0x58] sm:$0xff]  ;;  %v27_v48 = vld [vmem:[%s423_s0 + $0x68] sm:$0xff] }
   0x6   :  { %v63_v19 = vadd.f32 %v325_v5, %v40_v9  ;;  %v65_v29 = vadd.f32 %v325_v5, %v42_v16  ;;  %v66_v33 = vadd.f32 %v325_v5, %v43_v20  ;;  %v67_v40 = vadd.f32 %v325_v5, %v44_v21  ;;  %v26_v47 = vld [vmem:[%s423_s0 + $0x60] sm:$0xff]  ;;  %v28_v60 = vld [vmem:[%s423_s0 + $0x70] sm:$0xff]  ;;  %v29_v7 = vld [vmem:[%s423_s0 + $0x78] sm:$0xff] }
   0x7   :  { %vm76_vm0 = vcmp.ge.f32.partialorder %v60_v13, 0.0  ;;  %vm77_vm1 = vcmp.ge.f32.partialorder %v61_v14, 0.0  ;;  %v92_v22 = vmul.f32 0.2, %v60_v13  ;;  %v93_v23 = vmul.f32 0.2, %v61_v14 }
   0x8   :  { %vm78_vm2 = vcmp.ge.f32.partialorder %v62_v18, 0.0  ;;  %vm79_vm3 = vcmp.ge.f32.partialorder %v63_v19, 0.0  ;;  %v94_v24 = vmul.f32 0.2, %v62_v18  ;;  %v95_v25 = vmul.f32 0.2, %v63_v19 }
   0x9   :  { %v108_v26 = vsel %vm76_vm0, %v60_v13, %v92_v22  ;;  %v109_v27 = vsel %vm77_vm1, %v61_v14, %v93_v23  ;;  %v64_v28 = vadd.f32 %v325_v5, %v41_v15  ;;  %vm81_vm5 = vcmp.ge.f32.partialorder %v65_v29, 0.0 }
   0xa   :  { %v245_v30 = vpack.c.bf16 %v109_v27, %v108_v26  ;;  %v110_v31 = vsel %vm78_vm2, %v62_v18, %v94_v24  ;;  %v111_v32 = vsel %vm79_vm3, %v63_v19, %v95_v25  ;;  %v97_v39 = vmul.f32 0.2, %v65_v29 }
   0xb   :  { %v250_v37 = vpack.c.bf16 %v111_v32, %v110_v31  ;;  %vm80_vm4 = vcmp.ge.f32.partialorder %v64_v28, 0.0  ;;  %v96_v38 = vmul.f32 0.2, %v64_v28  ;;  %vm82_vm6 = vcmp.ge.f32.partialorder %v66_v33, 0.0 }
   0xc   :  { %246 = vst [vmem:[%s426_s3] sm:$0xff] %v245_v30   ;;  %v98_v41 = vmul.f32 0.2, %v66_v33  ;;  %v45_v44 = vmul.f32 %v318_v2, %v22_v34  ;;  %v46_v45 = vmul.f32 %v318_v2, %v23_v35  ;;  %v47_v46 = vmul.f32 %v318_v2, %v24_v36 }
   0xd   :  { %282 = vst [vmem:[%s426_s3 + $0x8] sm:$0xff] %v250_v37   ;;  %v112_v43 = vsel %vm80_vm4, %v64_v28, %v96_v38  ;;  %v113_v49 = vsel %vm81_vm5, %v65_v29, %v97_v39  ;;  %vm83_vm7 = vcmp.ge.f32.partialorder %v67_v40, 0.0  ;;  %v99_v50 = vmul.f32 0.2, %v67_v40 }
   0xe   :  { %v114_v51 = vsel %vm82_vm6, %v66_v33, %v98_v41  ;;  %v255_v52 = vpack.c.bf16 %v113_v49, %v112_v43  ;;  %v68_v53 = vadd.f32 %v325_v5, %v45_v44  ;;  %v69_v54 = vadd.f32 %v325_v5, %v46_v45 }
   0xf   :  { %v48_v55 = vmul.f32 %v318_v2, %v25_v42  ;;  %v115_v56 = vsel %vm83_vm7, %v67_v40, %v99_v50  ;;  %v70_v57 = vadd.f32 %v325_v5, %v47_v46  ;;  %v49_v58 = vmul.f32 %v318_v2, %v26_v47 }
  0x10   :  { %v50_v59 = vmul.f32 %v318_v2, %v27_v48  ;;  %283 = vst [vmem:[%s426_s3 + $0x10] sm:$0xff] %v255_v52   ;;  %v260_v61 = vpack.c.bf16 %v115_v56, %v114_v51  ;;  %vm84_vm8 = vcmp.ge.f32.partialorder %v68_v53, 0.0  ;;  %vm85_vm9 = vcmp.ge.f32.partialorder %v69_v54, 0.0 }
  0x11   :  { %v100_v62 = vmul.f32 0.2, %v68_v53  ;;  %v101_v63 = vmul.f32 0.2, %v69_v54  ;;  %v71_v0 = vadd.f32 %v325_v5, %v48_v55  ;;  %vm86_vm10 = vcmp.ge.f32.partialorder %v70_v57, 0.0 }
  0x12   :  { %v102_v1 = vmul.f32 0.2, %v70_v57  ;;  %284 = vst [vmem:[%s426_s3 + $0x18] sm:$0xff] %v260_v61   ;;  %v72_v4 = vadd.f32 %v325_v5, %v49_v58  ;;  %v73_v6 = vadd.f32 %v325_v5, %v50_v59  ;;  %v51_v8 = vmul.f32 %v318_v2, %v28_v60 }
  0x13   :  { %v116_v3 = vsel %vm84_vm8, %v68_v53, %v100_v62  ;;  %v117_v9 = vsel %vm85_vm9, %v69_v54, %v101_v63  ;;  %vm87_vm11 = vcmp.ge.f32.partialorder %v71_v0, 0.0  ;;  %v103_v10 = vmul.f32 0.2, %v71_v0 }
  0x14   :  { %v118_v11 = vsel %vm86_vm10, %v70_v57, %v102_v1  ;;  %v265_v12 = vpack.c.bf16 %v117_v9, %v116_v3  ;;  %vm88_vm12 = vcmp.ge.f32.partialorder %v72_v4, 0.0  ;;  %vm89_vm13 = vcmp.ge.f32.partialorder %v73_v6, 0.0 }
  0x15   :  { %v104_v13 = vmul.f32 0.2, %v72_v4  ;;  %v119_v14 = vsel %vm87_vm11, %v71_v0, %v103_v10  ;;  %v105_v15 = vmul.f32 0.2, %v73_v6  ;;  %v52_v16 = vmul.f32 %v318_v2, %v29_v7 }
  0x16   :  { %v74_v17 = vadd.f32 %v325_v5, %v51_v8  ;;  %285 = vst [vmem:[%s426_s3 + $0x20] sm:$0xff] %v265_v12   ;;  %v270_v18 = vpack.c.bf16 %v119_v14, %v118_v11 }
  0x17   :  { %v120_v19 = vsel %vm88_vm12, %v72_v4, %v104_v13  ;;  %v121_v20 = vsel %vm89_vm13, %v73_v6, %v105_v15  ;;  %v75_v21 = vadd.f32 %v325_v5, %v52_v16 }
  0x18   :  { %vm90_vm14 = vcmp.ge.f32.partialorder %v74_v17, 0.0  ;;  %v106_v22 = vmul.f32 0.2, %v74_v17  ;;  %286 = vst [vmem:[%s426_s3 + $0x28] sm:$0xff] %v270_v18   ;;  %v275_v23 = vpack.c.bf16 %v121_v20, %v120_v19 }
  0x19   :  { %vm91_vm15 = vcmp.ge.f32.partialorder %v75_v21, 0.0  ;;  %v107_v2 = vmul.f32 0.2, %v75_v21 }
  0x1a   :  { %v122_v24 = vsel %vm90_vm14, %v74_v17, %v106_v22  ;;  %287 = vst [vmem:[%s426_s3 + $0x30] sm:$0xff] %v275_v23  }
  0x1b   :  { %v123_v25 = vsel %vm91_vm15, %v75_v21, %v107_v2 }
  0x1c   :  { %v280_v26 = vpack.c.bf16 %v123_v25, %v122_v24 }
  0x1e   :  { %288 = vst [vmem:[%s426_s3 + $0x38] sm:$0xff] %v280_v26  }

// kernel: discriminator_forward.11
= control target key start
LH: loop header
LB: loop body
LE: loop exit
PB: predicated region body
PF: predicated region fallthrough
CT: control target
= control target key end

     0   :  { %vm480_vm0 = vcmask 1040384   ;;  %s850_s1 = inlined_call_operand.vmem [shape: bf16[256,128], index: 1, kind: input, shape index: {}]   ;;  %s851_s0 = inlined_call_operand.vmem [shape: bf16[128,256], index: 0, kind: input, shape index: {}]   ;;  %s852_s2 = inlined_call_operand.vmem [shape: f32[128,128], index: 2, kind: output, shape index: {0}]   ;;  %s853_s3 = inlined_call_operand.vmem [shape: f32[1,2,128], index: 3, kind: output, shape index: {1}]  }
   0x1   :  { %v619_v0 = vld [vmem:[%s850_s1 + $0x78] sm:$0xff]   ;;  %v621_v2 = vld [vmem:[%s850_s1 + $0x70] sm:$0xff]   ;;  %v623_v4 = vld [vmem:[%s850_s1 + $0x68] sm:$0xff]  }
   0x2   :  { %v620_v1 = vld [vmem:[%s850_s1 + $0x38] sm:$0xff]   ;;  %539 = vmatprep.subr.bf16.mxu0 %v619_v0  ;;  %603 = vmatprep.subr.bf16.mxu1 %v619_v0  ;;  %v622_v3 = vld [vmem:[%s850_s1 + $0x30] sm:$0xff]   ;;  %v624_v5 = vld [vmem:[%s850_s1 + $0x28] sm:$0xff]  }
   0x3   :  { %540 = vmatpush3.bf16.msra.mxu0 %v620_v1  ;;  %611 = vmatpush3.bf16.msra.mxu1 %v620_v1  ;;  %v625_v6 = vld [vmem:[%s850_s1 + $0x60] sm:$0xff]   ;;  %v627_v8 = vld [vmem:[%s850_s1 + $0x58] sm:$0xff]   ;;  %v629_v10 = vld [vmem:[%s850_s1 + $0x50] sm:$0xff]  }
   0x4   :  { %541 = vmatprep.subr.bf16.mxu0 %v621_v2  ;;  %604 = vmatprep.subr.bf16.mxu1 %v621_v2  ;;  %v626_v7 = vld [vmem:[%s850_s1 + $0x20] sm:$0xff]   ;;  %v628_v9 = vld [vmem:[%s850_s1 + $0x18] sm:$0xff]   ;;  %v630_v12 = vld [vmem:[%s850_s1 + $0x10] sm:$0xff]  }
   0x5   :  { %v637_v11 = vld [vmem:[%s851_s0 + $0x4] ss:$8 sps:$4 sm:$0xff]   ;;  %v635_v18 = vld [vmem:[%s851_s0] ss:$8 sps:$4 sm:$0xff]   ;;  %v638_v20 = vld [vmem:[%s851_s0 + $0x14] ss:$8 sps:$4 sm:$0xff]  }
   0x6   :  { %v643_v13 = vld [vmem:[%s851_s0 + $0x44] ss:$8 sps:$4 sm:$0xff]   ;;  %306 = vmatprep.mubr.bf16.mxu0 %v637_v11  ;;  %v641_v19 = vld [vmem:[%s851_s0 + $0x40] ss:$8 sps:$4 sm:$0xff]   ;;  %v647_v21 = vld [vmem:[%s851_s0 + $0x54] ss:$8 sps:$4 sm:$0xff]  }
   0x7   :  { %542 = vmatpush3.bf16.msra.mxu0 %v622_v3  ;;  %612 = vmatpush3.bf16.msra.mxu1 %v622_v3  ;;  %v631_v14 = vld [vmem:[%s850_s1 + $0x48] sm:$0xff]   ;;  %v633_v16 = vld [vmem:[%s850_s1 + $0x40] sm:$0xff]   ;;  %v640_v22 = vld [vmem:[%s851_s0 + $0x10] ss:$8 sps:$4 sm:$0xff]  }
   0x8   :  { %543 = vmatprep.subr.bf16.mxu0 %v623_v4  ;;  %605 = vmatprep.subr.bf16.mxu1 %v623_v4  ;;  %v632_v15 = vld [vmem:[%s850_s1 + $0x8] sm:$0xff]   ;;  %v634_v17 = vld [vmem:[%s850_s1] sm:$0xff]   ;;  %v649_v23 = vld [vmem:[%s851_s0 + $0x50] ss:$8 sps:$4 sm:$0xff]  }
   0x9   :  { %338 = vmatprep.mubr.bf16.mxu1 %v643_v13  ;;  %v644_v24 = vld [vmem:[%s851_s0 + $0x24] ss:$8 sps:$4 sm:$0xff]   ;;  %v646_v26 = vld [vmem:[%s851_s0 + $0x20] ss:$8 sps:$4 sm:$0xff]   ;;  %v650_v28 = vld [vmem:[%s851_s0 + $0x34] ss:$8 sps:$4 sm:$0xff]  }
   0xa   :  { %v653_v25 = vld [vmem:[%s851_s0 + $0x64] ss:$8 sps:$4 sm:$0xff]   ;;  %v655_v27 = vld [vmem:[%s851_s0 + $0x60] ss:$8 sps:$4 sm:$0xff]   ;;  %v656_v29 = vld [vmem:[%s851_s0 + $0x74] ss:$8 sps:$4 sm:$0xff]  }
   0xb   :  { %544 = vmatpush3.bf16.msra.mxu0 %v624_v5  ;;  %613 = vmatpush3.bf16.msra.mxu1 %v624_v5  ;;  %v652_v30 = vld [vmem:[%s851_s0 + $0x30] ss:$8 sps:$4 sm:$0xff]  }
   0xc   :  { %545 = vmatprep.subr.bf16.mxu0 %v625_v6  ;;  %606 = vmatprep.subr.bf16.mxu1 %v625_v6  ;;  %v658_v31 = vld [vmem:[%s851_s0 + $0x70] ss:$8 sps:$4 sm:$0xff]  }
   0xf   :  { %546 = vmatpush3.bf16.msra.mxu0 %v626_v7  ;;  %614 = vmatpush3.bf16.msra.mxu1 %v626_v7 }
  0x10   :  { %547 = vmatprep.subr.bf16.mxu0 %v627_v8  ;;  %607 = vmatprep.subr.bf16.mxu1 %v627_v8 }
  0x13   :  { %548 = vmatpush3.bf16.msra.mxu0 %v628_v9  ;;  %615 = vmatpush3.bf16.msra.mxu1 %v628_v9 }
  0x14   :  { %549 = vmatprep.subr.bf16.mxu0 %v629_v10  ;;  %608 = vmatprep.subr.bf16.mxu1 %v629_v10 }
  0x17   :  { %550 = vmatpush3.bf16.msra.mxu0 %v630_v12  ;;  %616 = vmatpush3.bf16.msra.mxu1 %v630_v12 }
  0x18   :  { %551 = vmatprep.subr.bf16.mxu0 %v631_v14  ;;  %609 = vmatprep.subr.bf16.mxu1 %v631_v14 }
  0x1b   :  { %552 = vmatpush3.bf16.msra.mxu0 %v632_v15  ;;  %617 = vmatpush3.bf16.msra.mxu1 %v632_v15 }
  0x1c   :  { %553 = vmatprep.subr.bf16.mxu0 %v633_v16  ;;  %610 = vmatprep.subr.bf16.mxu1 %v633_v16 }
  0x1f   :  { %554 = vmatpush3.bf16.msra.mxu0 %v634_v17  ;;  %618 = vmatpush3.bf16.msra.mxu1 %v634_v17 }
  0x22   :  { %307 = vmatmul.mubr.bf16.vlgmr.msra.gmra.mxu0 %v635_v18  ;;  %339 = vmatmul.mubr.bf16.vlgmr.msra.gmra.mxu1 %v641_v19 }
  0x23   :  { %314 = vmatprep.mubr.bf16.mxu0 %v638_v20  ;;  %346 = vmatprep.mubr.bf16.mxu1 %v647_v21 }
  0x2a   :  { %315 = vmatmul.mubr.bf16.gmra.mxu0 %v640_v22  ;;  %347 = vmatmul.mubr.bf16.gmra.mxu1 %v649_v23 }
  0x2b   :  { %322 = vmatprep.mubr.bf16.mxu0 %v644_v24  ;;  %354 = vmatprep.mubr.bf16.mxu1 %v653_v25 }
  0x32   :  { %323 = vmatmul.mubr.bf16.gmra.mxu0 %v646_v26  ;;  %355 = vmatmul.mubr.bf16.gmra.mxu1 %v655_v27 }
  0x33   :  { %330 = vmatprep.mubr.bf16.mxu0 %v650_v28  ;;  %362 = vmatprep.mubr.bf16.mxu1 %v656_v29 }
  0x3a   :  { %331 = vmatmul.mubr.bf16.gmra.mxu0 %v652_v30  ;;  %363 = vmatmul.mubr.bf16.gmra.mxu1 %v658_v31 }
  0xe2   :  { %v555_v32 = vpop.f32.mrf.mxu0  ;;  %v579_v33 = vpop.f32.mrf.mxu1 }
  0xe4   :  { %v556_v34 = vpop.f32.mrf.mxu0  ;;  %v580_v35 = vpop.f32.mrf.mxu1 }
  0xe5   :  { %v557_v36 = vadd.f32 %v556_v34, %v555_v32  ;;  %v775_v37 = vadd.f32 %v580_v35, %v579_v33 }
  0xe6   :  { %v558_v38 = vpop.f32.mrf.mxu0  ;;  %v582_v39 = vpop.f32.mrf.mxu1 }
  0xe7   :  { %483 = vst [vmem:[%s852_s2] sm:$0xff] %v557_v36  ;;  %491 = vst [vmem:[%s852_s2 + $0x40] sm:$0xff] %v775_v37  ;;  %v443_v63 = vmul.f32 %v557_v36, %v557_v36 }
  0xe8   :  { %v559_v40 = vpop.f32.mrf.mxu0  ;;  %v583_v41 = vpop.f32.mrf.mxu1 }
  0xe9   :  { %v560_v42 = vadd.f32 %v559_v40, %v558_v38  ;;  %v784_v43 = vadd.f32 %v583_v41, %v582_v39  ;;  %v451_v38 = vmul.f32 %v775_v37, %v775_v37 }
  0xea   :  { %v561_v44 = vpop.f32.mrf.mxu0  ;;  %v585_v45 = vpop.f32.mrf.mxu1 }
  0xeb   :  { %484 = vst [vmem:[%s852_s2 + $0x8] sm:$0xff] %v560_v42  ;;  %492 = vst [vmem:[%s852_s2 + $0x48] sm:$0xff] %v784_v43  ;;  %v444_v58 = vmul.f32 %v560_v42, %v560_v42  ;;  %v422_v3 = vadd.f32 %v560_v42, %v557_v36  ;;  %v452_v41 = vmul.f32 %v784_v43, %v784_v43 }
  0xec   :  { %v562_v46 = vpop.f32.mrf.mxu0  ;;  %v586_v47 = vpop.f32.mrf.mxu1 }
  0xed   :  { %v563_v48 = vadd.f32 %v562_v46, %v561_v44  ;;  %v793_v49 = vadd.f32 %v586_v47, %v585_v45  ;;  %v459_v4 = vadd.f32 %v444_v58, %v443_v63 }
  0xee   :  { %v564_v50 = vpop.f32.mrf.mxu0  ;;  %v588_v51 = vpop.f32.mrf.mxu1 }
  0xef   :  { %485 = vst [vmem:[%s852_s2 + $0x10] sm:$0xff] %v563_v48  ;;  %493 = vst [vmem:[%s852_s2 + $0x50] sm:$0xff] %v793_v49  ;;  %v445_v0 = vmul.f32 %v563_v48, %v563_v48  ;;  %v423_v8 = vadd.f32 %v563_v48, %v422_v3  ;;  %v453_v45 = vmul.f32 %v793_v49, %v793_v49 }
  0xf0   :  { %v565_v52 = vpop.f32.mrf.mxu0  ;;  %v589_v53 = vpop.f32.mrf.mxu1 }
  0xf1   :  { %v566_v54 = vadd.f32 %v565_v52, %v564_v50  ;;  %v802_v55 = vadd.f32 %v589_v53, %v588_v51  ;;  %v460_v11 = vadd.f32 %v459_v4, %v445_v0 }
  0xf2   :  { %v567_v56 = vpop.f32.mrf.mxu0  ;;  %v591_v57 = vpop.f32.mrf.mxu1 }
  0xf3   :  { %486 = vst [vmem:[%s852_s2 + $0x18] sm:$0xff] %v566_v54  ;;  %494 = vst [vmem:[%s852_s2 + $0x58] sm:$0xff] %v802_v55  ;;  %v446_v5 = vmul.f32 %v566_v54, %v566_v54  ;;  %v424_v14 = vadd.f32 %v566_v54, %v423_v8  ;;  %v454_v48 = vmul.f32 %v802_v55, %v802_v55 }
  0xf4   :  { %v568_v59 = vpop.f32.mrf.mxu0  ;;  %v592_v60 = vpop.f32.mrf.mxu1 }
  0xf5   :  { %v569_v61 = vadd.f32 %v568_v59, %v567_v56  ;;  %v593_v62 = vadd.f32 %v592_v60, %v591_v57  ;;  %v461_v16 = vadd.f32 %v460_v11, %v446_v5 }
  0xf6   :  { %v570_v1 = vpop.f32.mrf.mxu0  ;;  %v594_v2 = vpop.f32.mrf.mxu1 }
  0xf7   :  { %487 = vst [vmem:[%s852_s2 + $0x20] sm:$0xff] %v569_v61  ;;  %495 = vst [vmem:[%s852_s2 + $0x60] sm:$0xff] %v593_v62  ;;  %v447_v15 = vmul.f32 %v569_v61, %v569_v61  ;;  %v425_v19 = vadd.f32 %v569_v61, %v424_v14 }
  0xf8   :  { %v571_v6 = vpop.f32.mrf.mxu0  ;;  %v595_v7 = vpop.f32.mrf.mxu1 }
  0xf9   :  { %v572_v9 = vadd.f32 %v571_v6, %v570_v1  ;;  %v596_v10 = vadd.f32 %v595_v7, %v594_v2  ;;  %v462_v25 = vadd.f32 %v461_v16, %v447_v15 }
  0xfa   :  { %v573_v12 = vpop.f32.mrf.mxu0  ;;  %v597_v13 = vpop.f32.mrf.mxu1 }
  0xfb   :  { %488 = vst [vmem:[%s852_s2 + $0x28] sm:$0xff] %v572_v9  ;;  %496 = vst [vmem:[%s852_s2 + $0x68] sm:$0xff] %v596_v10  ;;  %v448_v20 = vmul.f32 %v572_v9, %v572_v9  ;;  %v426_v26 = vadd.f32 %v572_v9, %v425_v19  ;;  %v456_v56 = vmul.f32 %v596_v10, %v596_v10 }
  0xfc   :  { %v574_v17 = vpop.f32.mrf.mxu0  ;;  %v598_v18 = vpop.f32.mrf.mxu1 }
  0xfd   :  { %v575_v21 = vadd.f32 %v574_v17, %v573_v12  ;;  %v599_v22 = vadd.f32 %v598_v18, %v597_v13  ;;  %v463_v30 = vadd.f32 %v462_v25, %v448_v20 }
  0xfe   :  { %v576_v23 = vpop.f32.mrf.mxu0  ;;  %v600_v24 = vpop.f32.mrf.mxu1 }
  0xff   :  { %v449_v27 = vmul.f32 %v575_v21, %v575_v21  ;;  %489 = vst [vmem:[%s852_s2 + $0x30] sm:$0xff] %v575_v21  ;;  %497 = vst [vmem:[%s852_s2 + $0x70] sm:$0xff] %v599_v22  ;;  %v427_v31 = vadd.f32 %v575_v21, %v426_v26  ;;  %v457_v59 = vmul.f32 %v599_v22, %v599_v22 }
 0x100   :  { %v577_v28 = vpop.f32.mrf.mxu0  ;;  %v601_v29 = vpop.f32.mrf.mxu1 }
 0x101   :  { %v578_v32 = vadd.f32 %v577_v28, %v576_v23  ;;  %v602_v33 = vadd.f32 %v601_v29, %v600_v24  ;;  %v464_v34 = vadd.f32 %v463_v30, %v449_v27 }
 0x103   :  { %v428_v35 = vadd.f32 %v578_v32, %v427_v31  ;;  %v450_v36 = vmul.f32 %v578_v32, %v578_v32  ;;  %490 = vst [vmem:[%s852_s2 + $0x38] sm:$0xff] %v578_v32  ;;  %498 = vst [vmem:[%s852_s2 + $0x78] sm:$0xff] %v602_v33  ;;  %v458_v63 = vmul.f32 %v602_v33, %v602_v33 }
 0x105   :  { %v429_v39 = vadd.f32 %v775_v37, %v428_v35  ;;  %v465_v40 = vadd.f32 %v464_v34, %v450_v36  ;;  %v455_v37 = vmul.f32 %v593_v62, %v593_v62 }
 0x107   :  { %v430_v42 = vadd.f32 %v784_v43, %v429_v39  ;;  %v466_v44 = vadd.f32 %v465_v40, %v451_v38 }
 0x109   :  { %v467_v46 = vadd.f32 %v466_v44, %v452_v41  ;;  %v431_v47 = vadd.f32 %v793_v49, %v430_v42 }
 0x10b   :  { %v432_v50 = vadd.f32 %v802_v55, %v431_v47  ;;  %v468_v51 = vadd.f32 %v467_v46, %v453_v45 }
 0x10d   :  { %v433_v52 = vadd.f32 %v593_v62, %v432_v50  ;;  %v469_v53 = vadd.f32 %v468_v51, %v454_v48 }
 0x10f   :  { %v434_v54 = vadd.f32 %v596_v10, %v433_v52  ;;  %v470_v57 = vadd.f32 %v469_v53, %v455_v37 }
 0x111   :  { %v471_v43 = vadd.f32 %v470_v57, %v456_v56  ;;  %v435_v58 = vadd.f32 %v599_v22, %v434_v54 }
 0x113   :  { %v472_v60 = vadd.f32 %v471_v43, %v457_v59  ;;  %v436_v61 = vadd.f32 %v602_v33, %v435_v58 }
 0x115   :  { %v437_v0 = vrot.slane %v436_v61, 4  ;;  %v473_v49 = vadd.f32 %v472_v60, %v458_v63 }
 0x117   :  { %v438_v1 = vadd.f32 %v437_v0, %v436_v61  ;;  %v474_v2 = vrot.slane %v473_v49, 4 }
 0x119   :  { %v439_v3 = vrot.slane %v438_v1, 2  ;;  %v475_v4 = vadd.f32 %v474_v2, %v473_v49 }
 0x11b   :  { %v440_v55 = vadd.f32 %v439_v3, %v438_v1  ;;  %v476_v5 = vrot.slane %v475_v4, 2 }
 0x11d   :  { %v441_v6 = vrot.slane %v440_v55, 1  ;;  %v477_v62 = vadd.f32 %v476_v5, %v475_v4 }
 0x11f   :  { %v478_v7 = vrot.slane %v477_v62, 1  ;;  %v442_v8 = vadd.f32 %v441_v6, %v440_v55 }
 0x121   :  { %v479_v9 = vadd.f32 %v478_v7, %v477_v62 }
 0x123   :  { %v481_v10 = vsel %vm480_vm0, %v442_v8, %v479_v9 }
 0x124   :  { %482 = vst [vmem:[%s853_s3] sm:$0x3] %v481_v10 }

// kernel: discriminator_forward.14
= control target key start
LH: loop header
LB: loop body
LE: loop exit
PB: predicated region body
PF: predicated region fallthrough
CT: control target
= control target key end

     0   :  { %s141_s0 = inlined_call_operand.vmem [shape: f32[32,128], index: 0, kind: input, shape index: {}]   ;;  %s142_s1 = inlined_call_operand.vmem [shape: f32[1,128], index: 1, kind: input, shape index: {}]   ;;  %s143_s2 = inlined_call_operand.vmem [shape: f32[1,128], index: 2, kind: input, shape index: {}]   ;;  %s144_s3 = inlined_call_operand.vmem [shape: bf16[32,128], index: 3, kind: output, shape index: {}]  }
   0x1   :  { %v14_v0 = vld [vmem:[%s141_s0] sm:$0xff]  ;;  %v15_v1 = vld [vmem:[%s141_s0 + $0x8] sm:$0xff]  ;;  %v16_v6 = vld [vmem:[%s141_s0 + $0x10] sm:$0xff] }
   0x2   :  { %v76_v2 = vld [vmem:[%s142_s1] ss:$0 sm:$0xff]  ;;  %v17_v7 = vld [vmem:[%s141_s0 + $0x18] sm:$0xff] }
   0x3   :  { %v25_v3 = vmul.f32 %v76_v2, %v14_v0  ;;  %v26_v4 = vmul.f32 %v76_v2, %v15_v1  ;;  %v77_v5 = vld [vmem:[%s143_s2] ss:$0 sm:$0xff]  ;;  %v27_v8 = vmul.f32 %v76_v2, %v16_v6  ;;  %v28_v9 = vmul.f32 %v76_v2, %v17_v7 }
   0x5   :  { %v36_v10 = vadd.f32 %v77_v5, %v25_v3  ;;  %v37_v11 = vadd.f32 %v77_v5, %v26_v4  ;;  %v38_v12 = vadd.f32 %v77_v5, %v27_v8  ;;  %v39_v13 = vadd.f32 %v77_v5, %v28_v9 }
   0x7   :  { %vm40_vm0 = vcmp.ge.f32.partialorder %v36_v10, 0.0  ;;  %vm41_vm1 = vcmp.ge.f32.partialorder %v37_v11, 0.0  ;;  %v44_v14 = vmul.f32 0.2, %v36_v10  ;;  %v45_v15 = vmul.f32 0.2, %v37_v11 }
   0x8   :  { %vm42_vm2 = vcmp.ge.f32.partialorder %v38_v12, 0.0  ;;  %vm43_vm3 = vcmp.ge.f32.partialorder %v39_v13, 0.0  ;;  %v46_v16 = vmul.f32 0.2, %v38_v12  ;;  %v47_v17 = vmul.f32 0.2, %v39_v13 }
   0x9   :  { %v48_v18 = vsel %vm40_vm0, %v36_v10, %v44_v14  ;;  %v49_v19 = vsel %vm41_vm1, %v37_v11, %v45_v15 }
   0xa   :  { %v89_v20 = vpack.c.bf16 %v49_v19, %v48_v18  ;;  %v50_v21 = vsel %vm42_vm2, %v38_v12, %v46_v16  ;;  %v51_v22 = vsel %vm43_vm3, %v39_v13, %v47_v17 }
   0xb   :  { %v94_v23 = vpack.c.bf16 %v51_v22, %v50_v21 }
   0xc   :  { %90 = vst [vmem:[%s144_s3] sm:$0xff] %v89_v20  }
   0xd   :  { %96 = vst [vmem:[%s144_s3 + $0x8] sm:$0xff] %v94_v23  }

// kernel: discriminator_forward.13
= control target key start
LH: loop header
LB: loop body
LE: loop exit
PB: predicated region body
PF: predicated region fallthrough
CT: control target
= control target key end

     0   :  { %vm465_vm0 = vcmask 1040384   ;;  %s775_s1 = inlined_call_operand.vmem [shape: bf16[512,128], index: 1, kind: input, shape index: {}]   ;;  %s776_s0 = inlined_call_operand.vmem [shape: bf16[32,512], index: 0, kind: input, shape index: {}]   ;;  %s777_s2 = inlined_call_operand.vmem [shape: f32[32,128], index: 2, kind: output, shape index: {0}]   ;;  %s778_s3 = inlined_call_operand.vmem [shape: f32[1,2,128], index: 3, kind: output, shape index: {1}]  }
   0x1   :  { %v576_v0 = vld [vmem:[%s775_s1 + $0x78] sm:$0xff]   ;;  %v580_v4 = vld [vmem:[%s775_s1 + $0x70] sm:$0xff]   ;;  %v584_v8 = vld [vmem:[%s775_s1 + $0x68] sm:$0xff]  }
   0x2   :  { %v577_v1 = vld [vmem:[%s775_s1 + $0xf8] sm:$0xff]   ;;  %520 = vmatprep.subr.bf16.mxu0 %v576_v0  ;;  %v581_v5 = vld [vmem:[%s775_s1 + $0xf0] sm:$0xff]   ;;  %v585_v9 = vld [vmem:[%s775_s1 + $0xe8] sm:$0xff]  }
   0x3   :  { %v578_v2 = vld [vmem:[%s775_s1 + $0x38] sm:$0xff]   ;;  %548 = vmatprep.subr.bf16.mxu1 %v577_v1  ;;  %v582_v6 = vld [vmem:[%s775_s1 + $0x30] sm:$0xff]   ;;  %v586_v10 = vld [vmem:[%s775_s1 + $0x28] sm:$0xff]  }
   0x4   :  { %v579_v3 = vld [vmem:[%s775_s1 + $0xb8] sm:$0xff]   ;;  %521 = vmatpush3.bf16.msra.mxu0 %v578_v2  ;;  %v583_v7 = vld [vmem:[%s775_s1 + $0xb0] sm:$0xff]   ;;  %v587_v11 = vld [vmem:[%s775_s1 + $0xa8] sm:$0xff]  }
   0x5   :  { %549 = vmatpush3.bf16.msra.mxu1 %v579_v3  ;;  %522 = vmatprep.subr.bf16.mxu0 %v580_v4  ;;  %v588_v12 = vld [vmem:[%s775_s1 + $0x60] sm:$0xff]   ;;  %v592_v16 = vld [vmem:[%s775_s1 + $0x58] sm:$0xff]   ;;  %v596_v20 = vld [vmem:[%s775_s1 + $0x50] sm:$0xff]  }
   0x6   :  { %550 = vmatprep.subr.bf16.mxu1 %v581_v5  ;;  %v589_v13 = vld [vmem:[%s775_s1 + $0xe0] sm:$0xff]   ;;  %v593_v17 = vld [vmem:[%s775_s1 + $0xd8] sm:$0xff]   ;;  %v597_v21 = vld [vmem:[%s775_s1 + $0xd0] sm:$0xff]  }
   0x7   :  { %v590_v14 = vld [vmem:[%s775_s1 + $0x20] sm:$0xff]   ;;  %v594_v18 = vld [vmem:[%s775_s1 + $0x18] sm:$0xff]   ;;  %v598_v22 = vld [vmem:[%s775_s1 + $0x10] sm:$0xff]  }
   0x8   :  { %523 = vmatpush3.bf16.msra.mxu0 %v582_v6  ;;  %v591_v15 = vld [vmem:[%s775_s1 + $0xa0] sm:$0xff]   ;;  %v595_v19 = vld [vmem:[%s775_s1 + $0x98] sm:$0xff]   ;;  %v599_v23 = vld [vmem:[%s775_s1 + $0x90] sm:$0xff]  }
   0x9   :  { %551 = vmatpush3.bf16.msra.mxu1 %v583_v7  ;;  %524 = vmatprep.subr.bf16.mxu0 %v584_v8  ;;  %v600_v24 = vld [vmem:[%s775_s1 + $0x48] sm:$0xff]   ;;  %v604_v28 = vld [vmem:[%s775_s1 + $0x40] sm:$0xff]  }
   0xa   :  { %552 = vmatprep.subr.bf16.mxu1 %v585_v9  ;;  %v601_v25 = vld [vmem:[%s775_s1 + $0xc8] sm:$0xff]   ;;  %v605_v29 = vld [vmem:[%s775_s1 + $0xc0] sm:$0xff]  }
   0xb   :  { %v602_v26 = vld [vmem:[%s775_s1 + $0x8] sm:$0xff]   ;;  %v606_v30 = vld [vmem:[%s775_s1] sm:$0xff]  }
   0xc   :  { %525 = vmatpush3.bf16.msra.mxu0 %v586_v10  ;;  %v603_v27 = vld [vmem:[%s775_s1 + $0x88] sm:$0xff]   ;;  %v607_v31 = vld [vmem:[%s775_s1 + $0x80] sm:$0xff]  }
   0xd   :  { %553 = vmatpush3.bf16.msra.mxu1 %v587_v11  ;;  %526 = vmatprep.subr.bf16.mxu0 %v588_v12  ;;  %v608_v32 = vld [vmem:[%s776_s0] ss:$16 sps:$4 sm:$0xff]   ;;  %v610_v33 = vld [vmem:[%s776_s0 + $0x4] ss:$16 sps:$4 sm:$0xff]   ;;  %v611_v34 = vld [vmem:[%s776_s0 + $0x8] ss:$16 sps:$4 sm:$0xff]  }
   0xe   :  { %554 = vmatprep.subr.bf16.mxu1 %v589_v13  ;;  %v613_v35 = vld [vmem:[%s776_s0 + $0xc] ss:$16 sps:$4 sm:$0xff]   ;;  %362 = vmatprep.mubr.bf16.mxu0 %v610_v33  ;;  %v614_v36 = vld [vmem:[%s776_s0 + $0x24] ss:$16 sps:$4 sm:$0xff]   ;;  %v618_v38 = vld [vmem:[%s776_s0 + $0x20] ss:$16 sps:$4 sm:$0xff]  }
   0xf   :  { %411 = vmatprep.mubr.bf16.mxu1 %v613_v35  ;;  %v616_v37 = vld [vmem:[%s776_s0 + $0x2c] ss:$16 sps:$4 sm:$0xff]   ;;  %v619_v39 = vld [vmem:[%s776_s0 + $0x28] ss:$16 sps:$4 sm:$0xff]  }
  0x10   :  { %527 = vmatpush3.bf16.msra.mxu0 %v590_v14 }
  0x11   :  { %555 = vmatpush3.bf16.msra.mxu1 %v591_v15  ;;  %528 = vmatprep.subr.bf16.mxu0 %v592_v16 }
  0x12   :  { %556 = vmatprep.subr.bf16.mxu1 %v593_v17 }
  0x14   :  { %529 = vmatpush3.bf16.msra.mxu0 %v594_v18 }
  0x15   :  { %557 = vmatpush3.bf16.msra.mxu1 %v595_v19  ;;  %530 = vmatprep.subr.bf16.mxu0 %v596_v20 }
  0x16   :  { %558 = vmatprep.subr.bf16.mxu1 %v597_v21 }
  0x18   :  { %531 = vmatpush3.bf16.msra.mxu0 %v598_v22 }
  0x19   :  { %559 = vmatpush3.bf16.msra.mxu1 %v599_v23  ;;  %532 = vmatprep.subr.bf16.mxu0 %v600_v24 }
  0x1a   :  { %560 = vmatprep.subr.bf16.mxu1 %v601_v25 }
  0x1c   :  { %533 = vmatpush3.bf16.msra.mxu0 %v602_v26 }
  0x1d   :  { %561 = vmatpush3.bf16.msra.mxu1 %v603_v27  ;;  %534 = vmatprep.subr.bf16.mxu0 %v604_v28 }
  0x1e   :  { %562 = vmatprep.subr.bf16.mxu1 %v605_v29 }
  0x20   :  { %535 = vmatpush3.bf16.msra.mxu0 %v606_v30 }
  0x21   :  { %563 = vmatpush3.bf16.msra.mxu1 %v607_v31 }
  0x23   :  { %363 = vmatmul.mubr.bf16.vlgmr.msra.gmra.mxu0 %v608_v32 }
  0x24   :  { %412 = vmatmul.mubr.bf16.vlgmr.msra.gmra.mxu1 %v611_v34  ;;  %370 = vmatprep.mubr.bf16.mxu0 %v614_v36 }
  0x25   :  { %419 = vmatprep.mubr.bf16.mxu1 %v616_v37 }
  0x2b   :  { %371 = vmatmul.mubr.bf16.gmra.mxu0 %v618_v38 }
  0x2c   :  { %420 = vmatmul.mubr.bf16.gmra.mxu1 %v619_v39 }
  0xe3   :  { %v536_v40 = vpop.f32.mrf.mxu0 }
  0xe4   :  { %v564_v41 = vpop.f32.mrf.mxu1 }
  0xe5   :  { %v537_v42 = vpop.f32.mrf.mxu0 }
  0xe6   :  { %v538_v43 = vadd.f32 %v537_v42, %v536_v40  ;;  %v565_v44 = vpop.f32.mrf.mxu1 }
  0xe7   :  { %v566_v45 = vadd.f32 %v565_v44, %v564_v41  ;;  %v539_v46 = vpop.f32.mrf.mxu0 }
  0xe8   :  { %v567_v47 = vpop.f32.mrf.mxu1 }
  0xe9   :  { %v414_v48 = vadd.f32 %v566_v45, %v538_v43  ;;  %v540_v49 = vpop.f32.mrf.mxu0 }
  0xea   :  { %v541_v50 = vadd.f32 %v540_v49, %v539_v46  ;;  %v568_v51 = vpop.f32.mrf.mxu1 }
  0xeb   :  { %468 = vst [vmem:[%s777_s2] sm:$0xff] %v414_v48  ;;  %v569_v52 = vadd.f32 %v568_v51, %v567_v47  ;;  %v542_v53 = vpop.f32.mrf.mxu0  ;;  %v452_v3 = vmul.f32 %v414_v48, %v414_v48 }
  0xec   :  { %v570_v54 = vpop.f32.mrf.mxu1 }
  0xed   :  { %v417_v55 = vadd.f32 %v569_v52, %v541_v50  ;;  %v543_v56 = vpop.f32.mrf.mxu0 }
  0xee   :  { %v544_v57 = vadd.f32 %v543_v56, %v542_v53  ;;  %v571_v58 = vpop.f32.mrf.mxu1 }
  0xef   :  { %469 = vst [vmem:[%s777_s2 + $0x8] sm:$0xff] %v417_v55  ;;  %v572_v59 = vadd.f32 %v571_v58, %v570_v54  ;;  %v545_v60 = vpop.f32.mrf.mxu0  ;;  %v453_v62 = vmul.f32 %v417_v55, %v417_v55  ;;  %v443_v4 = vadd.f32 %v417_v55, %v414_v48 }
  0xf0   :  { %v573_v61 = vpop.f32.mrf.mxu1 }
  0xf1   :  { %v422_v63 = vadd.f32 %v572_v59, %v544_v57  ;;  %v546_v0 = vpop.f32.mrf.mxu0  ;;  %v456_v7 = vadd.f32 %v453_v62, %v452_v3 }
  0xf2   :  { %v547_v1 = vadd.f32 %v546_v0, %v545_v60  ;;  %v574_v2 = vpop.f32.mrf.mxu1 }
  0xf3   :  { %v454_v5 = vmul.f32 %v422_v63, %v422_v63  ;;  %470 = vst [vmem:[%s777_s2 + $0x10] sm:$0xff] %v422_v63  ;;  %v575_v6 = vadd.f32 %v574_v2, %v573_v61  ;;  %v444_v8 = vadd.f32 %v443_v4, %v422_v63 }
  0xf5   :  { %v425_v9 = vadd.f32 %v575_v6, %v547_v1  ;;  %v457_v10 = vadd.f32 %v456_v7, %v454_v5 }
  0xf7   :  { %v445_v11 = vadd.f32 %v444_v8, %v425_v9  ;;  %v455_v12 = vmul.f32 %v425_v9, %v425_v9  ;;  %471 = vst [vmem:[%s777_s2 + $0x18] sm:$0xff] %v425_v9 }
  0xf9   :  { %v446_v13 = vrot.slane %v445_v11, 4  ;;  %v458_v14 = vadd.f32 %v457_v10, %v455_v12 }
  0xfb   :  { %v447_v15 = vadd.f32 %v446_v13, %v445_v11  ;;  %v459_v16 = vrot.slane %v458_v14, 4 }
  0xfd   :  { %v448_v17 = vrot.slane %v447_v15, 2  ;;  %v460_v18 = vadd.f32 %v459_v16, %v458_v14 }
  0xff   :  { %v449_v19 = vadd.f32 %v448_v17, %v447_v15  ;;  %v461_v20 = vrot.slane %v460_v18, 2 }
 0x101   :  { %v450_v21 = vrot.slane %v449_v19, 1  ;;  %v462_v22 = vadd.f32 %v461_v20, %v460_v18 }
 0x103   :  { %v463_v23 = vrot.slane %v462_v22, 1  ;;  %v451_v24 = vadd.f32 %v450_v21, %v449_v19 }
 0x105   :  { %v464_v25 = vadd.f32 %v463_v23, %v462_v22 }
 0x107   :  { %v466_v26 = vsel %vm465_vm0, %v451_v24, %v464_v25 }
 0x108   :  { %467 = vst [vmem:[%s778_s3] sm:$0x3] %v466_v26 }

// kernel: discriminator_forward.15
= control target key start
LH: loop header
LB: loop body
LE: loop exit
PB: predicated region body
PF: predicated region fallthrough
CT: control target
= control target key end

     0   :  { %9 = vsyncpa [#allocation4], 0  ;;  %s948_s12 = smov 0   ;;  %s950_s13 = smov 0   ;;  %s1046_s0 = inlined_call_operand.vmem [shape: bf16[8,1024], index: 0, kind: input, shape index: {}]   ;;  %s1047_s1 = inlined_call_operand.vmem [shape: bf16[1024,128], index: 1, kind: input, shape index: {}]   ;;  %s1048_s2 = inlined_call_operand.vmem [shape: f32[8,128], index: 2, kind: output, shape index: {0}]   ;;  %s1049_s3 = inlined_call_operand.hbm [shape: f32[1,2,128], index: 3, kind: output, shape index: {1}]  }
   0x1   :  { %s952_s14 = smov 0  }
   0x2 LB: > { %s711_s15 = sadd.s32 4294967295, %s924_s14   ;;  %s24_s16 = sadd.s32 1, %s920_s13  ;;  %s924_s14 = sphi %s952_s14, %s15_s14   ;;  %s920_s13 = sphi %s950_s13, %s1052_s13   ;;  %s916_s12 = sphi %s948_s12, %s1051_s12  }
   0x3   : > { %p25_p0 = scmp.ge.s32.totalorder %s24_s16, 2  ;;  %p714_p1 = scmp.ge.s32.totalorder %s924_s14, 1 }
   0x4   : > { %p171_p2 = scmp.lt.s32.totalorder %s924_s14, 3 }
   0x5   : > { %s1054_s16 = smov (%p25_p0, %s24_s16), 0 }
   0x6   : > { %p172_p3 = pnand %p714_p1, %p171_p2 }
   0x7   : > { %s715_s17 = sshll.u32 (!%p172_p3), %s916_s12, 2  ;;  %s717_s18 = sshll.u32 (!%p172_p3), %s916_s12, 6 }
   0x8   : > { %175 = sbr.rel (%p172_p3) target bundleno = 298 (0x12a), region = 28  ;;  %p206_p4 = scmp.lt.s32.totalorder (!%p172_p3), %s715_s17, 7 }
   0x9   : > { %p214_p5 = scmp.lt.s32.totalorder (!%p172_p3), %s717_s18, 127  ;;  %p719_p6 = scmp.ne.s32.totalorder (!%p172_p3), %s916_s12, 0 }
   0xd   : > { %s1056_s17 = smov (!%p206_p4, %s715_s17), 7  ;;  %s1058_s18 = smov (!%p214_p5, %s717_s18), 127 }
   0xe   : > { %s716_s19 = sshll.u32 %s1056_s17, 2  ;;  %s718_s23 = sshll.u32 %s1058_s18, 2 }
   0xf   : > { %s974_s22 = scalar_lea.vmem %s1046_s0, %s716_s19  ;;  %s979_s26 = scalar_lea.vmem %s1047_s1, %s718_s23 }
  0x10   : > { %227 = sbr.rel (%p719_p6) target bundleno = 23 (0x17), region = 32 }
  0x15   : > { %v926_v0 = vmov 0.0  }
  0x16   : > { %228 = vst [vmem:[#allocation2] sm:$0xff] %v926_v0 }
  0x17 PF: > { %v838_v1 = vld [vmem:[%s979_s26 + $0x78] sm:$0xff]   ;;  %v842_v5 = vld [vmem:[%s979_s26 + $0x70] sm:$0xff]   ;;  %v846_v9 = vld [vmem:[%s979_s26 + $0x68] sm:$0xff]   ;;  %p756_p7 = scmp.ne.s32.totalorder %s916_s12, 1 }
  0x18   : > { %v839_v2 = vld [vmem:[%s979_s26 + $0xf8] sm:$0xff]   ;;  %762 = vmatprep.subr.bf16.mxu0 %v838_v1  ;;  %v843_v6 = vld [vmem:[%s979_s26 + $0xf0] sm:$0xff]   ;;  %v847_v10 = vld [vmem:[%s979_s26 + $0xe8] sm:$0xff]  }
  0x19   : > { %v840_v3 = vld [vmem:[%s979_s26 + $0x38] sm:$0xff]   ;;  %784 = vmatprep.subr.bf16.mxu1 %v839_v2  ;;  %v844_v7 = vld [vmem:[%s979_s26 + $0x30] sm:$0xff]   ;;  %v848_v11 = vld [vmem:[%s979_s26 + $0x28] sm:$0xff]  }
  0x1a   : > { %v841_v4 = vld [vmem:[%s979_s26 + $0xb8] sm:$0xff]   ;;  %763 = vmatpush3.bf16.msra.mxu0 %v840_v3  ;;  %v845_v8 = vld [vmem:[%s979_s26 + $0xb0] sm:$0xff]   ;;  %v849_v12 = vld [vmem:[%s979_s26 + $0xa8] sm:$0xff]  }
  0x1b   : > { %785 = vmatpush3.bf16.msra.mxu1 %v841_v4  ;;  %764 = vmatprep.subr.bf16.mxu0 %v842_v5  ;;  %v850_v13 = vld [vmem:[%s979_s26 + $0x60] sm:$0xff]   ;;  %v854_v17 = vld [vmem:[%s979_s26 + $0x58] sm:$0xff]   ;;  %v858_v21 = vld [vmem:[%s979_s26 + $0x50] sm:$0xff]  }
  0x1c   : > { %786 = vmatprep.subr.bf16.mxu1 %v843_v6  ;;  %v851_v14 = vld [vmem:[%s979_s26 + $0xe0] sm:$0xff]   ;;  %v855_v18 = vld [vmem:[%s979_s26 + $0xd8] sm:$0xff]   ;;  %v859_v22 = vld [vmem:[%s979_s26 + $0xd0] sm:$0xff]  }
  0x1d   : > { %v852_v15 = vld [vmem:[%s979_s26 + $0x20] sm:$0xff]   ;;  %v856_v19 = vld [vmem:[%s979_s26 + $0x18] sm:$0xff]   ;;  %v860_v23 = vld [vmem:[%s979_s26 + $0x10] sm:$0xff]  }
  0x1e   : > { %765 = vmatpush3.bf16.msra.mxu0 %v844_v7  ;;  %v853_v16 = vld [vmem:[%s979_s26 + $0xa0] sm:$0xff]   ;;  %v857_v20 = vld [vmem:[%s979_s26 + $0x98] sm:$0xff]   ;;  %v861_v24 = vld [vmem:[%s979_s26 + $0x90] sm:$0xff]  }
  0x1f   : > { %787 = vmatpush3.bf16.msra.mxu1 %v845_v8  ;;  %766 = vmatprep.subr.bf16.mxu0 %v846_v9  ;;  %v862_v25 = vld [vmem:[%s979_s26 + $0x48] sm:$0xff]   ;;  %v866_v29 = vld [vmem:[%s979_s26 + $0x40] sm:$0xff]  }
  0x20   : > { %788 = vmatprep.subr.bf16.mxu1 %v847_v10  ;;  %v863_v26 = vld [vmem:[%s979_s26 + $0xc8] sm:$0xff]   ;;  %v867_v30 = vld [vmem:[%s979_s26 + $0xc0] sm:$0xff]  }
  0x21   : > { %v864_v27 = vld [vmem:[%s979_s26 + $0x8] sm:$0xff]   ;;  %v868_v31 = vld [vmem:[%s979_s26] sm:$0xff]  }
  0x22   : > { %767 = vmatpush3.bf16.msra.mxu0 %v848_v11  ;;  %v865_v28 = vld [vmem:[%s979_s26 + $0x88] sm:$0xff]   ;;  %v869_v32 = vld [vmem:[%s979_s26 + $0x80] sm:$0xff]  }
  0x23   : > { %789 = vmatpush3.bf16.msra.mxu1 %v849_v12  ;;  %768 = vmatprep.subr.bf16.mxu0 %v850_v13  ;;  %v230_v33 = vld [vmem:[%s974_s22] sm:$0xff]  ;;  %v231_v34 = vld [vmem:[%s974_s22 + $0x8] sm:$0xff] }
  0x24   : > { %790 = vmatprep.subr.bf16.mxu1 %v851_v14  ;;  %v720_v35 = vcombine.low %v230_v33, %v230_v33  ;;  %v721_v36 = vcombine.high %v230_v33, %v230_v33  ;;  %v722_v37 = vcombine.low %v231_v34, %v231_v34  ;;  %v723_v38 = vcombine.high %v231_v34, %v231_v34  ;;  %v229_v45 = vld [vmem:[#allocation2] sm:$0xff] }
  0x26   : > { %769 = vmatpush3.bf16.msra.mxu0 %v852_v15  ;;  %534 = vmatprep.mubr.bf16.mxu0 %v721_v36 }
  0x27   : > { %791 = vmatpush3.bf16.msra.mxu1 %v853_v16  ;;  %770 = vmatprep.subr.bf16.mxu0 %v854_v17 }
  0x28   : > { %792 = vmatprep.subr.bf16.mxu1 %v855_v18  ;;  %574 = vmatprep.mubr.bf16.mxu1 %v723_v38 }
  0x2a   : > { %771 = vmatpush3.bf16.msra.mxu0 %v856_v19 }
  0x2b   : > { %793 = vmatpush3.bf16.msra.mxu1 %v857_v20  ;;  %772 = vmatprep.subr.bf16.mxu0 %v858_v21 }
  0x2c   : > { %794 = vmatprep.subr.bf16.mxu1 %v859_v22 }
  0x2e   : > { %773 = vmatpush3.bf16.msra.mxu0 %v860_v23 }
  0x2f   : > { %795 = vmatpush3.bf16.msra.mxu1 %v861_v24  ;;  %774 = vmatprep.subr.bf16.mxu0 %v862_v25 }
  0x30   : > { %796 = vmatprep.subr.bf16.mxu1 %v863_v26 }
  0x32   : > { %775 = vmatpush3.bf16.msra.mxu0 %v864_v27 }
  0x33   : > { %797 = vmatpush3.bf16.msra.mxu1 %v865_v28  ;;  %776 = vmatprep.subr.bf16.mxu0 %v866_v29 }
  0x34   : > { %798 = vmatprep.subr.bf16.mxu1 %v867_v30 }
  0x36   : > { %777 = vmatpush3.bf16.msra.mxu0 %v868_v31 }
  0x37   : > { %799 = vmatpush3.bf16.msra.mxu1 %v869_v32 }
  0x39   : > { %535 = vmatmul.mubr.bf16.vlgmr.msra.gmra.mxu0 %v720_v35 }
  0x3a   : > { %575 = vmatmul.mubr.bf16.vlgmr.msra.gmra.mxu1 %v722_v37 }
  0xf9   : > { %v778_v39 = vpop.f32.mrf.mxu0 }
  0xfa   : > { %v800_v40 = vpop.f32.mrf.mxu1 }
  0xfb   : > { %v779_v41 = vpop.f32.mrf.mxu0 }
  0xfc   : > { %v801_v42 = vpop.f32.mrf.mxu1  ;;  %v780_v43 = vadd.f32 %v779_v41, %v778_v39 }
  0xfd   : > { %v802_v44 = vadd.f32 %v801_v42, %v800_v40  ;;  %v781_v46 = vpop.f32.mrf.mxu0 }
  0xfe   : > { %v803_v47 = vpop.f32.mrf.mxu1 }
  0xff   : > { %v577_v48 = vadd.f32 %v802_v44, %v780_v43  ;;  %v782_v49 = vpop.f32.mrf.mxu0  ;;  %587 = sbr.rel (%p756_p7) target bundleno = 283 (0x11b), region = 36 }
 0x100   : > { %v804_v50 = vpop.f32.mrf.mxu1 }
 0x101   : > { %v582_v51 = vadd.f32 %v577_v48, %v229_v45 }
 0x103   : > { %583 = vst [vmem:[#allocation2] sm:$0xff] %v582_v51 }
 0x104   : > { %vm602_vm0 = vcmask 1040384  }
 0x10a   : > { %v588_v52 = vld [vmem:[#allocation2] sm:$0xff] }
 0x10b   : > { %v589_v53 = vrot.slane %v588_v52, 4  ;;  %v595_v54 = vmul.f32 %v588_v52, %v588_v52  ;;  %605 = vst [vmem:[%s1048_s2] sm:$0xff] %v588_v52 }
 0x10d   : > { %v590_v55 = vadd.f32 %v589_v53, %v588_v52  ;;  %v596_v56 = vrot.slane %v595_v54, 4 }
 0x10f   : > { %v591_v57 = vrot.slane %v590_v55, 2  ;;  %v597_v58 = vadd.f32 %v596_v56, %v595_v54 }
 0x111   : > { %v592_v59 = vadd.f32 %v591_v57, %v590_v55  ;;  %v598_v60 = vrot.slane %v597_v58, 2 }
 0x113   : > { %v593_v61 = vrot.slane %v592_v59, 1  ;;  %v599_v62 = vadd.f32 %v598_v60, %v597_v58 }
 0x115   : > { %v594_v63 = vadd.f32 %v593_v61, %v592_v59  ;;  %v600_v0 = vrot.slane %v599_v62, 1 }
 0x117   : > { %v601_v1 = vadd.f32 %v600_v0, %v599_v62 }
 0x119   : > { %v603_v2 = vsel %vm602_vm0, %v594_v63, %v601_v1 }
 0x11a   : > { %604 = vst [vmem:[#allocation3] sm:$0x3] %v603_v2 }
 0x11b PF: > { %p1022_p8 = scmp.eq.s32.totalorder %s711_s15, 1  ;;  %s927_s30 = smov [#allocation3]  }
 0x11c   : > { %s622_s4 = sshll.u32 %s927_s30, 4  ;;  %s623_s4 = int_to_ptr.vmem [resolvable:$true] %s622_s4 }
 0x11d   : > { %s874_s5 = scalar_lea.vmem %s623_s4, 32  ;;  %p881_p12 = scmp.lt.s32.totalorder %s623_s4, %s623_s4 }
 0x11e   : > { %p875_p9 = scmp.ne.s32.totalorder %s623_s4, %s874_s5  ;;  %p882_p13 = scmp.lt.s32.totalorder %s874_s5, %s874_s5 }
 0x120   : > { %p876_p10 = pnand %p875_p9, %p1022_p8  ;;  %p883_p0 = por %p882_p13, %p881_p12 }
 0x122   : > { %p877_p11 = pneg %p876_p10 }
 0x124   : > { %p884_p1 = pnand %p883_p0, %p877_p11 }
 0x126   : > { %887 = shalt.err (!%p884_p1)
}
 0x127   : > { %807 = dma.vmem_to_hbm [thread:$0]  (%p1022_p8), %s623_s4, 32, %s1049_s3, [#allocation4]  }
 0x128   : > { %911 = dma.done.wait (%p1022_p8), [#allocation4], 32  }
 0x129   : > { %913 = vsyncadd (%p1022_p8), [#allocation4], 4294967264 }
 0x12a PF: > { %s15_s14 = sadd.s32 1, %s924_s14   ;;  %s1051_s12 = smov %s920_s13 }
 0x12b   : > { %p12_p2 = scmp.ge.s32.totalorder %s15_s14, 4   ;;  %s1052_s13 = smov %s1054_s16 }
 0x12d   :  { %14 = sbr.rel (!%p12_p2) target bundleno = 2 (0x2), region = 79 }
 0x132   :  { %642 = vsyncpa [#allocation4], 1 }
 0x133   :  { %644 = vsyncpa [#allocation4 + $0x1], 1 }

</bundles_post_ra>
